<compile_context>
chip_gen: v6e
topology: v6e:2x2x1
jax: 0.10.0
libtpu: 0.0.40
codegen_flags: <defaults>
</compile_context>

<pallas_src>
import functools

import jax
import jax.numpy as jnp
from jax import lax
from jax.experimental import pallas as pl
from jax.experimental.pallas import tpu as pltpu


# Stand-in for -inf in the max pool's border exclusion.  Finite so the 1x1
# conv applied to masked halo rows never produces inf/NaN; those rows are
# re-masked before every pooling pass and never reach valid outputs.
_NEG = -1e30


def _crp_kernel(x_hi_ref, x_mid_ref, x_lo_ref, w_ref, o_ref, *,
                n_stages, halo, h_img, w_img, compute_dtype):
    """Fused CRP chain for one (batch, row-tile) grid step.

    x_hi_ref : (halo, Wp, C) rows [tile_start-halo, tile_start)       (clamped at top)
    x_mid_ref: (TH,   Wp, C) rows [tile_start, tile_start+TH)
    x_lo_ref : (halo, Wp, C) rows [tile_start+TH, tile_start+TH+halo) (clamped at bottom)
    w_ref    : (n_stages, C, C) stacked 1x1-conv weights (C_in, C_out)
    o_ref    : (TH, Wp, C)
    """
    th, w_pad, c = o_ref.shape
    window_rows = th + 2 * halo
    tile_start = pl.program_id(1) * th
    neg = jnp.asarray(_NEG, dtype=compute_dtype)

    # Residual accumulator lives in an f32 value; o_ref is written exactly once.
    x_mid = x_mid_ref[...]
    acc = x_mid.astype(jnp.float32)

    # Working window rows [tile_start - halo, tile_start + th + halo).
    top = jnp.concatenate(
        [x_hi_ref[...].astype(compute_dtype),
         x_mid.astype(compute_dtype),
         x_lo_ref[...].astype(compute_dtype)], axis=0)

    # Row validity of the stage-0 window, computed once; stage i uses the
    # static slice [2*i : 2*i + rows] (the window shrinks by 4 rows / stage).
    row0 = tile_start - halo + lax.broadcasted_iota(
        jnp.int32, (window_rows, 1, 1), 0)
    row_ok = jnp.logical_and(row0 >= 0, row0 < h_img)

    use_roll = jnp.dtype(compute_dtype).itemsize == 4        # static
    need_col = use_roll or (w_pad != w_img)
    if need_col:
        col = lax.broadcasted_iota(jnp.int32, (1, w_pad, 1), 1)
    if use_roll:
        # (shift, edge-mask) for the W taps at offsets +1, +2, -1, -2.
        w_taps = ((w_pad - 1, col < (w_img - 1)),
                  (w_pad - 2, col < (w_img - 2)),
                  (1,         col >= 1),
                  (2,         col >= 2))

    for i in range(n_stages):                     # static -> fully unrolled
        rows = window_rows - 4 * i
        # Out-of-image rows behave like MaxPool2d's implicit -inf padding.
        t = jnp.where(row_ok[2 * i:2 * i + rows], top, neg)
        if (not use_roll) and (w_pad != w_img):
            t = jnp.where(col < w_img, t, neg)    # exclude padded W columns

        # ---- 5-tap max along H: row-offset slices on the untiled dim -------
        out_rows = rows - 4
        p = t[0:out_rows]
        for dh in range(1, 5):
            p = jnp.maximum(p, t[dh:dh + out_rows])

        # ---- 5-tap max along W ---------------------------------------------
        if use_roll:
            # XLU rotations + edge masks (edge/padded taps act like -inf pad).
            m = p
            for shift, mask in w_taps:
                m = jnp.maximum(
                    m, jnp.where(mask, pltpu.roll(p, shift=shift, axis=1), neg))
        else:
            # 16-bit path: padded slab + shifted slices (packed sublane
            # rotates are not a universally supported Mosaic lowering).
            pw = jnp.pad(p, ((0, 0), (2, 2), (0, 0)), constant_values=_NEG)
            m = p
            for dw in (0, 1, 3, 4):
                m = jnp.maximum(m, pw[:, dw:dw + w_pad, :])

        # ---- 1x1 conv == channel matmul on the MXU, f32 accumulate ----------
        # TODO(synk): for C < 128 the MXU/lane utilization is poor; a
        # W-on-lanes VPU broadcast-MAC layout would be faster for tiny C.
        y = jnp.dot(
            m.reshape(out_rows * w_pad, c).astype(w_ref.dtype),
            w_ref[i],
            preferred_element_type=jnp.float32,
        ).reshape(out_rows, w_pad, c)

        # ---- residual: only the central `th` rows belong to this tile ------
        off = halo - 2 * (i + 1)
        acc = acc + y[off:off + th]

        if i + 1 < n_stages:
            top = y.astype(compute_dtype)         # feeds the next stage's pool

    o_ref[...] = acc.astype(o_ref.dtype)


def _pick_tile_rows(h, halo, w, c, in_itemsize, pool_itemsize, vmem_budget,
                    n_batch, min_steps=8):
    """Output rows per tile: a multiple of `halo`, sized so the in-kernel
    temporaries + double-buffered blocks fit `vmem_budget`, then shrunk (when
    the image allows) so the grid has >= min_steps steps for megacore +
    DMA/compute overlap."""
    cdiv = lambda a, b: -(-a // b)
    h_cover = cdiv(h, halo) * halo
    # Bytes scaling with tile rows: double-buffered in/out blocks, ~6 live
    # pooling temporaries in the compute dtype, f32 accumulator + f32 conv out.
    per_row = w * c * (4 * in_itemsize + 6 * pool_itemsize + 8)
    fixed = 2 * halo * w * c * (2 * in_itemsize + 6 * pool_itemsize + 4)
    th = ((max(vmem_budget - fixed, 0) // per_row) // halo) * halo
    th = max(halo, min(th, h_cover))
    if n_batch * cdiv(h_cover, th) < min_steps and h_cover > halo:
        want_h = min(h_cover // halo, cdiv(min_steps, n_batch))
        th = min(th, max(halo, ((h_cover // want_h) // halo) * halo))
    return int(th)


def crp_block(x_nchw, weights, n_stages, *,
              compute_dtype=jnp.bfloat16, matmul_dtype=None):
    """Run CRPBlock.

    x_nchw:        (N, C, H, W) input (PyTorch layout).
    weights:       list of n_stages (C_out, C_in) 1x1-conv weights (C_in==C_out).
    compute_dtype: pooling / working dtype.  bf16 is the recommended v6e/v7x
                   setting; pass jnp.float32 on v5e (no bf16 VPU path).
    matmul_dtype:  MXU operand dtype (defaults to compute_dtype); accumulation
                   is always f32.
    """
    N, C, H, W = x_nchw.shape
    if n_stages == 0:
        return x_nchw
    for wt in weights:
        assert wt.shape == (C, C), "CRPBlock residual add needs C_in == C_out"
    if matmul_dtype is None:
        matmul_dtype = compute_dtype

    halo = 2 * n_stages
    cdiv = lambda a, b: -(-a // b)

    # Glue: NCHW -> NHWC (channels on lanes); weights -> (S, C_in, C_out).
    x = jnp.transpose(x_nchw, (0, 2, 3, 1))
    w_stack = jnp.stack([jnp.transpose(wt) for wt in weights],
                        axis=0).astype(matmul_dtype)

    # Pad W to a sublane multiple so in-kernel slices / reshapes stay aligned.
    w_pad = cdiv(W, 8) * 8
    if w_pad != W:
        x = jnp.pad(x, ((0, 0), (0, 0), (0, w_pad - W), (0, 0)))

    # ---- generation-aware tile / VMEM sizing --------------------------------
    try:
        vmem_cap = int(pltpu.get_tpu_info().vmem_capacity_bytes)
    except Exception:                       # pragma: no cover - conservative
        vmem_cap = 64 * 1024 * 1024         # v7x per-TensorCore size
    in_itemsize = x.dtype.itemsize
    pool_itemsize = jnp.dtype(compute_dtype).itemsize
    th = _pick_tile_rows(H, halo, w_pad, C, in_itemsize, pool_itemsize,
                         vmem_budget=vmem_cap // 2, n_batch=N)

    h_pad = cdiv(H, th) * th
    if h_pad != H:
        # Padding rows are masked inside the kernel (h_img = true H).
        x = jnp.pad(x, ((0, 0), (0, h_pad - H), (0, 0), (0, 0)))
    num_h = h_pad // th
    rb = th // halo                          # tile size in halo-block units
    nhb = h_pad // halo                      # number of halo blocks along H
    window_rows = th + 2 * halo

    kernel = functools.partial(_crp_kernel, n_stages=n_stages, halo=halo,
                               h_img=H, w_img=W, compute_dtype=compute_dtype)

    # VMEM request: estimated footprint with headroom, capped at 75% of the
    # physical capacity (~48 MiB on v7x, ~96 MiB on v5e/v6e).
    est = (2 * window_rows * w_pad * C * in_itemsize        # in blocks, x2 buf
           + 2 * th * w_pad * C * in_itemsize               # out block, x2 buf
           + 2 * n_stages * C * C * jnp.dtype(matmul_dtype).itemsize
           + 6 * window_rows * w_pad * C * pool_itemsize    # pooling temps
           + 8 * th * w_pad * C)                            # f32 acc + f32 conv
    vmem_limit = int(min(max(2 * est, 32 * 1024 * 1024), (3 * vmem_cap) // 4))

    cost = pl.CostEstimate(
        flops=int(2 * N * n_stages * num_h * window_rows * w_pad * C * C),
        transcendentals=0,
        bytes_accessed=int(in_itemsize * N * w_pad * C * (2 * h_pad + 2 * halo * num_h)
                           + n_stages * C * C * jnp.dtype(matmul_dtype).itemsize),
    )

    out = pl.pallas_call(
        kernel,
        out_shape=jax.ShapeDtypeStruct((N, h_pad, w_pad, C), x.dtype),
        grid_spec=pltpu.PrefetchScalarGridSpec(
            num_scalar_prefetch=0,
            grid=(N, num_h),
            in_specs=[
                # Halo rows above the tile (block index clamped at the top
                # edge; out-of-image rows are re-masked inside the kernel).
                pl.BlockSpec((None, halo, w_pad, C),
                             lambda b, h: (b, jnp.maximum(h * rb - 1, 0), 0, 0)),
                # The tile itself.
                pl.BlockSpec((None, th, w_pad, C), lambda b, h: (b, h, 0, 0)),
                # Halo rows below the tile (clamped at the bottom edge).
                pl.BlockSpec((None, halo, w_pad, C),
                             lambda b, h: (b, jnp.minimum(h * rb + rb, nhb - 1), 0, 0)),
                # Stacked 1x1-conv weights: constant block index -> DMA'd once.
                # TODO(synk): pipeline_mode=pl.Buffered(1) would drop the dead
                # second weight buffer once supported by the top-level
                # pallas_call pipeliner on all target JAX versions.
                pl.BlockSpec((n_stages, C, C), lambda b, h: (0, 0, 0)),
            ],
            out_specs=pl.BlockSpec((None, th, w_pad, C), lambda b, h: (b, h, 0, 0)),
        ),
        compiler_params=pltpu.CompilerParams(
            dimension_semantics=("parallel", "parallel"),
            vmem_limit_bytes=vmem_limit,
        ),
        cost_estimate=cost,
    )(x, x, x, w_stack)

    out = out[:, :H, :W]
    # Glue: NHWC -> NCHW to match the PyTorch output layout.
    return jnp.transpose(out, (0, 3, 1, 2))


def crp_block_reference(x_nchw, weights, n_stages):
    """Pure-JAX f32 reference matching the PyTorch forward exactly."""
    neg_inf = jnp.array(-jnp.inf, dtype=x_nchw.dtype)
    N, C, H, W = x_nchw.shape
    top = x_nchw
    x = x_nchw
    for i in range(n_stages):
        padded = jnp.pad(top, ((0, 0), (0, 0), (2, 2), (2, 2)),
                         constant_values=neg_inf)
        pooled = jnp.full_like(top, neg_inf)
        for dh in range(5):
            for dw in range(5):
                pooled = jnp.maximum(pooled, padded[:, :, dh:dh + H, dw:dw + W])
        top = jnp.einsum('oc,nchw->nohw', weights[i], pooled,
                         precision=lax.Precision.HIGHEST)
        x = top + x
    return x


if __name__ == "__main__":
    key = jax.random.PRNGKey(0)

    # Small shapes consistent with the module (residual needs C_in == C_out).
    N, C, H, W = 2, 4, 16, 16
    n_stages = 4

    key, kx = jax.random.split(key)
    x = jax.random.normal(kx, (N, C, H, W), dtype=jnp.float32)

    weights = []
    for i in range(n_stages):
        key, kw = jax.random.split(key)
        weights.append(jax.random.normal(kw, (C, C), dtype=jnp.float32) * 0.1)

    ref = crp_block_reference(x, weights, n_stages)

    # 1) f32 compute path: tight check of the tiling / halo / pooling / roll
    #    structure (this is also the recommended v5e configuration).
    out_f32 = jax.block_until_ready(
        crp_block(x, weights, n_stages, compute_dtype=jnp.float32))
    assert out_f32.shape == (N, C, H, W)
    err_f32 = float(jnp.max(jnp.abs(out_f32 - ref)))
    assert jnp.allclose(out_f32, ref, atol=5e-3, rtol=5e-3), err_f32

    # 2) default bf16 compute path: bf16 pooling + bf16-operand / f32-accumulate
    #    matmul with an f32 residual accumulator (recommended on v6e/v7x).
    out_bf16 = jax.block_until_ready(crp_block(x, weights, n_stages))
    assert out_bf16.shape == (N, C, H, W)
    err_bf16 = float(jnp.max(jnp.abs(out_bf16 - ref)))
    assert jnp.allclose(out_bf16, ref, atol=1e-1, rtol=1e-1), err_bf16

    print("KERNEL_OK")
</pallas_src>

<mosaic_0001>
module attributes {stable_mosaic.version = 11 : i64} {
  func.func @_crp_kernel(%arg0: i32, %arg1: i32, %arg2: memref<1x8x16x4xf32, #tpu.memory_space<vmem>>, %arg3: memref<1x8x16x4xf32, #tpu.memory_space<vmem>>, %arg4: memref<1x8x16x4xf32, #tpu.memory_space<vmem>>, %arg5: memref<4x4x4xf32, #tpu.memory_space<vmem>>, %arg6: memref<1x8x16x4xf32, #tpu.memory_space<vmem>>) attributes {dimension_semantics = [#tpu.dimension_semantics<parallel>, #tpu.dimension_semantics<parallel>], iteration_bounds = array<i64: 2, 2>, scalar_prefetch = 0 : i64, scratch_operands = 0 : i64, tpu.core_type = #tpu.core_type<tc>, window_params = [{transform_indices = @transform_0, window_bounds = array<i64: 1, 8, 16, 4>}, {transform_indices = @transform_1, window_bounds = array<i64: 1, 8, 16, 4>}, {transform_indices = @transform_2, window_bounds = array<i64: 1, 8, 16, 4>}, {pipeline_mode = #tpu.pipeline_mode<synchronous>, transform_indices = @transform_3, window_bounds = array<i64: 4, 4, 4>}, {transform_indices = @transform_4, window_bounds = array<i64: 1, 8, 16, 4>}]} {
    %c8_i32 = arith.constant 8 : i32
    %0 = arith.muli %arg1, %c8_i32 : i32
    %c0 = arith.constant 0 : index
    %c0_0 = arith.constant 0 : index
    %c0_1 = arith.constant 0 : index
    %c0_2 = arith.constant 0 : index
    %1 = vector.load %arg3[%c0, %c0_0, %c0_1, %c0_2] : memref<1x8x16x4xf32, #tpu.memory_space<vmem>>, vector<1x8x16x4xf32>
    %2 = vector.shape_cast %1 : vector<1x8x16x4xf32> to vector<8x16x4xf32>
    %c0_3 = arith.constant 0 : index
    %c0_4 = arith.constant 0 : index
    %c0_5 = arith.constant 0 : index
    %c0_6 = arith.constant 0 : index
    %3 = vector.load %arg2[%c0_3, %c0_4, %c0_5, %c0_6] : memref<1x8x16x4xf32, #tpu.memory_space<vmem>>, vector<1x8x16x4xf32>
    %4 = vector.shape_cast %3 : vector<1x8x16x4xf32> to vector<8x16x4xf32>
    %c0_7 = arith.constant 0 : index
    %c0_8 = arith.constant 0 : index
    %c0_9 = arith.constant 0 : index
    %c0_10 = arith.constant 0 : index
    %5 = vector.load %arg4[%c0_7, %c0_8, %c0_9, %c0_10] : memref<1x8x16x4xf32, #tpu.memory_space<vmem>>, vector<1x8x16x4xf32>
    %6 = vector.shape_cast %5 : vector<1x8x16x4xf32> to vector<8x16x4xf32>
    %7 = tpu.concatenate %4, %2, %6 in 0 : vector<8x16x4xf32>, vector<8x16x4xf32>, vector<8x16x4xf32> -> vector<24x16x4xf32>
    %c8_i32_11 = arith.constant 8 : i32
    %8 = arith.subi %0, %c8_i32_11 : i32
    %9 = tpu.iota {dimensions = array<i32: 0>} : vector<24x1x1xi32>
    %10 = vector.broadcast %8 : i32 to vector<24x1x1xi32>
    %11 = arith.addi %10, %9 : vector<24x1x1xi32>
    %c0_i32 = arith.constant 0 : i32
    %12 = vector.broadcast %c0_i32 : i32 to vector<24x1x1xi32>
    %13 = arith.cmpi sge, %11, %12 : vector<24x1x1xi32>
    %c16_i32 = arith.constant 16 : i32
    %14 = vector.broadcast %c16_i32 : i32 to vector<24x1x1xi32>
    %15 = arith.cmpi slt, %11, %14 : vector<24x1x1xi32>
    %16 = arith.andi %13, %15 : vector<24x1x1xi1>
    %17 = tpu.iota {dimensions = array<i32: 1>} : vector<1x16x1xi32>
    %c15_i32 = arith.constant 15 : i32
    %18 = vector.broadcast %c15_i32 : i32 to vector<1x16x1xi32>
    %19 = arith.cmpi slt, %17, %18 : vector<1x16x1xi32>
    %c14_i32 = arith.constant 14 : i32
    %20 = vector.broadcast %c14_i32 : i32 to vector<1x16x1xi32>
    %21 = arith.cmpi slt, %17, %20 : vector<1x16x1xi32>
    %c1_i32 = arith.constant 1 : i32
    %22 = vector.broadcast %c1_i32 : i32 to vector<1x16x1xi32>
    %23 = arith.cmpi sge, %17, %22 : vector<1x16x1xi32>
    %c2_i32 = arith.constant 2 : i32
    %24 = vector.broadcast %c2_i32 : i32 to vector<1x16x1xi32>
    %25 = arith.cmpi sge, %17, %24 : vector<1x16x1xi32>
    %cst = arith.constant -1.000000e+30 : f32
    %26 = vector.shape_cast %16 : vector<24x1x1xi1> to vector<24x1x1xi1>
    %27 = vector.broadcast %26 : vector<24x1x1xi1> to vector<24x16x4xi1>
    %28 = vector.broadcast %cst : f32 to vector<24x16x4xf32>
    %29 = arith.select %27, %7, %28 : vector<24x16x4xi1>, vector<24x16x4xf32>
    %30 = vector.extract_strided_slice %29 {offsets = [0, 0, 0], sizes = [20, 16, 4], strides = [1, 1, 1]} : vector<24x16x4xf32> to vector<20x16x4xf32>
    %31 = vector.extract_strided_slice %29 {offsets = [1, 0, 0], sizes = [20, 16, 4], strides = [1, 1, 1]} : vector<24x16x4xf32> to vector<20x16x4xf32>
    %32 = arith.maximumf %30, %31 : vector<20x16x4xf32>
    %33 = vector.extract_strided_slice %29 {offsets = [2, 0, 0], sizes = [20, 16, 4], strides = [1, 1, 1]} : vector<24x16x4xf32> to vector<20x16x4xf32>
    %34 = arith.maximumf %32, %33 : vector<20x16x4xf32>
    %35 = vector.extract_strided_slice %29 {offsets = [3, 0, 0], sizes = [20, 16, 4], strides = [1, 1, 1]} : vector<24x16x4xf32> to vector<20x16x4xf32>
    %36 = arith.maximumf %34, %35 : vector<20x16x4xf32>
    %37 = vector.extract_strided_slice %29 {offsets = [4, 0, 0], sizes = [20, 16, 4], strides = [1, 1, 1]} : vector<24x16x4xf32> to vector<20x16x4xf32>
    %38 = arith.maximumf %36, %37 : vector<20x16x4xf32>
    %c15_i32_12 = arith.constant 15 : i32
    %39 = tpu.dynamic_rotate %38 by %c15_i32_12 dim 1 : vector<20x16x4xf32>, i32 -> vector<20x16x4xf32>
    %cst_13 = arith.constant -1.000000e+30 : f32
    %40 = vector.shape_cast %19 : vector<1x16x1xi1> to vector<1x16x1xi1>
    %41 = vector.broadcast %40 : vector<1x16x1xi1> to vector<20x16x4xi1>
    %42 = vector.broadcast %cst_13 : f32 to vector<20x16x4xf32>
    %43 = arith.select %41, %39, %42 : vector<20x16x4xi1>, vector<20x16x4xf32>
    %44 = arith.maximumf %38, %43 : vector<20x16x4xf32>
    %c14_i32_14 = arith.constant 14 : i32
    %45 = tpu.dynamic_rotate %38 by %c14_i32_14 dim 1 : vector<20x16x4xf32>, i32 -> vector<20x16x4xf32>
    %cst_15 = arith.constant -1.000000e+30 : f32
    %46 = vector.shape_cast %21 : vector<1x16x1xi1> to vector<1x16x1xi1>
    %47 = vector.broadcast %46 : vector<1x16x1xi1> to vector<20x16x4xi1>
    %48 = vector.broadcast %cst_15 : f32 to vector<20x16x4xf32>
    %49 = arith.select %47, %45, %48 : vector<20x16x4xi1>, vector<20x16x4xf32>
    %50 = arith.maximumf %44, %49 : vector<20x16x4xf32>
    %c1_i32_16 = arith.constant 1 : i32
    %51 = tpu.dynamic_rotate %38 by %c1_i32_16 dim 1 : vector<20x16x4xf32>, i32 -> vector<20x16x4xf32>
    %cst_17 = arith.constant -1.000000e+30 : f32
    %52 = vector.shape_cast %23 : vector<1x16x1xi1> to vector<1x16x1xi1>
    %53 = vector.broadcast %52 : vector<1x16x1xi1> to vector<20x16x4xi1>
    %54 = vector.broadcast %cst_17 : f32 to vector<20x16x4xf32>
    %55 = arith.select %53, %51, %54 : vector<20x16x4xi1>, vector<20x16x4xf32>
    %56 = arith.maximumf %50, %55 : vector<20x16x4xf32>
    %c2_i32_18 = arith.constant 2 : i32
    %57 = tpu.dynamic_rotate %38 by %c2_i32_18 dim 1 : vector<20x16x4xf32>, i32 -> vector<20x16x4xf32>
    %cst_19 = arith.constant -1.000000e+30 : f32
    %58 = vector.shape_cast %25 : vector<1x16x1xi1> to vector<1x16x1xi1>
    %59 = vector.broadcast %58 : vector<1x16x1xi1> to vector<20x16x4xi1>
    %60 = vector.broadcast %cst_19 : f32 to vector<20x16x4xf32>
    %61 = arith.select %59, %57, %60 : vector<20x16x4xi1>, vector<20x16x4xf32>
    %62 = arith.maximumf %56, %61 : vector<20x16x4xf32>
    %63 = vector.shape_cast %62 : vector<20x16x4xf32> to vector<320x4xf32>
    %c0_20 = arith.constant 0 : index
    %c0_21 = arith.constant 0 : index
    %c0_22 = arith.constant 0 : index
    %64 = vector.load %arg5[%c0_20, %c0_21, %c0_22] : memref<4x4x4xf32, #tpu.memory_space<vmem>>, vector<1x4x4xf32>
    %65 = vector.shape_cast %64 : vector<1x4x4xf32> to vector<4x4xf32>
    %cst_23 = arith.constant dense<0.000000e+00> : vector<320x4xf32>
    %66 = tpu.matmul %63, %65, %cst_23 {dimension_numbers = #tpu.dot_dimension_numbers<[1], [0], [0], [1], [0, 0, 1, 1], [], []>} : vector<320x4xf32>, vector<4x4xf32>, vector<320x4xf32> -> vector<320x4xf32>
    %67 = vector.shape_cast %66 : vector<320x4xf32> to vector<20x16x4xf32>
    %68 = vector.extract_strided_slice %67 {offsets = [6, 0, 0], sizes = [8, 16, 4], strides = [1, 1, 1]} : vector<20x16x4xf32> to vector<8x16x4xf32>
    %69 = arith.addf %2, %68 : vector<8x16x4xf32>
    %70 = vector.extract_strided_slice %16 {offsets = [2, 0, 0], sizes = [20, 1, 1], strides = [1, 1, 1]} : vector<24x1x1xi1> to vector<20x1x1xi1>
    %cst_24 = arith.constant -1.000000e+30 : f32
    %71 = vector.shape_cast %70 : vector<20x1x1xi1> to vector<20x1x1xi1>
    %72 = vector.broadcast %71 : vector<20x1x1xi1> to vector<20x16x4xi1>
    %73 = vector.broadcast %cst_24 : f32 to vector<20x16x4xf32>
    %74 = arith.select %72, %67, %73 : vector<20x16x4xi1>, vector<20x16x4xf32>
    %75 = vector.extract_strided_slice %74 {offsets = [0, 0, 0], sizes = [16, 16, 4], strides = [1, 1, 1]} : vector<20x16x4xf32> to vector<16x16x4xf32>
    %76 = vector.extract_strided_slice %74 {offsets = [1, 0, 0], sizes = [16, 16, 4], strides = [1, 1, 1]} : vector<20x16x4xf32> to vector<16x16x4xf32>
    %77 = arith.maximumf %75, %76 : vector<16x16x4xf32>
    %78 = vector.extract_strided_slice %74 {offsets = [2, 0, 0], sizes = [16, 16, 4], strides = [1, 1, 1]} : vector<20x16x4xf32> to vector<16x16x4xf32>
    %79 = arith.maximumf %77, %78 : vector<16x16x4xf32>
    %80 = vector.extract_strided_slice %74 {offsets = [3, 0, 0], sizes = [16, 16, 4], strides = [1, 1, 1]} : vector<20x16x4xf32> to vector<16x16x4xf32>
    %81 = arith.maximumf %79, %80 : vector<16x16x4xf32>
    %82 = vector.extract_strided_slice %74 {offsets = [4, 0, 0], sizes = [16, 16, 4], strides = [1, 1, 1]} : vector<20x16x4xf32> to vector<16x16x4xf32>
    %83 = arith.maximumf %81, %82 : vector<16x16x4xf32>
    %c15_i32_25 = arith.constant 15 : i32
    %84 = tpu.dynamic_rotate %83 by %c15_i32_25 dim 1 : vector<16x16x4xf32>, i32 -> vector<16x16x4xf32>
    %cst_26 = arith.constant -1.000000e+30 : f32
    %85 = vector.shape_cast %19 : vector<1x16x1xi1> to vector<1x16x1xi1>
    %86 = vector.broadcast %85 : vector<1x16x1xi1> to vector<16x16x4xi1>
    %87 = vector.broadcast %cst_26 : f32 to vector<16x16x4xf32>
    %88 = arith.select %86, %84, %87 : vector<16x16x4xi1>, vector<16x16x4xf32>
    %89 = arith.maximumf %83, %88 : vector<16x16x4xf32>
    %c14_i32_27 = arith.constant 14 : i32
    %90 = tpu.dynamic_rotate %83 by %c14_i32_27 dim 1 : vector<16x16x4xf32>, i32 -> vector<16x16x4xf32>
    %cst_28 = arith.constant -1.000000e+30 : f32
    %91 = vector.shape_cast %21 : vector<1x16x1xi1> to vector<1x16x1xi1>
    %92 = vector.broadcast %91 : vector<1x16x1xi1> to vector<16x16x4xi1>
    %93 = vector.broadcast %cst_28 : f32 to vector<16x16x4xf32>
    %94 = arith.select %92, %90, %93 : vector<16x16x4xi1>, vector<16x16x4xf32>
    %95 = arith.maximumf %89, %94 : vector<16x16x4xf32>
    %c1_i32_29 = arith.constant 1 : i32
    %96 = tpu.dynamic_rotate %83 by %c1_i32_29 dim 1 : vector<16x16x4xf32>, i32 -> vector<16x16x4xf32>
    %cst_30 = arith.constant -1.000000e+30 : f32
    %97 = vector.shape_cast %23 : vector<1x16x1xi1> to vector<1x16x1xi1>
    %98 = vector.broadcast %97 : vector<1x16x1xi1> to vector<16x16x4xi1>
    %99 = vector.broadcast %cst_30 : f32 to vector<16x16x4xf32>
    %100 = arith.select %98, %96, %99 : vector<16x16x4xi1>, vector<16x16x4xf32>
    %101 = arith.maximumf %95, %100 : vector<16x16x4xf32>
    %c2_i32_31 = arith.constant 2 : i32
    %102 = tpu.dynamic_rotate %83 by %c2_i32_31 dim 1 : vector<16x16x4xf32>, i32 -> vector<16x16x4xf32>
    %cst_32 = arith.constant -1.000000e+30 : f32
    %103 = vector.shape_cast %25 : vector<1x16x1xi1> to vector<1x16x1xi1>
    %104 = vector.broadcast %103 : vector<1x16x1xi1> to vector<16x16x4xi1>
    %105 = vector.broadcast %cst_32 : f32 to vector<16x16x4xf32>
    %106 = arith.select %104, %102, %105 : vector<16x16x4xi1>, vector<16x16x4xf32>
    %107 = arith.maximumf %101, %106 : vector<16x16x4xf32>
    %108 = vector.shape_cast %107 : vector<16x16x4xf32> to vector<256x4xf32>
    %c1 = arith.constant 1 : index
    %c0_33 = arith.constant 0 : index
    %c0_34 = arith.constant 0 : index
    %109 = vector.load %arg5[%c1, %c0_33, %c0_34] : memref<4x4x4xf32, #tpu.memory_space<vmem>>, vector<1x4x4xf32>
    %110 = vector.shape_cast %109 : vector<1x4x4xf32> to vector<4x4xf32>
    %cst_35 = arith.constant dense<0.000000e+00> : vector<256x4xf32>
    %111 = tpu.matmul %108, %110, %cst_35 {dimension_numbers = #tpu.dot_dimension_numbers<[1], [0], [0], [1], [0, 0, 1, 1], [], []>} : vector<256x4xf32>, vector<4x4xf32>, vector<256x4xf32> -> vector<256x4xf32>
    %112 = vector.shape_cast %111 : vector<256x4xf32> to vector<16x16x4xf32>
    %113 = vector.extract_strided_slice %112 {offsets = [4, 0, 0], sizes = [8, 16, 4], strides = [1, 1, 1]} : vector<16x16x4xf32> to vector<8x16x4xf32>
    %114 = arith.addf %69, %113 : vector<8x16x4xf32>
    %115 = vector.extract_strided_slice %16 {offsets = [4, 0, 0], sizes = [16, 1, 1], strides = [1, 1, 1]} : vector<24x1x1xi1> to vector<16x1x1xi1>
    %cst_36 = arith.constant -1.000000e+30 : f32
    %116 = vector.shape_cast %115 : vector<16x1x1xi1> to vector<16x1x1xi1>
    %117 = vector.broadcast %116 : vector<16x1x1xi1> to vector<16x16x4xi1>
    %118 = vector.broadcast %cst_36 : f32 to vector<16x16x4xf32>
    %119 = arith.select %117, %112, %118 : vector<16x16x4xi1>, vector<16x16x4xf32>
    %120 = vector.extract_strided_slice %119 {offsets = [0, 0, 0], sizes = [12, 16, 4], strides = [1, 1, 1]} : vector<16x16x4xf32> to vector<12x16x4xf32>
    %121 = vector.extract_strided_slice %119 {offsets = [1, 0, 0], sizes = [12, 16, 4], strides = [1, 1, 1]} : vector<16x16x4xf32> to vector<12x16x4xf32>
    %122 = arith.maximumf %120, %121 : vector<12x16x4xf32>
    %123 = vector.extract_strided_slice %119 {offsets = [2, 0, 0], sizes = [12, 16, 4], strides = [1, 1, 1]} : vector<16x16x4xf32> to vector<12x16x4xf32>
    %124 = arith.maximumf %122, %123 : vector<12x16x4xf32>
    %125 = vector.extract_strided_slice %119 {offsets = [3, 0, 0], sizes = [12, 16, 4], strides = [1, 1, 1]} : vector<16x16x4xf32> to vector<12x16x4xf32>
    %126 = arith.maximumf %124, %125 : vector<12x16x4xf32>
    %127 = vector.extract_strided_slice %119 {offsets = [4, 0, 0], sizes = [12, 16, 4], strides = [1, 1, 1]} : vector<16x16x4xf32> to vector<12x16x4xf32>
    %128 = arith.maximumf %126, %127 : vector<12x16x4xf32>
    %c15_i32_37 = arith.constant 15 : i32
    %129 = tpu.dynamic_rotate %128 by %c15_i32_37 dim 1 : vector<12x16x4xf32>, i32 -> vector<12x16x4xf32>
    %cst_38 = arith.constant -1.000000e+30 : f32
    %130 = vector.shape_cast %19 : vector<1x16x1xi1> to vector<1x16x1xi1>
    %131 = vector.broadcast %130 : vector<1x16x1xi1> to vector<12x16x4xi1>
    %132 = vector.broadcast %cst_38 : f32 to vector<12x16x4xf32>
    %133 = arith.select %131, %129, %132 : vector<12x16x4xi1>, vector<12x16x4xf32>
    %134 = arith.maximumf %128, %133 : vector<12x16x4xf32>
    %c14_i32_39 = arith.constant 14 : i32
    %135 = tpu.dynamic_rotate %128 by %c14_i32_39 dim 1 : vector<12x16x4xf32>, i32 -> vector<12x16x4xf32>
    %cst_40 = arith.constant -1.000000e+30 : f32
    %136 = vector.shape_cast %21 : vector<1x16x1xi1> to vector<1x16x1xi1>
    %137 = vector.broadcast %136 : vector<1x16x1xi1> to vector<12x16x4xi1>
    %138 = vector.broadcast %cst_40 : f32 to vector<12x16x4xf32>
    %139 = arith.select %137, %135, %138 : vector<12x16x4xi1>, vector<12x16x4xf32>
    %140 = arith.maximumf %134, %139 : vector<12x16x4xf32>
    %c1_i32_41 = arith.constant 1 : i32
    %141 = tpu.dynamic_rotate %128 by %c1_i32_41 dim 1 : vector<12x16x4xf32>, i32 -> vector<12x16x4xf32>
    %cst_42 = arith.constant -1.000000e+30 : f32
    %142 = vector.shape_cast %23 : vector<1x16x1xi1> to vector<1x16x1xi1>
    %143 = vector.broadcast %142 : vector<1x16x1xi1> to vector<12x16x4xi1>
    %144 = vector.broadcast %cst_42 : f32 to vector<12x16x4xf32>
    %145 = arith.select %143, %141, %144 : vector<12x16x4xi1>, vector<12x16x4xf32>
    %146 = arith.maximumf %140, %145 : vector<12x16x4xf32>
    %c2_i32_43 = arith.constant 2 : i32
    %147 = tpu.dynamic_rotate %128 by %c2_i32_43 dim 1 : vector<12x16x4xf32>, i32 -> vector<12x16x4xf32>
    %cst_44 = arith.constant -1.000000e+30 : f32
    %148 = vector.shape_cast %25 : vector<1x16x1xi1> to vector<1x16x1xi1>
    %149 = vector.broadcast %148 : vector<1x16x1xi1> to vector<12x16x4xi1>
    %150 = vector.broadcast %cst_44 : f32 to vector<12x16x4xf32>
    %151 = arith.select %149, %147, %150 : vector<12x16x4xi1>, vector<12x16x4xf32>
    %152 = arith.maximumf %146, %151 : vector<12x16x4xf32>
    %153 = vector.shape_cast %152 : vector<12x16x4xf32> to vector<192x4xf32>
    %c2 = arith.constant 2 : index
    %c0_45 = arith.constant 0 : index
    %c0_46 = arith.constant 0 : index
    %154 = vector.load %arg5[%c2, %c0_45, %c0_46] : memref<4x4x4xf32, #tpu.memory_space<vmem>>, vector<1x4x4xf32>
    %155 = vector.shape_cast %154 : vector<1x4x4xf32> to vector<4x4xf32>
    %cst_47 = arith.constant dense<0.000000e+00> : vector<192x4xf32>
    %156 = tpu.matmul %153, %155, %cst_47 {dimension_numbers = #tpu.dot_dimension_numbers<[1], [0], [0], [1], [0, 0, 1, 1], [], []>} : vector<192x4xf32>, vector<4x4xf32>, vector<192x4xf32> -> vector<192x4xf32>
    %157 = vector.shape_cast %156 : vector<192x4xf32> to vector<12x16x4xf32>
    %158 = vector.extract_strided_slice %157 {offsets = [2, 0, 0], sizes = [8, 16, 4], strides = [1, 1, 1]} : vector<12x16x4xf32> to vector<8x16x4xf32>
    %159 = arith.addf %114, %158 : vector<8x16x4xf32>
    %160 = vector.extract_strided_slice %16 {offsets = [6, 0, 0], sizes = [12, 1, 1], strides = [1, 1, 1]} : vector<24x1x1xi1> to vector<12x1x1xi1>
    %cst_48 = arith.constant -1.000000e+30 : f32
    %161 = vector.shape_cast %160 : vector<12x1x1xi1> to vector<12x1x1xi1>
    %162 = vector.broadcast %161 : vector<12x1x1xi1> to vector<12x16x4xi1>
    %163 = vector.broadcast %cst_48 : f32 to vector<12x16x4xf32>
    %164 = arith.select %162, %157, %163 : vector<12x16x4xi1>, vector<12x16x4xf32>
    %165 = vector.extract_strided_slice %164 {offsets = [0, 0, 0], sizes = [8, 16, 4], strides = [1, 1, 1]} : vector<12x16x4xf32> to vector<8x16x4xf32>
    %166 = vector.extract_strided_slice %164 {offsets = [1, 0, 0], sizes = [8, 16, 4], strides = [1, 1, 1]} : vector<12x16x4xf32> to vector<8x16x4xf32>
    %167 = arith.maximumf %165, %166 : vector<8x16x4xf32>
    %168 = vector.extract_strided_slice %164 {offsets = [2, 0, 0], sizes = [8, 16, 4], strides = [1, 1, 1]} : vector<12x16x4xf32> to vector<8x16x4xf32>
    %169 = arith.maximumf %167, %168 : vector<8x16x4xf32>
    %170 = vector.extract_strided_slice %164 {offsets = [3, 0, 0], sizes = [8, 16, 4], strides = [1, 1, 1]} : vector<12x16x4xf32> to vector<8x16x4xf32>
    %171 = arith.maximumf %169, %170 : vector<8x16x4xf32>
    %172 = vector.extract_strided_slice %164 {offsets = [4, 0, 0], sizes = [8, 16, 4], strides = [1, 1, 1]} : vector<12x16x4xf32> to vector<8x16x4xf32>
    %173 = arith.maximumf %171, %172 : vector<8x16x4xf32>
    %c15_i32_49 = arith.constant 15 : i32
    %174 = tpu.dynamic_rotate %173 by %c15_i32_49 dim 1 : vector<8x16x4xf32>, i32 -> vector<8x16x4xf32>
    %cst_50 = arith.constant -1.000000e+30 : f32
    %175 = vector.shape_cast %19 : vector<1x16x1xi1> to vector<1x16x1xi1>
    %176 = vector.broadcast %175 : vector<1x16x1xi1> to vector<8x16x4xi1>
    %177 = vector.broadcast %cst_50 : f32 to vector<8x16x4xf32>
    %178 = arith.select %176, %174, %177 : vector<8x16x4xi1>, vector<8x16x4xf32>
    %179 = arith.maximumf %173, %178 : vector<8x16x4xf32>
    %c14_i32_51 = arith.constant 14 : i32
    %180 = tpu.dynamic_rotate %173 by %c14_i32_51 dim 1 : vector<8x16x4xf32>, i32 -> vector<8x16x4xf32>
    %cst_52 = arith.constant -1.000000e+30 : f32
    %181 = vector.shape_cast %21 : vector<1x16x1xi1> to vector<1x16x1xi1>
    %182 = vector.broadcast %181 : vector<1x16x1xi1> to vector<8x16x4xi1>
    %183 = vector.broadcast %cst_52 : f32 to vector<8x16x4xf32>
    %184 = arith.select %182, %180, %183 : vector<8x16x4xi1>, vector<8x16x4xf32>
    %185 = arith.maximumf %179, %184 : vector<8x16x4xf32>
    %c1_i32_53 = arith.constant 1 : i32
    %186 = tpu.dynamic_rotate %173 by %c1_i32_53 dim 1 : vector<8x16x4xf32>, i32 -> vector<8x16x4xf32>
    %cst_54 = arith.constant -1.000000e+30 : f32
    %187 = vector.shape_cast %23 : vector<1x16x1xi1> to vector<1x16x1xi1>
    %188 = vector.broadcast %187 : vector<1x16x1xi1> to vector<8x16x4xi1>
    %189 = vector.broadcast %cst_54 : f32 to vector<8x16x4xf32>
    %190 = arith.select %188, %186, %189 : vector<8x16x4xi1>, vector<8x16x4xf32>
    %191 = arith.maximumf %185, %190 : vector<8x16x4xf32>
    %c2_i32_55 = arith.constant 2 : i32
    %192 = tpu.dynamic_rotate %173 by %c2_i32_55 dim 1 : vector<8x16x4xf32>, i32 -> vector<8x16x4xf32>
    %cst_56 = arith.constant -1.000000e+30 : f32
    %193 = vector.shape_cast %25 : vector<1x16x1xi1> to vector<1x16x1xi1>
    %194 = vector.broadcast %193 : vector<1x16x1xi1> to vector<8x16x4xi1>
    %195 = vector.broadcast %cst_56 : f32 to vector<8x16x4xf32>
    %196 = arith.select %194, %192, %195 : vector<8x16x4xi1>, vector<8x16x4xf32>
    %197 = arith.maximumf %191, %196 : vector<8x16x4xf32>
    %198 = vector.shape_cast %197 : vector<8x16x4xf32> to vector<128x4xf32>
    %c3 = arith.constant 3 : index
    %c0_57 = arith.constant 0 : index
    %c0_58 = arith.constant 0 : index
    %199 = vector.load %arg5[%c3, %c0_57, %c0_58] : memref<4x4x4xf32, #tpu.memory_space<vmem>>, vector<1x4x4xf32>
    %200 = vector.shape_cast %199 : vector<1x4x4xf32> to vector<4x4xf32>
    %cst_59 = arith.constant dense<0.000000e+00> : vector<128x4xf32>
    %201 = tpu.matmul %198, %200, %cst_59 {dimension_numbers = #tpu.dot_dimension_numbers<[1], [0], [0], [1], [0, 0, 1, 1], [], []>} : vector<128x4xf32>, vector<4x4xf32>, vector<128x4xf32> -> vector<128x4xf32>
    %202 = vector.shape_cast %201 : vector<128x4xf32> to vector<8x16x4xf32>
    %203 = arith.addf %159, %202 : vector<8x16x4xf32>
    %c0_60 = arith.constant 0 : index
    %c0_61 = arith.constant 0 : index
    %c0_62 = arith.constant 0 : index
    %c0_63 = arith.constant 0 : index
    %204 = vector.load %arg6[%c0_60, %c0_61, %c0_62, %c0_63] : memref<1x8x16x4xf32, #tpu.memory_space<vmem>>, vector<1x8x16x4xf32>
    %205 = vector.shape_cast %204 : vector<1x8x16x4xf32> to vector<8x16x4xf32>
    %206 = vector.shape_cast %203 : vector<8x16x4xf32> to vector<1x8x16x4xf32>
    tpu.vector_store %arg6[%c0_60, %c0_61, %c0_62, %c0_63], %206 {strides = array<i32>} : memref<1x8x16x4xf32, #tpu.memory_space<vmem>>, vector<1x8x16x4xf32>,
    return
  }
  func.func @transform_0(%arg0: i32, %arg1: i32) -> (i32, i32, i32, i32) {
    %c1_i32 = arith.constant 1 : i32
    %0 = arith.muli %arg1, %c1_i32 : i32
    %c1_i32_0 = arith.constant 1 : i32
    %1 = arith.subi %0, %c1_i32_0 : i32
    %c0_i32 = arith.constant 0 : i32
    %2 = arith.maxsi %1, %c0_i32 : i32
    %c0_i32_1 = arith.constant 0 : i32
    %c0_i32_2 = arith.constant 0 : i32
    %c0_i32_3 = arith.constant 0 : i32
    return %arg0, %2, %c0_i32_1, %c0_i32_2 : i32, i32, i32, i32
  }
  func.func @transform_1(%arg0: i32, %arg1: i32) -> (i32, i32, i32, i32) {
    %c0_i32 = arith.constant 0 : i32
    %c0_i32_0 = arith.constant 0 : i32
    %c0_i32_1 = arith.constant 0 : i32
    return %arg0, %arg1, %c0_i32, %c0_i32_0 : i32, i32, i32, i32
  }
  func.func @transform_2(%arg0: i32, %arg1: i32) -> (i32, i32, i32, i32) {
    %c1_i32 = arith.constant 1 : i32
    %0 = arith.muli %arg1, %c1_i32 : i32
    %c1_i32_0 = arith.constant 1 : i32
    %1 = arith.addi %0, %c1_i32_0 : i32
    %c1_i32_1 = arith.constant 1 : i32
    %2 = arith.minsi %1, %c1_i32_1 : i32
    %c0_i32 = arith.constant 0 : i32
    %c0_i32_2 = arith.constant 0 : i32
    %c0_i32_3 = arith.constant 0 : i32
    return %arg0, %2, %c0_i32, %c0_i32_2 : i32, i32, i32, i32
  }
  func.func @transform_3(%arg0: i32, %arg1: i32) -> (i32, i32, i32) {
    %c0_i32 = arith.constant 0 : i32
    %c0_i32_0 = arith.constant 0 : i32
    %c0_i32_1 = arith.constant 0 : i32
    %c0_i32_2 = arith.constant 0 : i32
    return %c0_i32, %c0_i32_0, %c0_i32_1 : i32, i32, i32
  }
  func.func @transform_4(%arg0: i32, %arg1: i32) -> (i32, i32, i32, i32) {
    %c0_i32 = arith.constant 0 : i32
    %c0_i32_0 = arith.constant 0 : i32
    %c0_i32_1 = arith.constant 0 : i32
    return %arg0, %arg1, %c0_i32, %c0_i32_0 : i32, i32, i32, i32
  }
}

</mosaic_0001>

<bundles_post_ra>
// kernel: tpu_custom_call.1
= control target key start
LH: loop header
LB: loop body
LE: loop exit
PB: predicated region body
PF: predicated region fallthrough
CT: control target
= control target key end

     0   :  { %s4929_s15 = smov 0   ;;  %s4931_s16 = smov 0   ;;  %s8279_s0 = inlined_call_operand.vmem [shape: f32[2,16,16,4], index: 0, kind: input, shape index: {}]   ;;  %s8280_s1 = inlined_call_operand.vmem [shape: f32[2,16,16,4], index: 1, kind: input, shape index: {}]   ;;  %s8281_s2 = inlined_call_operand.vmem [shape: f32[2,16,16,4], index: 2, kind: input, shape index: {}]   ;;  %s8282_s3 = inlined_call_operand.vmem [shape: f32[4,4,4], index: 3, kind: input, shape index: {}]   ;;  %s8283_s4 = inlined_call_operand.vmem [shape: f32[2,16,16,4], index: 4, kind: output, shape index: {}]  }
   0x1   :  { %s4933_s17 = smov 0   ;;  %s4935_s18 = smov 0  }
   0x2   :  { %s4937_s19 = smov 0  }
   0x3 LB: > { %s23_s20 = sadd.s32 1, %s4894_s17  ;;  %s26_s21 = sadd.s32 1, %s4898_s18  ;;  %s4902_s19 = sphi %s4937_s19, %s14_s19   ;;  %s4898_s18 = sphi %s4935_s18, %s9118_s18   ;;  %s4894_s17 = sphi %s4933_s17, %s9117_s17   ;;  %s4890_s16 = sphi %s4931_s16, %s9116_s16   ;;  %s4886_s15 = sphi %s4929_s15, %s9115_s15  }
   0x4   : > { %p24_p0 = scmp.ge.s32.totalorder %s23_s20, 2  ;;  %p4375_p1 = scmp.ge.s32.totalorder %s4902_s19, 1 }
   0x5   : > { %p244_p2 = scmp.lt.s32.totalorder %s4902_s19, 5 }
   0x6   : > { %s9120_s20 = smov (%p24_p0, %s23_s20), 0  ;;  %s9122_s21 = smov (!%p24_p0, %s26_s21), %s4898_s18 }
   0x7   : > { %p245_p3 = pnand %p4375_p1, %p244_p2  ;;  %p28_p4 = scmp.ge.s32.totalorder %s9122_s21, 2 }
   0x9   : > { %s9124_s21 = smov (%p28_p4, %s9122_s21), 0  ;;  %248 = sbr.rel (%p245_p3) target bundleno = 1122 (0x462), region = 36 }
   0xe   : > { %v1435_v0 = vld [vmem:[%s8282_s3] sm:$0xf]  ;;  %vm8284_vm0 = vcmask 1043456   ;;  %s4376_s24 = sadd.s32 4294967295, %s4886_s15  ;;  %p310_p5 = scmp.lt.s32.totalorder %s4890_s16, 1  ;;  %v508_v1 = vlaneseq }
   0xf   : > { %4632 = vmatprep.subr.msk.mxu0 %vm8284_vm0, %v1435_v0  ;;  %p307_p6 = scmp.gt.s32.totalorder %s4376_s24, 0  ;;  %s4968_s26 = sshll.u32 %s4886_s15, 3 }
  0x10   : > { %4633 = vmatpush3.msk.msra.mxu0 %vm8284_vm0, %v1435_v0  ;;  %s9126_s16 = smov (!%p310_p5, %s4890_s16), 1  ;;  %s4394_s28 = sadd.s32 4294967288, %s4968_s26  ;;  %v4975_v3 = vshrl.u32 %v508_v1, 7 }
  0x11   : > { %s9128_s24 = smov (!%p307_p6, %s4376_s24), 0  ;;  %s4970_s27 = sshll.u32 %s9126_s16, 5  ;;  %v4973_v2 = vstv %s4394_s28 }
  0x12   : > { %s4377_s25 = sshll.u32 %s9128_s24, 3  ;;  %v413_v4 = vadd.s32 1, %v4973_v2  ;;  %v414_v5 = vadd.s32 2, %v4973_v2  ;;  %v415_v6 = vadd.s32 3, %v4973_v2  ;;  %v416_v7 = vadd.s32 4, %v4973_v2  ;;  %p326_p8 = scmp.lt.s32.totalorder %s4968_s26, 15 }
  0x13   : > { %p312_p7 = scmp.lt.s32.totalorder %s4377_s25, 15  ;;  %vm436_vm1 = vcmp.ge.s32.totalorder %v4973_v2, 0  ;;  %vm460_vm2 = vcmp.lt.s32.totalorder %v4973_v2, 16  ;;  %v417_v9 = vadd.s32 5, %v4973_v2  ;;  %v4997_v12 = vadd.s32 8, %v4975_v3  ;;  %s334_s16 = sadd.s32 1, %s4886_s15 }
  0x14   : > { %vm4989_vm3 = vmand %vm436_vm1, %vm460_vm2  ;;  %vm437_vm4 = vcmp.ge.s32.totalorder %v413_v4, 0  ;;  %vm461_vm5 = vcmp.lt.s32.totalorder %v413_v4, 16  ;;  %v5000_v13 = vadd.s32 6, %v4973_v2  ;;  %vm438_vm6 = vcmp.ge.s32.totalorder %v414_v5, 0  ;;  %s9132_s26 = smov (!%p326_p8, %s4968_s26), 15  ;;  %p5506_p9 = scmp.lt.s32.totalorder %s334_s16, 1 }
  0x15   : > { %s9130_s25 = smov (!%p312_p7, %s4377_s25), 15  ;;  %vm439_vm7 = vcmp.ge.s32.totalorder %v415_v6, 0  ;;  %vm440_vm8 = vcmp.ge.s32.totalorder %v416_v7, 0  ;;  %vm462_vm9 = vcmp.lt.s32.totalorder %v414_v5, 16  ;;  %vm463_vm10 = vcmp.lt.s32.totalorder %v415_v6, 16  ;;  %vm485_vm12 = vmand %vm437_vm4, %vm461_vm5  ;;  %s4382_s9 = sshll.u32 %s9132_s26, 1 }
  0x16   : > { %s4378_s29 = sshll.u32 %s9130_s25, 1  ;;  %vm464_vm11 = vcmp.lt.s32.totalorder %v416_v7, 16  ;;  %vm441_vm13 = vcmp.ge.s32.totalorder %v417_v9, 0  ;;  %vm5017_vm14 = vmand %vm438_vm6, %vm462_vm9  ;;  %vm465_vm15 = vcmp.lt.s32.totalorder %v417_v9, 16  ;;  %vm8291_vm2 = vcmp.lt.s32.totalorder %v4975_v3, 7  ;;  %s5186_s10 = sadd.s32 %s4382_s9, %s4970_s27 }
  0x17   : > { %s316_s30 = sadd.s32 %s4970_s27, %s4378_s29  ;;  %vm5022_vm1 = vmand %vm439_vm7, %vm463_vm10  ;;  %vm8288_vm5 = vcmp.lt.s32.totalorder %v4975_v3, 1  ;;  %vm8297_vm6 = vcmp.lt.s32.totalorder %v4975_v3, 2  ;;  %vm8286_vm7 = vcmp.lt.s32.totalorder %v4997_v12, 15  ;;  %vm8290_vm9 = vcmp.ge.s32.totalorder %v4975_v3, 2  ;;  %s4384_s11 = sshll.u32 %s5186_s10, 3 }
  0x18   : > { %s4380_s5 = sshll.u32 %s316_s30, 3  ;;  %vm5034_vm4 = vmand %vm440_vm8, %vm464_vm11  ;;  %vm8289_vm8 = vcmp.ge.s32.totalorder %v4975_v3, 1  ;;  %vm8285_vm10 = vcmp.lt.s32.totalorder %v4997_v12, 14  ;;  %s5226_s14 = scalar_lea.vmem %s8280_s1, %s4384_s11 }
  0x19   : > { %s4987_s8 = scalar_lea.vmem %s8279_s0, %s4380_s5  ;;  %vm5066_vm11 = vmand %vm441_vm13, %vm465_vm15  ;;  %vm466_vm13 = vcmp.lt.s32.totalorder %v5000_v13, 16  ;;  %s9134_s16 = smov (!%p5506_p9, %s334_s16), 1 }
  0x1a   : > { %v379_v10 = vld [vmem:[%s4987_s8] sm:$0xff]  ;;  %v380_v11 = vld [vmem:[%s4987_s8 + $0x8] sm:$0xff]  ;;  %v381_v14 = vld [vmem:[%s4987_s8 + $0x10] sm:$0xff]  ;;  %s4385_s15 = sshll.u32 %s9134_s16, 3 }
  0x1b   : > { %v382_v15 = vld [vmem:[%s4987_s8 + $0x18] sm:$0xff]  ;;  %v383_v16 = vld [vmem:[%s4987_s8 + $0x20] sm:$0xff]  ;;  %v384_v17 = vld [vmem:[%s4987_s8 + $0x28] sm:$0xff]  ;;  %v567_v19 = vsel %vm4989_vm3, %v379_v10, -1e+30  ;;  %p5589_p10 = scmp.lt.s32.totalorder %s4385_s15, 15 }
  0x1c   : > { %v385_v18 = vld [vmem:[%s4987_s8 + $0x30] sm:$0xff]  ;;  %v386_v20 = vld [vmem:[%s4987_s8 + $0x38] sm:$0xff]  ;;  %v387_v21 = vld [vmem:[%s4987_s8 + $0x40] sm:$0xff]  ;;  %v568_v22 = vsel %vm4989_vm3, %v380_v11, -1e+30  ;;  %vm8292_vm3 = vcmp.lt.s32.totalorder %v4975_v3, 6 }
  0x1d   : > { %v388_v23 = vld [vmem:[%s4987_s8 + $0x48] sm:$0xff]  ;;  %v569_v25 = vsel %vm485_vm12, %v381_v14, -1e+30  ;;  %v570_v26 = vsel %vm485_vm12, %v382_v15, -1e+30  ;;  %v389_v37 = vld [vmem:[%s4987_s8 + $0x50] sm:$0xff] }
  0x1e   : > { %v571_v28 = vsel %vm5017_vm14, %v383_v16, -1e+30  ;;  %v572_v29 = vsel %vm5017_vm14, %v384_v17, -1e+30  ;;  %v615_v30 = vmax.f32 %v567_v19, %v569_v25  ;;  %v616_v31 = vmax.f32 %v568_v22, %v570_v26  ;;  %v390_v38 = vld [vmem:[%s4987_s8 + $0x58] sm:$0xff]  ;;  %v391_v52 = vld [vmem:[%s4987_s8 + $0x60] sm:$0xff] }
  0x1f   : > { %v5040_v33 = vsel %vm5022_vm1, %v385_v18, -1e+30  ;;  %v5044_v34 = vsel %vm5022_vm1, %v386_v20, -1e+30  ;;  %v617_v35 = vmax.f32 %v569_v25, %v571_v28  ;;  %v618_v36 = vmax.f32 %v570_v26, %v572_v29  ;;  %v392_v53 = vld [vmem:[%s4987_s8 + $0x68] sm:$0xff]  ;;  %s9136_s15 = smov (!%p5589_p10, %s4385_s15), 15 }
  0x20   : > { %v5055_v39 = vsel %vm5034_vm4, %v387_v21, -1e+30  ;;  %v5059_v40 = vsel %vm5034_vm4, %v388_v23, -1e+30  ;;  %v619_v41 = vmax.f32 %v571_v28, %v5040_v33  ;;  %v620_v42 = vmax.f32 %v572_v29, %v5044_v34  ;;  %s4386_s24 = sshll.u32 %s9136_s15, 1 }
  0x21   : > { %v621_v44 = vmax.f32 %v5040_v33, %v5055_v39  ;;  %v622_v45 = vmax.f32 %v5044_v34, %v5059_v40  ;;  %v655_v46 = vmax.f32 %v615_v30, %v571_v28  ;;  %v656_v47 = vmax.f32 %v616_v31, %v572_v29  ;;  %s5662_s25 = sadd.s32 %s4386_s24, %s4970_s27 }
  0x22   : > { %v5076_v48 = vsel %vm5066_vm11, %v389_v37, -1e+30  ;;  %v5080_v49 = vsel %vm5066_vm11, %v390_v38, -1e+30  ;;  %v657_v50 = vmax.f32 %v617_v35, %v5040_v33  ;;  %v658_v51 = vmax.f32 %v618_v36, %v5044_v34  ;;  %s4388_s26 = sshll.u32 %s5662_s25, 3 }
  0x23   : > { %v695_v54 = vmax.f32 %v655_v46, %v5040_v33  ;;  %v696_v55 = vmax.f32 %v656_v47, %v5044_v34  ;;  %vm442_vm12 = vcmp.ge.s32.totalorder %v5000_v13, 0  ;;  %v5097_v59 = vmax.f32 %v619_v41, %v5055_v39  ;;  %s5697_s29 = scalar_lea.vmem %s8281_s2, %s4388_s26 }
  0x24   : > { %v697_v56 = vmax.f32 %v657_v50, %v5055_v39  ;;  %v698_v57 = vmax.f32 %v658_v51, %v5059_v40  ;;  %vm5092_vm15 = vmand %vm442_vm12, %vm466_vm13  ;;  %v5100_v60 = vmax.f32 %v620_v42, %v5059_v40  ;;  %vm8287_vm12 = vcmask 31744  }
  0x25   : > { %v735_v61 = vmax.f32 %v695_v54, %v5055_v39  ;;  %v736_v62 = vmax.f32 %v696_v55, %v5059_v40  ;;  %v5106_v63 = vsel %vm5092_vm15, %v391_v52, -1e+30  ;;  %v5110_v0 = vsel %vm5092_vm15, %v392_v53, -1e+30 }
  0x26   : > { %v737_v1 = vmax.f32 %v697_v56, %v5076_v48  ;;  %v5114_v4 = vmax.f32 %v698_v57, %v5080_v49  ;;  %v699_v5 = vmax.f32 %v5097_v59, %v5076_v48  ;;  %v700_v6 = vmax.f32 %v5100_v60, %v5080_v49 }
  0x27   : > { %v775_v7 = vrot.slane %v735_v61, 1  ;;  %v795_v8 = vrot.slane %v736_v62, 1  ;;  %v940_v9 = vrot.slane %v735_v61, 2  ;;  %v960_v10 = vrot.slane %v736_v62, 2 }
  0x28   : > { %v1105_v11 = vrot.slane %v735_v61, 7  ;;  %v1125_v13 = vrot.slane %v736_v62, 7  ;;  %v1270_v14 = vrot.slane %v735_v61, 6  ;;  %v1290_v15 = vrot.slane %v736_v62, 6 }
  0x29   : > { %v816_v16 = vsel %vm8291_vm2, %v775_v7, %v795_v8  ;;  %v981_v17 = vsel %vm8292_vm3, %v940_v9, %v960_v10  ;;  %v836_v18 = vsel %vm8291_vm2, %v795_v8, %v775_v7  ;;  %v1001_v19 = vsel %vm8292_vm3, %v960_v10, %v940_v9 }
  0x2a   : > { %v900_v20 = vmax.f32 %v735_v61, %v816_v16  ;;  %v1166_v21 = vsel %vm8288_vm5, %v1125_v13, %v1105_v11  ;;  %v1331_v22 = vsel %vm8297_vm6, %v1290_v15, %v1270_v14  ;;  %v861_v23 = vsel %vm8286_vm7, %v836_v18, -1e+30 }
  0x2b   : > { %v1190_v25 = vsel %vm8289_vm8, %v1166_v21, -1e+30  ;;  %v1355_v26 = vsel %vm8290_vm9, %v1331_v22, -1e+30  ;;  %v901_v28 = vmax.f32 %v736_v62, %v861_v23  ;;  %v1026_v29 = vsel %vm8285_vm10, %v1001_v19, -1e+30 }
  0x2c   : > { %v1065_v30 = vmax.f32 %v900_v20, %v981_v17  ;;  %v1146_v31 = vsel %vm8288_vm5, %v1105_v11, %v1125_v13  ;;  %v1311_v35 = vsel %vm8297_vm6, %v1270_v14, %v1290_v15  ;;  %v776_v36 = vrot.slane %v737_v1, 1 }
  0x2d   : > { %v1066_v37 = vmax.f32 %v901_v28, %v1026_v29  ;;  %v796_v38 = vrot.slane %v5114_v4, 1  ;;  %v941_v41 = vrot.slane %v737_v1, 2  ;;  %v961_v42 = vrot.slane %v5114_v4, 2 }
  0x2e   : > { %v1230_v46 = vmax.f32 %v1065_v30, %v1190_v25  ;;  %v1106_v47 = vrot.slane %v737_v1, 7  ;;  %v1126_v50 = vrot.slane %v5114_v4, 7  ;;  %v1271_v51 = vrot.slane %v737_v1, 6 }
  0x2f   : > { %v1231_v52 = vmax.f32 %v1066_v37, %v1146_v31  ;;  %v817_v53 = vsel %vm8291_vm2, %v776_v36, %v796_v38  ;;  %v982_v54 = vsel %vm8292_vm3, %v941_v41, %v961_v42  ;;  %v1291_v55 = vrot.slane %v5114_v4, 6 }
  0x30   : > { %v1395_v56 = vmax.f32 %v1230_v46, %v1355_v26  ;;  %v902_v57 = vmax.f32 %v737_v1, %v817_v53  ;;  %v1167_v59 = vsel %vm8288_vm5, %v1126_v50, %v1106_v47  ;;  %v837_v60 = vsel %vm8291_vm2, %v796_v38, %v776_v36  ;;  %v393_v46 = vld [vmem:[%s4987_s8 + $0x70] sm:$0xff] }
  0x31   : > { %v1396_v61 = vmax.f32 %v1231_v52, %v1311_v35  ;;  %v1192_v62 = vsel %vm8289_vm8, %v1167_v59, -1e+30  ;;  %v1332_v7 = vsel %vm8297_vm6, %v1291_v55, %v1271_v51  ;;  %v863_v8 = vsel %vm8286_vm7, %v837_v60, -1e+30 }
  0x32   : > { %4634 = vmatprep.mubr.msk.f32.mxu0 %vm8287_vm12, %v1395_v56  ;;  %v1067_v1 = vmax.f32 %v902_v57, %v982_v54  ;;  %v1357_v9 = vsel %vm8290_vm9, %v1332_v7, -1e+30  ;;  %v903_v10 = vmax.f32 %v5114_v4, %v863_v8  ;;  %v1002_v11 = vsel %vm8292_vm3, %v961_v42, %v941_v41 }
  0x33   : > { %4635 = vmatmul.mubr.msk.f32.vlgmr.msra.gmra.mxu0 %vm8287_vm12, %v1396_v61  ;;  %v1028_v13 = vsel %vm8285_vm10, %v1002_v11, -1e+30  ;;  %v1147_v14 = vsel %vm8288_vm5, %v1106_v47, %v1126_v50  ;;  %v1312_v15 = vsel %vm8297_vm6, %v1271_v51, %v1291_v55  ;;  %v739_v16 = vmax.f32 %v699_v5, %v5106_v63  ;;  %v394_v47 = vld [vmem:[%s4987_s8 + $0x78] sm:$0xff] }
  0x34   : > { %v1232_v17 = vmax.f32 %v1067_v1, %v1192_v62  ;;  %v1068_v18 = vmax.f32 %v903_v10, %v1028_v13  ;;  %v740_v4 = vmax.f32 %v700_v6, %v5110_v0  ;;  %v419_v19 = vadd.s32 7, %v4973_v2 }
  0x35   : > { %v777_v20 = vrot.slane %v739_v16, 1  ;;  %v942_v21 = vrot.slane %v739_v16, 2  ;;  %v1107_v22 = vrot.slane %v739_v16, 7  ;;  %v1272_v23 = vrot.slane %v739_v16, 6 }
  0x36   : > { %v1397_v25 = vmax.f32 %v1232_v17, %v1357_v9  ;;  %v1233_v26 = vmax.f32 %v1068_v18, %v1147_v14  ;;  %v797_v28 = vrot.slane %v740_v4, 1  ;;  %v962_v29 = vrot.slane %v740_v4, 2  ;;  %v363_v14 = vld [vmem:[%s5226_s14] sm:$0xff] }
  0x37   : > { %v1127_v5 = vrot.slane %v740_v4, 7  ;;  %v1292_v30 = vrot.slane %v740_v4, 6  ;;  %vm443_vm13 = vcmp.ge.s32.totalorder %v419_v19, 0  ;;  %vm467_vm0 = vcmp.lt.s32.totalorder %v419_v19, 16 }
  0x38   : > { %4637 = vmatprep.mubr.msk.f32.mxu0 %vm8287_vm12, %v1397_v25  ;;  %v1398_v6 = vmax.f32 %v1233_v26, %v1312_v15  ;;  %v818_v31 = vsel %vm8291_vm2, %v777_v20, %v797_v28  ;;  %v983_v35 = vsel %vm8292_vm3, %v942_v21, %v962_v29  ;;  %v838_v36 = vsel %vm8291_vm2, %v797_v28, %v777_v20  ;;  %vm5204_vm10 = vmand %vm443_vm13, %vm467_vm0  ;;  %v364_v15 = vld [vmem:[%s5226_s14 + $0x8] sm:$0xff] }
  0x39   : > { %v904_v37 = vmax.f32 %v739_v16, %v818_v31  ;;  %v1168_v38 = vsel %vm8288_vm5, %v1127_v5, %v1107_v22  ;;  %v1333_v41 = vsel %vm8297_vm6, %v1292_v30, %v1272_v23  ;;  %v865_v42 = vsel %vm8286_vm7, %v838_v36, -1e+30 }
  0x3a   : > { %4638 = vmatmul.mubr.msk.f32.gmra.mxu0 %vm8287_vm12, %v1398_v6  ;;  %v1194_v51 = vsel %vm8289_vm8, %v1168_v38, -1e+30  ;;  %v1359_v52 = vsel %vm8290_vm9, %v1333_v41, -1e+30  ;;  %v905_v53 = vmax.f32 %v740_v4, %v865_v42  ;;  %v1003_v54 = vsel %vm8292_vm3, %v962_v29, %v942_v21 }
  0x3b   : > { %v1069_v55 = vmax.f32 %v904_v37, %v983_v35  ;;  %vm8354_vm7 = vcmp.lt.s32.totalorder %v4997_v12, 14  ;;  %v1148_v57 = vsel %vm8288_vm5, %v1107_v22, %v1127_v5  ;;  %v1313_v59 = vsel %vm8297_vm6, %v1272_v23, %v1292_v30 }
  0x3c   : > { %v1030_v56 = vsel %vm8354_vm7, %v1003_v54, -1e+30  ;;  %v5230_v61 = vsel %vm5204_vm10, %v393_v46, -1e+30  ;;  %v5234_v62 = vsel %vm5204_vm10, %v394_v47, -1e+30  ;;  %v661_v7 = vmax.f32 %v621_v44, %v5076_v48 }
  0x3d   : > { %v1070_v60 = vmax.f32 %v905_v53, %v1030_v56  ;;  %v1234_v8 = vmax.f32 %v1069_v55, %v1194_v51  ;;  %v662_v1 = vmax.f32 %v622_v45, %v5080_v49  ;;  %v420_v9 = vadd.s32 8, %v4973_v2  ;;  %v365_v47 = vld [vmem:[%s5226_s14 + $0x10] sm:$0xff]  ;;  %v366_v51 = vld [vmem:[%s5226_s14 + $0x18] sm:$0xff] }
  0x3e   : > { %v623_v10 = vmax.f32 %v5055_v39, %v5076_v48  ;;  %v701_v13 = vmax.f32 %v661_v7, %v5106_v63  ;;  %v624_v33 = vmax.f32 %v5059_v40, %v5080_v49  ;;  %v421_v44 = vadd.s32 9, %v4973_v2 }
  0x3f   : > { %v1235_v11 = vmax.f32 %v1070_v60, %v1148_v57  ;;  %v1399_v16 = vmax.f32 %v1234_v8, %v1359_v52  ;;  %v702_v17 = vmax.f32 %v662_v1, %v5110_v0  ;;  %vm444_vm0 = vcmp.ge.s32.totalorder %v420_v9, 0 }
  0x40   : > { %vm468_vm7 = vcmp.lt.s32.totalorder %v420_v9, 16  ;;  %v741_v45 = vmax.f32 %v701_v13, %v5230_v61  ;;  %v663_v18 = vmax.f32 %v623_v10, %v5106_v63  ;;  %v664_v4 = vmax.f32 %v624_v33, %v5110_v0 }
  0x41   : > { %v1400_v34 = vmax.f32 %v1235_v11, %v1313_v59  ;;  %vm5255_vm13 = vmand %vm444_vm0, %vm468_vm7  ;;  %4640 = vmatprep.mubr.msk.f32.mxu0 %vm8287_vm12, %v1399_v16  ;;  %v742_v40 = vmax.f32 %v702_v17, %v5234_v62  ;;  %vm445_vm0 = vcmp.ge.s32.totalorder %v421_v44, 0  ;;  %vm469_vm7 = vcmp.lt.s32.totalorder %v421_v44, 16 }
  0x42   : > { %v5265_v19 = vsel %vm5255_vm13, %v363_v14, -1e+30  ;;  %v5269_v20 = vsel %vm5255_vm13, %v364_v15, -1e+30  ;;  %v778_v21 = vrot.slane %v741_v45, 1  ;;  %v943_v22 = vrot.slane %v741_v45, 2 }
  0x43   : > { %4641 = vmatmul.mubr.msk.f32.gmra.mxu0 %vm8287_vm12, %v1400_v34  ;;  %v1108_v23 = vrot.slane %v741_v45, 7  ;;  %v1273_v25 = vrot.slane %v741_v45, 6  ;;  %v798_v26 = vrot.slane %v742_v40, 1  ;;  %v963_v28 = vrot.slane %v742_v40, 2  ;;  %vm5293_vm12 = vmand %vm445_vm0, %vm469_vm7 }
  0x44   : > { %v1128_v29 = vrot.slane %v742_v40, 7  ;;  %v1293_v5 = vrot.slane %v742_v40, 6  ;;  %v703_v30 = vmax.f32 %v663_v18, %v5230_v61  ;;  %v704_v6 = vmax.f32 %v664_v4, %v5234_v62 }
  0x45   : > { %v625_v31 = vmax.f32 %v5076_v48, %v5106_v63  ;;  %v819_v35 = vsel %vm8291_vm2, %v778_v21, %v798_v26  ;;  %v984_v36 = vsel %vm8292_vm3, %v943_v22, %v963_v28  ;;  %v839_v48 = vsel %vm8291_vm2, %v798_v26, %v778_v21 }
  0x46   : > { %v1169_v37 = vsel %vm8288_vm5, %v1128_v29, %v1108_v23  ;;  %v1334_v38 = vsel %vm8297_vm6, %v1293_v5, %v1273_v25  ;;  %v906_v41 = vmax.f32 %v741_v45, %v819_v35  ;;  %vm8359_vm5 = vcmp.lt.s32.totalorder %v4997_v12, 15 }
  0x47   : > { %v1196_v42 = vsel %vm8289_vm8, %v1169_v37, -1e+30  ;;  %v1361_v46 = vsel %vm8290_vm9, %v1334_v38, -1e+30  ;;  %v867_v53 = vsel %vm8359_vm5, %v839_v48, -1e+30  ;;  %v1004_v54 = vsel %vm8292_vm3, %v963_v28, %v943_v22 }
  0x48   : > { %vm8360_vm8 = vcmp.lt.s32.totalorder %v4975_v3, 1  ;;  %v1314_v56 = vsel %vm8297_vm6, %v1273_v25, %v1293_v5  ;;  %v1071_v57 = vmax.f32 %v906_v41, %v984_v36  ;;  %v907_v59 = vmax.f32 %v742_v40, %v867_v53  ;;  %v367_v53 = vld [vmem:[%s5226_s14 + $0x20] sm:$0xff] }
  0x49   : > { %v1149_v55 = vsel %vm8360_vm8, %v1108_v23, %v1128_v29  ;;  %vm8361_vm9 = vcmp.lt.s32.totalorder %v4997_v12, 14  ;;  %v743_v7 = vmax.f32 %v703_v30, %v5265_v19  ;;  %v744_v8 = vmax.f32 %v704_v6, %v5269_v20  ;;  %vm8362_vm5 = vmmov %vm8360_vm8 }
  0x4a   : > { %v1032_v60 = vsel %vm8361_vm9, %v1004_v54, -1e+30  ;;  %v5311_v1 = vsel %vm5293_vm12, %v365_v47, -1e+30  ;;  %v5315_v9 = vsel %vm5293_vm12, %v366_v51, -1e+30  ;;  %v626_v10 = vmax.f32 %v5080_v49, %v5110_v0 }
  0x4b   : > { %v1236_v11 = vmax.f32 %v1071_v57, %v1196_v42  ;;  %v1072_v13 = vmax.f32 %v907_v59, %v1032_v60  ;;  %v779_v14 = vrot.slane %v743_v7, 1  ;;  %v944_v15 = vrot.slane %v743_v7, 2  ;;  %v368_v54 = vld [vmem:[%s5226_s14 + $0x28] sm:$0xff] }
  0x4c   : > { %v799_v33 = vrot.slane %v744_v8, 1  ;;  %v964_v44 = vrot.slane %v744_v8, 2  ;;  %v1109_v16 = vrot.slane %v743_v7, 7  ;;  %v1129_v17 = vrot.slane %v744_v8, 7 }
  0x4d   : > { %v1401_v34 = vmax.f32 %v1236_v11, %v1361_v46  ;;  %v1237_v45 = vmax.f32 %v1072_v13, %v1149_v55  ;;  %v1274_v18 = vrot.slane %v743_v7, 6  ;;  %v1294_v4 = vrot.slane %v744_v8, 6 }
  0x4e   : > { %v820_v40 = vsel %vm8291_vm2, %v779_v14, %v799_v33  ;;  %v985_v21 = vsel %vm8292_vm3, %v944_v15, %v964_v44  ;;  %v1170_v49 = vsel %vm8362_vm5, %v1129_v17, %v1109_v16  ;;  %v840_v22 = vsel %vm8291_vm2, %v799_v33, %v779_v14 }
  0x4f   : > { %vm8363_vm8 = vcmask 31744   ;;  %v1402_v23 = vmax.f32 %v1237_v45, %v1314_v56  ;;  %v908_v25 = vmax.f32 %v743_v7, %v820_v40  ;;  %vm8364_vm9 = vcmp.ge.s32.totalorder %v4975_v3, 1 }
  0x50   : > { %4643 = vmatprep.mubr.msk.f32.mxu0 %vm8363_vm8, %v1401_v34  ;;  %v1198_v26 = vsel %vm8364_vm9, %v1170_v49, -1e+30  ;;  %v1335_v28 = vsel %vm8297_vm6, %v1294_v4, %v1274_v18  ;;  %vm8365_vm0 = vcmp.ge.s32.totalorder %v4975_v3, 2  ;;  %vm8366_vm7 = vcmp.lt.s32.totalorder %v4997_v12, 15 }
  0x51   : > { %v1363_v29 = vsel %vm8365_vm0, %v1335_v28, -1e+30  ;;  %v869_v5 = vsel %vm8366_vm7, %v840_v22, -1e+30  ;;  %v1005_v30 = vsel %vm8292_vm3, %v964_v44, %v944_v15  ;;  %v1150_v6 = vsel %vm8362_vm5, %v1109_v16, %v1129_v17  ;;  %4644 = vmatmul.mubr.msk.f32.gmra.mxu0 %vm8363_vm8, %v1402_v23 }
  0x52   : > { %v1073_v35 = vmax.f32 %v908_v25, %v985_v21  ;;  %v909_v36 = vmax.f32 %v744_v8, %v869_v5  ;;  %vm8367_vm9 = vcmp.lt.s32.totalorder %v4997_v12, 14  ;;  %v1315_v38 = vsel %vm8297_vm6, %v1274_v18, %v1294_v4 }
  0x53   : > { %v1034_v37 = vsel %vm8367_vm9, %v1005_v30, -1e+30  ;;  %v665_v41 = vmax.f32 %v625_v31, %v5230_v61  ;;  %v666_v42 = vmax.f32 %v626_v10, %v5234_v62  ;;  %v422_v46 = vadd.s32 10, %v4973_v2 }
  0x54   : > { %v627_v48 = vmax.f32 %v5106_v63, %v5230_v61  ;;  %v1238_v47 = vmax.f32 %v1073_v35, %v1198_v26  ;;  %v1074_v51 = vmax.f32 %v909_v36, %v1034_v37  ;;  %v628_v55 = vmax.f32 %v5110_v0, %v5234_v62 }
  0x55   : > { %v423_v56 = vadd.s32 11, %v4973_v2  ;;  %v705_v57 = vmax.f32 %v665_v41, %v5265_v19  ;;  %v706_v31 = vmax.f32 %v666_v42, %v5269_v20  ;;  %vm446_vm0 = vcmp.ge.s32.totalorder %v422_v46, 0 }
  0x56   : > { %vm470_vm7 = vcmp.lt.s32.totalorder %v422_v46, 16  ;;  %v1403_v59 = vmax.f32 %v1238_v47, %v1363_v29  ;;  %v1239_v60 = vmax.f32 %v1074_v51, %v1150_v6  ;;  %v8368_v7 = vmov 0 }
  0x57   : > { %vm5357_vm5 = vmand %vm446_vm0, %vm470_vm7  ;;  %v667_v63 = vmax.f32 %v627_v48, %v5265_v19  ;;  %v668_v8 = vmax.f32 %v628_v55, %v5269_v20  ;;  %v745_v0 = vmax.f32 %v705_v57, %v5311_v1  ;;  %v746_v10 = vmax.f32 %v706_v31, %v5315_v9  ;;  %v369_v48 = vld [vmem:[%s5226_s14 + $0x30] sm:$0xff] }
  0x58   : > { %v8369_v7 = vsel %vm5357_vm5, 4294967295, %v8368_v7  ;;  %v5367_v11 = vsel %vm5357_vm5, %v367_v53, -1e+30  ;;  %v5371_v13 = vsel %vm5357_vm5, %v368_v54, -1e+30  ;;  %4646 = vmatprep.mubr.msk.f32.mxu0 %vm8363_vm8, %v1403_v59  ;;  %v1404_v14 = vmax.f32 %v1239_v60, %v1315_v38  ;;  %vm8370_vm0 = vmmov %vm8363_vm8 }
  0x59   : > { %v707_v15 = vmax.f32 %v667_v63, %v5311_v1  ;;  %v708_v33 = vmax.f32 %v668_v8, %v5315_v9  ;;  %v780_v44 = vrot.slane %v745_v0, 1  ;;  %v800_v16 = vrot.slane %v746_v10, 1 }
  0x5a   : > { %v945_v17 = vrot.slane %v745_v0, 2  ;;  %v965_v34 = vrot.slane %v746_v10, 2  ;;  %4647 = vmatmul.mubr.msk.f32.gmra.mxu0 %vm8370_vm0, %v1404_v14  ;;  %v1110_v45 = vrot.slane %v745_v0, 7  ;;  %v1130_v18 = vrot.slane %v746_v10, 7 }
  0x5b   : > { %v1275_v4 = vrot.slane %v745_v0, 6  ;;  %v1295_v40 = vrot.slane %v746_v10, 6  ;;  %v821_v21 = vsel %vm8291_vm2, %v780_v44, %v800_v16  ;;  %v841_v22 = vsel %vm8291_vm2, %v800_v16, %v780_v44 }
  0x5c   : > { %v986_v49 = vsel %vm8292_vm3, %v945_v17, %v965_v34  ;;  %v1006_v23 = vsel %vm8292_vm3, %v965_v34, %v945_v17  ;;  %v910_v25 = vmax.f32 %v745_v0, %v821_v21  ;;  %vm8371_vm7 = vcmp.lt.s32.totalorder %v4975_v3, 1 }
  0x5d   : > { %v1171_v26 = vsel %vm8371_vm7, %v1130_v18, %v1110_v45  ;;  %v1336_v28 = vsel %vm8297_vm6, %v1295_v40, %v1275_v4  ;;  %vm8372_vm8 = vcmp.lt.s32.totalorder %v4997_v12, 15  ;;  %vm8373_vm0 = vcmp.ge.s32.totalorder %v4975_v3, 1  ;;  %vm8376_vm3 = vmmov %vm8371_vm7 }
  0x5e   : > { %v871_v29 = vsel %vm8372_vm8, %v841_v22, -1e+30  ;;  %v1200_v5 = vsel %vm8373_vm0, %v1171_v26, -1e+30  ;;  %vm8374_vm9 = vcmp.ge.s32.totalorder %v4975_v3, 2  ;;  %vm8375_vm2 = vcmp.lt.s32.totalorder %v4997_v12, 14 }
  0x5f   : > { %v1365_v30 = vsel %vm8374_vm9, %v1336_v28, -1e+30  ;;  %v911_v6 = vmax.f32 %v746_v10, %v871_v29  ;;  %v1036_v35 = vsel %vm8375_vm2, %v1006_v23, -1e+30  ;;  %v1075_v36 = vmax.f32 %v910_v25, %v986_v49 }
  0x60   : > { %v1151_v37 = vsel %vm8376_vm3, %v1110_v45, %v1130_v18  ;;  %v1316_v38 = vsel %vm8297_vm6, %v1275_v4, %v1295_v40  ;;  %v747_v41 = vmax.f32 %v707_v15, %v5367_v11  ;;  %v748_v46 = vmax.f32 %v708_v33, %v5371_v13  ;;  %v370_v45 = vld [vmem:[%s5226_s14 + $0x38] sm:$0xff] }
  0x61   : > { %v1076_v42 = vmax.f32 %v911_v6, %v1036_v35  ;;  %vm471_vm7 = vcmp.lt.s32.totalorder %v423_v56, 16  ;;  %v629_v47 = vmax.f32 %v5230_v61, %v5265_v19  ;;  %v1240_v51 = vmax.f32 %v1075_v36, %v1200_v5  ;;  %v371_v35 = vld [vmem:[%s5226_s14 + $0x40] sm:$0xff]  ;;  %v372_v36 = vld [vmem:[%s5226_s14 + $0x48] sm:$0xff] }
  0x62   : > { %v781_v53 = vrot.slane %v747_v41, 1  ;;  %v946_v54 = vrot.slane %v747_v41, 2  ;;  %v1111_v55 = vrot.slane %v747_v41, 7  ;;  %vm8377_vm2 = vcmp.ge.s32.totalorder %v423_v56, 0 }
  0x63   : > { %vm5407_vm9 = vmand %vm8377_vm2, %vm471_vm7  ;;  %v8378_v57 = vmov 0  ;;  %v1241_v31 = vmax.f32 %v1076_v42, %v1151_v37  ;;  %v801_v59 = vrot.slane %v748_v46, 1  ;;  %v966_v60 = vrot.slane %v748_v46, 2 }
  0x64   : > { %v8379_v57 = vsel %vm5407_vm9, 4294967295, %v8378_v57  ;;  %v1131_v63 = vrot.slane %v748_v46, 7  ;;  %v1405_v8 = vmax.f32 %v1240_v51, %v1365_v30  ;;  %v1276_v0 = vrot.slane %v747_v41, 6 }
  0x65   : > { %v1296_v10 = vrot.slane %v748_v46, 6  ;;  %v5413_v61 = vsel %vm5407_vm9, %v369_v48, -1e+30  ;;  %v1406_v14 = vmax.f32 %v1241_v31, %v1316_v38  ;;  %vm8380_vm3 = vcmp.lt.s32.totalorder %v4975_v3, 7 }
  0x66   : > { %v822_v56 = vsel %vm8380_vm3, %v781_v53, %v801_v59  ;;  %vm8381_vm8 = vcmp.lt.s32.totalorder %v4975_v3, 6  ;;  %vm8382_vm0 = vcmp.lt.s32.totalorder %v4975_v3, 1  ;;  %vm8383_vm7 = vcmask 31744   ;;  %vm8385_vm5 = vmmov %vm8380_vm3 }
  0x67   : > { %v987_v15 = vsel %vm8381_vm8, %v946_v54, %v966_v60  ;;  %v1172_v33 = vsel %vm8382_vm0, %v1131_v63, %v1111_v55  ;;  %4649 = vmatprep.mubr.msk.f32.mxu0 %vm8383_vm7, %v1405_v8  ;;  %v912_v44 = vmax.f32 %v747_v41, %v822_v56  ;;  %vm8384_vm2 = vcmp.ge.s32.totalorder %v4975_v3, 1  ;;  %vm8386_vm3 = vmmov %vm8383_vm7 }
  0x68   : > { %v1202_v16 = vsel %vm8384_vm2, %v1172_v33, -1e+30  ;;  %v1337_v17 = vsel %vm8297_vm6, %v1296_v10, %v1276_v0  ;;  %v842_v34 = vsel %vm8385_vm5, %v801_v59, %v781_v53  ;;  %4650 = vmatmul.mubr.msk.f32.gmra.mxu0 %vm8386_vm3, %v1406_v14  ;;  %vm8387_vm8 = vcmp.ge.s32.totalorder %v4975_v3, 2 }
  0x69   : > { %v1367_v18 = vsel %vm8387_vm8, %v1337_v17, -1e+30  ;;  %vm8388_vm0 = vcmp.lt.s32.totalorder %v4997_v12, 15  ;;  %vm8389_vm7 = vcmp.lt.s32.totalorder %v4975_v3, 6  ;;  %vm8390_vm2 = vcmp.lt.s32.totalorder %v4975_v3, 1 }
  0x6a   : > { %v873_v4 = vsel %vm8388_vm0, %v842_v34, -1e+30  ;;  %v1007_v40 = vsel %vm8389_vm7, %v966_v60, %v946_v54  ;;  %v1152_v21 = vsel %vm8390_vm2, %v1111_v55, %v1131_v63  ;;  %v1077_v49 = vmax.f32 %v912_v44, %v987_v15 }
  0x6b   : > { %v913_v22 = vmax.f32 %v748_v46, %v873_v4  ;;  %vm8391_vm5 = vcmp.lt.s32.totalorder %v4997_v12, 14  ;;  %v1317_v25 = vsel %vm8297_vm6, %v1276_v0, %v1296_v10  ;;  %v5444_v26 = vsel %vm5407_vm9, %v370_v45, -1e+30 }
  0x6c   : > { %v1038_v23 = vsel %vm8391_vm5, %v1007_v40, -1e+30  ;;  %v630_v28 = vmax.f32 %v5234_v62, %v5269_v20  ;;  %v669_v29 = vmax.f32 %v629_v47, %v5311_v1  ;;  %v424_v5 = vadd.s32 12, %v4973_v2 }
  0x6d   : > { %v1242_v30 = vmax.f32 %v1077_v49, %v1202_v16  ;;  %v1078_v6 = vmax.f32 %v913_v22, %v1038_v23  ;;  %v631_v37 = vmax.f32 %v5265_v19, %v5311_v1  ;;  %v632_v38 = vmax.f32 %v5269_v20, %v5315_v9 }
  0x6e   : > { %v670_v41 = vmax.f32 %v630_v28, %v5315_v9  ;;  %v709_v42 = vmax.f32 %v669_v29, %v5367_v11  ;;  %vm448_vm3 = vcmp.ge.s32.totalorder %v424_v5, 0  ;;  %vm472_vm8 = vcmp.lt.s32.totalorder %v424_v5, 16 }
  0x6f   : > { %v1407_v62 = vmax.f32 %v1242_v30, %v1367_v18  ;;  %v1243_v46 = vmax.f32 %v1078_v6, %v1152_v21  ;;  %vm5458_vm0 = vmand %vm448_vm3, %vm472_vm8  ;;  %v8392_v48 = vmov 0  ;;  %v671_v47 = vmax.f32 %v631_v37, %v5367_v11 }
  0x70   : > { %v8393_v48 = vsel %vm5458_vm0, 4294967295, %v8392_v48  ;;  %v672_v51 = vmax.f32 %v632_v38, %v5371_v13  ;;  %v710_v19 = vmax.f32 %v670_v41, %v5371_v13  ;;  %v749_v20 = vmax.f32 %v709_v42, %v5413_v61 }
  0x71   : > { %v5468_v53 = vsel %vm5458_vm0, %v371_v35, -1e+30  ;;  %v5472_v54 = vsel %vm5458_vm0, %v372_v36, -1e+30  ;;  %vm8394_vm7 = vcmask 31744   ;;  %v1408_v55 = vmax.f32 %v1243_v46, %v1317_v25 }
  0x72   : > { %4652 = vmatprep.mubr.msk.f32.mxu0 %vm8394_vm7, %v1407_v62  ;;  %v711_v31 = vmax.f32 %v671_v47, %v5413_v61  ;;  %v712_v59 = vmax.f32 %v672_v51, %v5444_v26  ;;  %v5478_v60 = vadd.s32 13, %v4973_v2  ;;  %v750_v63 = vmax.f32 %v710_v19, %v5444_v26  ;;  %vm8395_vm2 = vmmov %vm8394_vm7 }
  0x73   : > { %v782_v8 = vrot.slane %v749_v20, 1  ;;  %v947_v0 = vrot.slane %v749_v20, 2  ;;  %v1112_v10 = vrot.slane %v749_v20, 7  ;;  %4653 = vmatmul.mubr.msk.f32.gmra.mxu0 %vm8395_vm2, %v1408_v55  ;;  %v1277_v14 = vrot.slane %v749_v20, 6 }
  0x74   : > { %v751_v56 = vmax.f32 %v711_v31, %v5468_v53  ;;  %v5484_v15 = vmax.f32 %v712_v59, %v5472_v54  ;;  %v802_v33 = vrot.slane %v750_v63, 1  ;;  %v967_v44 = vrot.slane %v750_v63, 2 }
  0x75   : > { %v1132_v16 = vrot.slane %v750_v63, 7  ;;  %v1297_v17 = vrot.slane %v750_v63, 6  ;;  %vm8396_vm5 = vcmp.lt.s32.totalorder %v4975_v3, 7  ;;  %vm8397_vm3 = vcmp.lt.s32.totalorder %v4975_v3, 6 }
  0x76   : > { %v783_v34 = vrot.slane %v751_v56, 1  ;;  %v803_v45 = vrot.slane %v5484_v15, 1  ;;  %v948_v18 = vrot.slane %v751_v56, 2  ;;  %v968_v4 = vrot.slane %v5484_v15, 2 }
  0x77   : > { %v823_v40 = vsel %vm8396_vm5, %v782_v8, %v802_v33  ;;  %v988_v21 = vsel %vm8397_vm3, %v947_v0, %v967_v44  ;;  %vm8398_vm8 = vcmp.lt.s32.totalorder %v4975_v3, 1  ;;  %v1338_v22 = vsel %vm8297_vm6, %v1297_v17, %v1277_v14 }
  0x78   : > { %v1173_v49 = vsel %vm8398_vm8, %v1132_v16, %v1112_v10  ;;  %vm449_vm7 = vcmp.ge.s32.totalorder %v5478_v60, 0  ;;  %v914_v23 = vmax.f32 %v749_v20, %v823_v40  ;;  %vm8399_vm2 = vcmp.ge.s32.totalorder %v4975_v3, 1  ;;  %v373_v40 = vld [vmem:[%s5226_s14 + $0x50] sm:$0xff] }
  0x79   : > { %v1204_v25 = vsel %vm8399_vm2, %v1173_v49, -1e+30  ;;  %vm8400_vm0 = vcmp.ge.s32.totalorder %v4975_v3, 2  ;;  %v843_v29 = vsel %vm8396_vm5, %v802_v33, %v782_v8  ;;  %vm8402_vm3 = vcmp.lt.s32.totalorder %v4997_v12, 15 }
  0x7a   : > { %v1369_v28 = vsel %vm8400_vm0, %v1338_v22, -1e+30  ;;  %v875_v5 = vsel %vm8402_vm3, %v843_v29, -1e+30  ;;  %vm8403_vm8 = vcmp.lt.s32.totalorder %v4975_v3, 6  ;;  %vm8404_vm2 = vcmp.lt.s32.totalorder %v4975_v3, 1 }
  0x7b   : > { %v1008_v30 = vsel %vm8403_vm8, %v967_v44, %v947_v0  ;;  %v1153_v6 = vsel %vm8404_vm2, %v1112_v10, %v1132_v16  ;;  %v1318_v35 = vsel %vm8297_vm6, %v1277_v14, %v1297_v17  ;;  %v1079_v36 = vmax.f32 %v914_v23, %v988_v21  ;;  %vm8406_vm3 = vmmov %vm8403_vm8  ;;  %v374_v21 = vld [vmem:[%s5226_s14 + $0x58] sm:$0xff] }
  0x7c   : > { %v915_v37 = vmax.f32 %v750_v63, %v875_v5  ;;  %vm8405_vm0 = vcmp.lt.s32.totalorder %v4997_v12, 14  ;;  %v824_v41 = vsel %vm8396_vm5, %v783_v34, %v803_v45  ;;  %v989_v62 = vsel %vm8406_vm3, %v948_v18, %v968_v4  ;;  %vm8407_vm8 = vmmov %vm8404_vm2 }
  0x7d   : > { %v1040_v38 = vsel %vm8405_vm0, %v1008_v30, -1e+30  ;;  %v916_v42 = vmax.f32 %v751_v56, %v824_v41  ;;  %v1113_v46 = vrot.slane %v751_v56, 7  ;;  %v1133_v47 = vrot.slane %v5484_v15, 7  ;;  %vm8408_vm2 = vmmov %vm8396_vm5 }
  0x7e   : > { %v1244_v51 = vmax.f32 %v1079_v36, %v1204_v25  ;;  %v1080_v19 = vmax.f32 %v915_v37, %v1040_v38  ;;  %v1278_v20 = vrot.slane %v751_v56, 6  ;;  %v1298_v55 = vrot.slane %v5484_v15, 6  ;;  %vm8409_vm0 = vmmov %vm8406_vm3 }
  0x7f   : > { %v1081_v31 = vmax.f32 %v916_v42, %v989_v62  ;;  %v1174_v59 = vsel %vm8407_vm8, %v1133_v47, %v1113_v46  ;;  %v844_v63 = vsel %vm8408_vm2, %v803_v45, %v783_v34  ;;  %v1009_v8 = vsel %vm8409_vm0, %v968_v4, %v948_v18 }
  0x80   : > { %v1409_v0 = vmax.f32 %v1244_v51, %v1369_v28  ;;  %v1245_v10 = vmax.f32 %v1080_v19, %v1153_v6  ;;  %vm8410_vm5 = vcmp.ge.s32.totalorder %v4975_v3, 1  ;;  %v1339_v56 = vsel %vm8297_vm6, %v1298_v55, %v1278_v20  ;;  %v375_v6 = vld [vmem:[%s5226_s14 + $0x60] sm:$0xff] }
  0x81   : > { %v1206_v14 = vsel %vm8410_vm5, %v1174_v59, -1e+30  ;;  %vm8411_vm3 = vcmp.ge.s32.totalorder %v4975_v3, 2  ;;  %vm8412_vm8 = vcmp.lt.s32.totalorder %v4997_v12, 15  ;;  %vm8413_vm2 = vcmp.lt.s32.totalorder %v4997_v12, 14 }
  0x82   : > { %v1246_v33 = vmax.f32 %v1081_v31, %v1206_v14  ;;  %v1371_v44 = vsel %vm8411_vm3, %v1339_v56, -1e+30  ;;  %v877_v16 = vsel %vm8412_vm8, %v844_v63, -1e+30  ;;  %v1042_v17 = vsel %vm8413_vm2, %v1009_v8, -1e+30 }
  0x83   : > { %vm8414_vm0 = vcmask 31744   ;;  %v1410_v34 = vmax.f32 %v1245_v10, %v1318_v35  ;;  %v917_v45 = vmax.f32 %v5484_v15, %v877_v16  ;;  %vm8415_vm5 = vcmp.lt.s32.totalorder %v4975_v3, 1  ;;  %v376_v35 = vld [vmem:[%s5226_s14 + $0x68] sm:$0xff] }
  0x84   : > { %4655 = vmatprep.mubr.msk.f32.mxu0 %vm8414_vm0, %v1409_v0  ;;  %v1154_v18 = vsel %vm8415_vm5, %v1113_v46, %v1133_v47  ;;  %v1319_v4 = vsel %vm8297_vm6, %v1278_v20, %v1298_v55  ;;  %v1411_v49 = vmax.f32 %v1246_v33, %v1371_v44  ;;  %vm473_vm3 = vcmp.lt.s32.totalorder %v5478_v60, 16  ;;  %vm8416_vm8 = vmmov %vm8414_vm0 }
  0x85   : > { %v633_v22 = vmax.f32 %v5311_v1, %v5367_v11  ;;  %v634_v15 = vmax.f32 %v5315_v9, %v5371_v13  ;;  %4656 = vmatmul.mubr.msk.f32.gmra.mxu0 %vm8416_vm8, %v1410_v34  ;;  %v1082_v23 = vmax.f32 %v917_v45, %v1042_v17  ;;  %vm5565_vm2 = vmand %vm449_vm7, %vm473_vm3  ;;  %v8417_v25 = vmov 0 }
  0x86   : > { %v8418_v25 = vsel %vm5565_vm2, 4294967295, %v8417_v25  ;;  %v426_v28 = vadd.s32 14, %v4973_v2  ;;  %v635_v29 = vmax.f32 %v5367_v11, %v5413_v61  ;;  %v636_v1 = vmax.f32 %v5371_v13, %v5444_v26  ;;  %4658 = vmatprep.mubr.msk.f32.mxu0 %vm8414_vm0, %v1411_v49 }
  0x87   : > { %v5577_v9 = vsel %vm5565_vm2, %v373_v40, -1e+30  ;;  %v5581_v60 = vsel %vm5565_vm2, %v374_v21, -1e+30  ;;  %v673_v5 = vmax.f32 %v633_v22, %v5413_v61  ;;  %v674_v30 = vmax.f32 %v634_v15, %v5444_v26 }
  0x88   : > { %v1247_v11 = vmax.f32 %v1082_v23, %v1154_v18  ;;  %vm450_vm7 = vcmp.ge.s32.totalorder %v426_v28, 0  ;;  %vm474_vm5 = vcmp.lt.s32.totalorder %v426_v28, 16  ;;  %v675_v13 = vmax.f32 %v635_v29, %v5468_v53 }
  0x89   : > { %v713_v36 = vmax.f32 %v673_v5, %v5468_v53  ;;  %v714_v37 = vmax.f32 %v674_v30, %v5472_v54  ;;  %vm5596_vm3 = vmand %vm450_vm7, %vm474_vm5  ;;  %v8420_v38 = vmov 0  ;;  %v676_v41 = vmax.f32 %v636_v1, %v5472_v54 }
  0x8a   : > { %v8421_v38 = vsel %vm5596_vm3, 4294967295, %v8420_v38  ;;  %v427_v42 = vadd.s32 15, %v4973_v2  ;;  %v1412_v62 = vmax.f32 %v1247_v11, %v1319_v4  ;;  %v5604_v46 = vsel %vm5596_vm3, %v375_v6, -1e+30  ;;  %v377_v6 = vld [vmem:[%s5226_s14 + $0x70] sm:$0xff] }
  0x8b   : > { %8422 = vst [vmem:[#allocation2_spill] sm:$0xff] %v8421_v38  ;;  %v5608_v47 = vsel %vm5596_vm3, %v376_v35, -1e+30  ;;  %v715_v51 = vmax.f32 %v675_v13, %v5577_v9  ;;  %v753_v19 = vmax.f32 %v713_v36, %v5577_v9  ;;  %v754_v20 = vmax.f32 %v714_v37, %v5581_v60 }
  0x8c   : > { %v716_v55 = vmax.f32 %v676_v41, %v5581_v60  ;;  %4659 = vmatmul.mubr.msk.f32.gmra.mxu0 %vm8414_vm0, %v1412_v62  ;;  %v637_v59 = vmax.f32 %v5413_v61, %v5468_v53  ;;  %v638_v63 = vmax.f32 %v5444_v26, %v5472_v54  ;;  %vm8423_vm5 = vcmp.lt.s32.totalorder %v4975_v3, 7 }
  0x8d   : > { %v5622_v31 = vmax.f32 %v715_v51, %v5604_v46  ;;  %v784_v8 = vrot.slane %v753_v19, 1  ;;  %v804_v0 = vrot.slane %v754_v20, 1  ;;  %v949_v10 = vrot.slane %v753_v19, 2  ;;  %vm8425_vm8 = vmmov %vm8423_vm5 }
  0x8e   : > { %v969_v14 = vrot.slane %v754_v20, 2  ;;  %v1114_v56 = vrot.slane %v753_v19, 7  ;;  %v1134_v33 = vrot.slane %v754_v20, 7  ;;  %v1279_v44 = vrot.slane %v753_v19, 6 }
  0x8f   : > { %v1299_v16 = vrot.slane %v754_v20, 6  ;;  %v825_v17 = vsel %vm8423_vm5, %v784_v8, %v804_v0  ;;  %vm8424_vm0 = vcmp.lt.s32.totalorder %v4975_v3, 6  ;;  %v845_v45 = vsel %vm8425_vm8, %v804_v0, %v784_v8 }
  0x90   : > { %v990_v34 = vsel %vm8424_vm0, %v949_v10, %v969_v14  ;;  %vm8426_vm7 = vmmov %vm8424_vm0  ;;  %v918_v4 = vmax.f32 %v753_v19, %v825_v17  ;;  %vm8427_vm6 = vcmp.lt.s32.totalorder %v4975_v3, 1  ;;  %vm8428_vm3 = vcmp.lt.s32.totalorder %v4975_v3, 2 }
  0x91   : > { %v1010_v18 = vsel %vm8426_vm7, %v969_v14, %v949_v10  ;;  %v1175_v40 = vsel %vm8427_vm6, %v1134_v33, %v1114_v56  ;;  %v1340_v21 = vsel %vm8428_vm3, %v1299_v16, %v1279_v44  ;;  %vm8429_vm5 = vcmp.lt.s32.totalorder %v4997_v12, 15  ;;  %vm8433_vm2 = vmmov %vm8427_vm6 }
  0x92   : > { %v879_v49 = vsel %vm8429_vm5, %v845_v45, -1e+30  ;;  %vm8430_vm0 = vcmp.ge.s32.totalorder %v4975_v3, 1  ;;  %vm8431_vm8 = vcmp.ge.s32.totalorder %v4975_v3, 2  ;;  %vm8432_vm7 = vcmp.lt.s32.totalorder %v4997_v12, 14  ;;  %vm8434_vm6 = vmmov %vm8428_vm3 }
  0x93   : > { %v1208_v22 = vsel %vm8430_vm0, %v1175_v40, -1e+30  ;;  %v1373_v15 = vsel %vm8431_vm8, %v1340_v21, -1e+30  ;;  %v919_v23 = vmax.f32 %v754_v20, %v879_v49  ;;  %v1044_v28 = vsel %vm8432_vm7, %v1010_v18, -1e+30 }
  0x94   : > { %v1083_v29 = vmax.f32 %v918_v4, %v990_v34  ;;  %v1155_v1 = vsel %vm8433_vm2, %v1114_v56, %v1134_v33  ;;  %v1320_v5 = vsel %vm8434_vm6, %v1279_v44, %v1299_v16  ;;  %v756_v30 = vmax.f32 %v716_v55, %v5608_v47  ;;  %v378_v34 = vld [vmem:[%s5226_s14 + $0x78] sm:$0xff] }
  0x95   : > { %vm8435_vm3 = vcmp.lt.s32.totalorder %v427_v42, 16  ;;  %vm8436_vm5 = vcmp.ge.s32.totalorder %v427_v42, 0  ;;  %v8437_v35 = vmov 0  ;;  %v1084_v11 = vmax.f32 %v919_v23, %v1044_v28 }
  0x96   : > { %vm5657_vm0 = vmand %vm8436_vm5, %vm8435_vm3  ;;  %v785_v13 = vrot.slane %v5622_v31, 1  ;;  %v950_v36 = vrot.slane %v5622_v31, 2  ;;  %v1115_v37 = vrot.slane %v5622_v31, 7  ;;  %v1248_v41 = vmax.f32 %v1083_v29, %v1208_v22 }
  0x97   : > { %v8438_v35 = vsel %vm5657_vm0, 4294967295, %v8437_v35  ;;  %v805_v62 = vrot.slane %v756_v30, 1  ;;  %v970_v51 = vrot.slane %v756_v30, 2  ;;  %v1135_v19 = vrot.slane %v756_v30, 7 }
  0x98   : > { %8439 = vst [vmem:[#allocation3_spill] sm:$0xff] %v8438_v35  ;;  %v1249_v42 = vmax.f32 %v1084_v11, %v1155_v1  ;;  %v1280_v20 = vrot.slane %v5622_v31, 6  ;;  %v1300_v55 = vrot.slane %v756_v30, 6  ;;  %v5670_v8 = vsel %vm5657_vm0, %v377_v6, -1e+30 }
  0x99   : > { %v1413_v0 = vmax.f32 %v1248_v41, %v1373_v15  ;;  %vm8440_vm2 = vcmp.lt.s32.totalorder %v4975_v3, 7  ;;  %vm8441_vm8 = vcmp.lt.s32.totalorder %v4975_v3, 6  ;;  %vm8442_vm7 = vcmp.lt.s32.totalorder %v4975_v3, 1 }
  0x9a   : > { %v826_v10 = vsel %vm8440_vm2, %v785_v13, %v805_v62  ;;  %v991_v14 = vsel %vm8441_vm8, %v950_v36, %v970_v51  ;;  %v1176_v56 = vsel %vm8442_vm7, %v1135_v19, %v1115_v37  ;;  %v1414_v33 = vmax.f32 %v1249_v42, %v1320_v5 }
  0x9b   : > { %v920_v44 = vmax.f32 %v5622_v31, %v826_v10  ;;  %vm8443_vm6 = vcmp.ge.s32.totalorder %v4975_v3, 1  ;;  %vm8444_vm3 = vcmp.lt.s32.totalorder %v4975_v3, 2  ;;  %vm8445_vm5 = vcmask 31744  }
  0x9c   : > { %v1210_v16 = vsel %vm8443_vm6, %v1176_v56, -1e+30  ;;  %v1341_v17 = vsel %vm8444_vm3, %v1300_v55, %v1280_v20  ;;  %4661 = vmatprep.mubr.msk.f32.mxu0 %vm8445_vm5, %v1413_v0  ;;  %vm8446_vm2 = vcmp.ge.s32.totalorder %v4975_v3, 2  ;;  %vm8447_vm8 = vcmp.lt.s32.totalorder %v4975_v3, 7  ;;  %vm8450_vm6 = vmmov %vm8445_vm5 }
  0x9d   : > { %v1375_v45 = vsel %vm8446_vm2, %v1341_v17, -1e+30  ;;  %v846_v18 = vsel %vm8447_vm8, %v805_v62, %v785_v13  ;;  %vm8448_vm7 = vcmp.lt.s32.totalorder %v4975_v3, 6  ;;  %vm8449_vm9 = vcmp.lt.s32.totalorder %v4975_v3, 1  ;;  %4662 = vmatmul.mubr.msk.f32.gmra.mxu0 %vm8450_vm6, %v1414_v33 }
  0x9e   : > { %v1011_v4 = vsel %vm8448_vm7, %v970_v51, %v950_v36  ;;  %v1156_v31 = vsel %vm8449_vm9, %v1115_v37, %v1135_v19  ;;  %v1085_v40 = vmax.f32 %v920_v44, %v991_v14  ;;  %vm8451_vm3 = vcmp.lt.s32.totalorder %v4997_v12, 15  ;;  %v396_v36 = vld [vmem:[%s5697_s29 + $0x8] sm:$0xff] }
  0x9f   : > { %v881_v21 = vsel %vm8451_vm3, %v846_v18, -1e+30  ;;  %vm8452_vm5 = vcmp.lt.s32.totalorder %v4997_v12, 14  ;;  %vm8453_vm2 = vcmp.lt.s32.totalorder %v4975_v3, 2  ;;  %v5708_v23 = vsel %vm5657_vm0, %v378_v34, -1e+30 }
  0xa0   : > { %v1046_v49 = vsel %vm8452_vm5, %v1011_v4, -1e+30  ;;  %v1321_v22 = vsel %vm8453_vm2, %v1280_v20, %v1300_v55  ;;  %v921_v15 = vmax.f32 %v756_v30, %v881_v21  ;;  %v677_v28 = vmax.f32 %v637_v59, %v5577_v9  ;;  %v395_v59 = vld [vmem:[%s5697_s29] sm:$0xff]  ;;  %vm8457_vm5 = vmmov %vm8450_vm6 }
  0xa1   : > { %v678_v29 = vmax.f32 %v638_v63, %v5581_v60  ;;  %v1250_v1 = vmax.f32 %v1085_v40, %v1210_v16  ;;  %v428_v5 = vadd.s32 16, %v4973_v2  ;;  %v639_v30 = vmax.f32 %v5468_v53, %v5577_v9 }
  0xa2   : > { %v640_v6 = vmax.f32 %v5472_v54, %v5581_v60  ;;  %v1086_v11 = vmax.f32 %v921_v15, %v1046_v49  ;;  %v717_v13 = vmax.f32 %v677_v28, %v5604_v46  ;;  %v5728_v37 = vadd.s32 17, %v4973_v2 }
  0xa3   : > { %v718_v61 = vmax.f32 %v678_v29, %v5608_v47  ;;  %v1415_v26 = vmax.f32 %v1250_v1, %v1375_v45  ;;  %vm452_vm9 = vcmp.ge.s32.totalorder %v428_v5, 0  ;;  %vm476_vm8 = vcmp.lt.s32.totalorder %v428_v5, 16 }
  0xa4   : > { %v679_v63 = vmax.f32 %v639_v30, %v5604_v46  ;;  %v1251_v41 = vmax.f32 %v1086_v11, %v1156_v31  ;;  %v757_v53 = vmax.f32 %v717_v13, %v5670_v8  ;;  %vm5733_vm7 = vmand %vm452_vm9, %vm476_vm8  ;;  %v8454_v62 = vmov 0 }
  0xa5   : > { %v758_v54 = vmax.f32 %v718_v61, %v5708_v23  ;;  %v8455_v62 = vsel %vm5733_vm7, 4294967295, %v8454_v62  ;;  %v680_v51 = vmax.f32 %v640_v6, %v5608_v47  ;;  %4664 = vmatprep.mubr.msk.f32.mxu0 %vm8450_vm6, %v1415_v26  ;;  %v5741_v19 = vsel %vm5733_vm7, %v395_v59, -1e+30 }
  0xa6   : > { %8456 = vst [vmem:[#allocation4_spill] sm:$0xff] %v8455_v62  ;;  %v5745_v42 = vsel %vm5733_vm7, %v396_v36, -1e+30  ;;  %v719_v20 = vmax.f32 %v679_v63, %v5670_v8  ;;  %v1416_v55 = vmax.f32 %v1251_v41, %v1321_v22  ;;  %v786_v0 = vrot.slane %v757_v53, 1 }
  0xa7   : > { %v806_v10 = vrot.slane %v758_v54, 1  ;;  %v951_v14 = vrot.slane %v757_v53, 2  ;;  %v971_v56 = vrot.slane %v758_v54, 2  ;;  %v1116_v33 = vrot.slane %v757_v53, 7 }
  0xa8   : > { %v1136_v44 = vrot.slane %v758_v54, 7  ;;  %v1281_v16 = vrot.slane %v757_v53, 6  ;;  %4665 = vmatmul.mubr.msk.f32.gmra.mxu0 %vm8457_vm5, %v1416_v55  ;;  %vm8458_vm2 = vcmp.lt.s32.totalorder %v4975_v3, 7  ;;  %v1301_v34 = vrot.slane %v758_v54, 6 }
  0xa9   : > { %v827_v17 = vsel %vm8458_vm2, %v786_v0, %v806_v10  ;;  %vm8459_vm9 = vmmov %vm8458_vm2  ;;  %v720_v18 = vmax.f32 %v680_v51, %v5708_v23  ;;  %vm8460_vm8 = vcmp.lt.s32.totalorder %v4975_v3, 6  ;;  %vm8461_vm6 = vcmp.lt.s32.totalorder %v4975_v3, 1 }
  0xaa   : > { %v847_v45 = vsel %vm8459_vm9, %v806_v10, %v786_v0  ;;  %v922_v4 = vmax.f32 %v757_v53, %v827_v17  ;;  %v992_v31 = vsel %vm8460_vm8, %v951_v14, %v971_v56  ;;  %v1177_v40 = vsel %vm8461_vm6, %v1136_v44, %v1116_v33  ;;  %vm8464_vm9 = vmmov %vm8460_vm8  ;;  %v397_v17 = vld [vmem:[%s5697_s29 + $0x10] sm:$0xff] }
  0xab   : > { %v883_v21 = vsel %vm8451_vm3, %v847_v45, -1e+30  ;;  %vm8462_vm5 = vcmp.ge.s32.totalorder %v4975_v3, 1  ;;  %vm8463_vm2 = vcmp.lt.s32.totalorder %v4975_v3, 2  ;;  %v1012_v28 = vsel %vm8464_vm9, %v971_v56, %v951_v14 }
  0xac   : > { %v1212_v49 = vsel %vm8462_vm5, %v1177_v40, -1e+30  ;;  %v1342_v22 = vsel %vm8463_vm2, %v1301_v34, %v1281_v16  ;;  %v923_v15 = vmax.f32 %v758_v54, %v883_v21  ;;  %v1087_v29 = vmax.f32 %v922_v4, %v992_v31  ;;  %vm8467_vm3 = vmmov %vm8463_vm2 }
  0xad   : > { %vm8465_vm7 = vcmp.ge.s32.totalorder %v4975_v3, 2  ;;  %vm8466_vm8 = vcmp.lt.s32.totalorder %v4997_v12, 14  ;;  %v1157_v30 = vsel %vm8461_vm6, %v1116_v33, %v1136_v44  ;;  %v1322_v11 = vsel %vm8467_vm3, %v1281_v16, %v1301_v34  ;;  %v398_v34 = vld [vmem:[%s5697_s29 + $0x18] sm:$0xff] }
  0xae   : > { %v1377_v1 = vsel %vm8465_vm7, %v1342_v22, -1e+30  ;;  %v1048_v5 = vsel %vm8466_vm8, %v1012_v28, -1e+30  ;;  %v759_v13 = vmax.f32 %v719_v20, %v5741_v19  ;;  %v760_v61 = vmax.f32 %v720_v18, %v5745_v42  ;;  %vm8470_vm8 = vmmov %vm8461_vm6 }
  0xaf   : > { %v1088_v6 = vmax.f32 %v923_v15, %v1048_v5  ;;  %v1252_v59 = vmax.f32 %v1087_v29, %v1212_v49  ;;  %vm477_vm5 = vcmp.lt.s32.totalorder %v5728_v37, 16  ;;  %v641_v36 = vmax.f32 %v5577_v9, %v5604_v46 }
  0xb0   : > { %v642_v26 = vmax.f32 %v5581_v60, %v5608_v47  ;;  %v787_v41 = vrot.slane %v759_v13, 1  ;;  %v807_v53 = vrot.slane %v760_v61, 1  ;;  %v952_v54 = vrot.slane %v759_v13, 2 }
  0xb1   : > { %v1253_v63 = vmax.f32 %v1088_v6, %v1157_v30  ;;  %v1417_v51 = vmax.f32 %v1252_v59, %v1377_v1  ;;  %v972_v55 = vrot.slane %v760_v61, 2  ;;  %v1117_v20 = vrot.slane %v759_v13, 7 }
  0xb2   : > { %v1137_v0 = vrot.slane %v760_v61, 7  ;;  %vm8468_vm7 = vcmp.lt.s32.totalorder %v4975_v3, 7  ;;  %v1282_v56 = vrot.slane %v759_v13, 6  ;;  %v1302_v33 = vrot.slane %v760_v61, 6 }
  0xb3   : > { %v1418_v10 = vmax.f32 %v1253_v63, %v1322_v11  ;;  %v828_v14 = vsel %vm8468_vm7, %v787_v41, %v807_v53  ;;  %vm8469_vm2 = vcmask 31744   ;;  %v993_v60 = vsel %vm8464_vm9, %v952_v54, %v972_v55  ;;  %vm8471_vm6 = vmmov %vm8468_vm7 }
  0xb4   : > { %4667 = vmatprep.mubr.msk.f32.mxu0 %vm8469_vm2, %v1417_v51  ;;  %v924_v9 = vmax.f32 %v759_v13, %v828_v14  ;;  %v1178_v44 = vsel %vm8470_vm8, %v1137_v0, %v1117_v20  ;;  %v848_v16 = vsel %vm8471_vm6, %v807_v53, %v787_v41  ;;  %vm8472_vm3 = vcmp.ge.s32.totalorder %v5728_v37, 0 }
  0xb5   : > { %vm5797_vm7 = vmand %vm8472_vm3, %vm477_vm5  ;;  %v8473_v45 = vmov 0  ;;  %4668 = vmatmul.mubr.msk.f32.gmra.mxu0 %vm8469_vm2, %v1418_v10  ;;  %vm8476_vm9 = vcmp.ge.s32.totalorder %v4975_v3, 1  ;;  %vm8477_vm8 = vcmp.lt.s32.totalorder %v4975_v3, 2  ;;  %vm8478_vm6 = vcmp.lt.s32.totalorder %v4997_v12, 15 }
  0xb6   : > { %v8474_v45 = vsel %vm5797_vm7, 4294967295, %v8473_v45  ;;  %v1214_v18 = vsel %vm8476_vm9, %v1178_v44, -1e+30  ;;  %v1343_v4 = vsel %vm8477_vm8, %v1302_v33, %v1282_v56  ;;  %v885_v31 = vsel %vm8478_vm6, %v848_v16, -1e+30  ;;  %vm8483_vm9 = vmmov %vm8477_vm8 }
  0xb7   : > { %8475 = vst [vmem:[#allocation5_spill] sm:$0xff] %v8474_v45  ;;  %vm8479_vm0 = vcmp.lt.s32.totalorder %v4975_v3, 6  ;;  %v1089_v21 = vmax.f32 %v924_v9, %v993_v60  ;;  %vm8480_vm5 = vcmp.ge.s32.totalorder %v4975_v3, 2  ;;  %v925_v49 = vmax.f32 %v760_v61, %v885_v31 }
  0xb8   : > { %v1013_v40 = vsel %vm8479_vm0, %v972_v55, %v952_v54  ;;  %v1379_v37 = vsel %vm8480_vm5, %v1343_v4, -1e+30  ;;  %vm8481_vm3 = vcmp.lt.s32.totalorder %v4997_v12, 14  ;;  %vm8482_vm2 = vcmp.lt.s32.totalorder %v4975_v3, 1  ;;  %v399_v55 = vld [vmem:[%s5697_s29 + $0x20] sm:$0xff] }
  0xb9   : > { %v1050_v22 = vsel %vm8481_vm3, %v1013_v40, -1e+30  ;;  %v1158_v15 = vsel %vm8482_vm2, %v1117_v20, %v1137_v0  ;;  %v1323_v28 = vsel %vm8483_vm9, %v1282_v56, %v1302_v33  ;;  %v5820_v29 = vsel %vm5797_vm7, %v397_v17, -1e+30 }
  0xba   : > { %v5824_v1 = vsel %vm5797_vm7, %v398_v34, -1e+30  ;;  %v1254_v5 = vmax.f32 %v1089_v21, %v1214_v18  ;;  %v1090_v30 = vmax.f32 %v925_v49, %v1050_v22  ;;  %v681_v6 = vmax.f32 %v641_v36, %v5670_v8  ;;  %v400_v36 = vld [vmem:[%s5697_s29 + $0x28] sm:$0xff] }
  0xbb   : > { %v682_v11 = vmax.f32 %v642_v26, %v5708_v23  ;;  %v430_v13 = vadd.s32 18, %v4973_v2  ;;  %v643_v61 = vmax.f32 %v5604_v46, %v5670_v8  ;;  %v644_v59 = vmax.f32 %v5608_v47, %v5708_v23 }
  0xbc   : > { %v431_v63 = vadd.s32 19, %v4973_v2  ;;  %v1419_v41 = vmax.f32 %v1254_v5, %v1379_v37  ;;  %v1255_v53 = vmax.f32 %v1090_v30, %v1158_v15  ;;  %v721_v54 = vmax.f32 %v681_v6, %v5741_v19 }
  0xbd   : > { %v722_v51 = vmax.f32 %v682_v11, %v5745_v42  ;;  %vm454_vm0 = vcmp.ge.s32.totalorder %v430_v13, 0  ;;  %vm478_vm8 = vcmp.lt.s32.totalorder %v430_v13, 16  ;;  %v683_v26 = vmax.f32 %v643_v61, %v5741_v19 }
  0xbe   : > { %v684_v20 = vmax.f32 %v644_v59, %v5745_v42  ;;  %vm8484_vm6 = vcmask 31744   ;;  %v1420_v46 = vmax.f32 %v1255_v53, %v1323_v28  ;;  %v761_v47 = vmax.f32 %v721_v54, %v5820_v29  ;;  %vm5843_vm5 = vmand %vm454_vm0, %vm478_vm8 }
  0xbf   : > { %4670 = vmatprep.mubr.msk.f32.mxu0 %vm8484_vm6, %v1419_v41  ;;  %v762_v0 = vmax.f32 %v722_v51, %v5824_v1  ;;  %v8485_v10 = vmov 0  ;;  %v5849_v14 = vsel %vm5843_vm5, %v399_v55, -1e+30  ;;  %v5853_v56 = vsel %vm5843_vm5, %v400_v36, -1e+30  ;;  %vm8488_vm2 = vmmov %vm8484_vm6  ;;  %v401_v55 = vld [vmem:[%s5697_s29 + $0x30] sm:$0xff] }
  0xc0   : > { %v8486_v10 = vsel %vm5843_vm5, 4294967295, %v8485_v10  ;;  %v723_v33 = vmax.f32 %v683_v26, %v5820_v29  ;;  %v724_v9 = vmax.f32 %v684_v20, %v5824_v1  ;;  %4671 = vmatmul.mubr.msk.f32.gmra.mxu0 %vm8488_vm2, %v1420_v46  ;;  %v788_v60 = vrot.slane %v761_v47, 1 }
  0xc1   : > { %8487 = vst [vmem:[#allocation6_spill] sm:$0xff] %v8486_v10  ;;  %v808_v44 = vrot.slane %v762_v0, 1  ;;  %v953_v16 = vrot.slane %v761_v47, 2  ;;  %v973_v17 = vrot.slane %v762_v0, 2  ;;  %v1118_v34 = vrot.slane %v761_v47, 7 }
  0xc2   : > { %v1138_v18 = vrot.slane %v762_v0, 7  ;;  %v1283_v4 = vrot.slane %v761_v47, 6  ;;  %v1303_v31 = vrot.slane %v762_v0, 6  ;;  %vm8489_vm9 = vcmp.lt.s32.totalorder %v4975_v3, 7 }
  0xc3   : > { %v829_v40 = vsel %vm8489_vm9, %v788_v60, %v808_v44  ;;  %vm8490_vm0 = vcmp.lt.s32.totalorder %v4975_v3, 6  ;;  %vm8491_vm8 = vmmov %vm8489_vm9  ;;  %vm8493_vm2 = vcmp.lt.s32.totalorder %v4975_v3, 1  ;;  %vm8494_vm3 = vcmp.lt.s32.totalorder %v4975_v3, 2 }
  0xc4   : > { %v994_v21 = vsel %vm8490_vm0, %v953_v16, %v973_v17  ;;  %v849_v37 = vsel %vm8491_vm8, %v808_v44, %v788_v60  ;;  %vm8492_vm6 = vmmov %vm8490_vm0  ;;  %v926_v22 = vmax.f32 %v761_v47, %v829_v40  ;;  %v1179_v15 = vsel %vm8493_vm2, %v1138_v18, %v1118_v34 }
  0xc5   : > { %v1014_v49 = vsel %vm8492_vm6, %v973_v17, %v953_v16  ;;  %v1344_v28 = vsel %vm8494_vm3, %v1303_v31, %v1283_v4  ;;  %vm8495_vm5 = vcmp.lt.s32.totalorder %v4997_v12, 15  ;;  %vm8496_vm9 = vcmp.ge.s32.totalorder %v4975_v3, 1  ;;  %vm8499_vm6 = vmmov %vm8493_vm2 }
  0xc6   : > { %v887_v5 = vsel %vm8495_vm5, %v849_v37, -1e+30  ;;  %v1216_v30 = vsel %vm8496_vm9, %v1179_v15, -1e+30  ;;  %vm8497_vm0 = vcmp.ge.s32.totalorder %v4975_v3, 2  ;;  %vm8498_vm8 = vcmp.lt.s32.totalorder %v4997_v12, 14  ;;  %vm8500_vm2 = vmmov %vm8494_vm3 }
  0xc7   : > { %v1381_v6 = vsel %vm8497_vm0, %v1344_v28, -1e+30  ;;  %v927_v11 = vmax.f32 %v762_v0, %v887_v5  ;;  %v1052_v13 = vsel %vm8498_vm8, %v1014_v49, -1e+30  ;;  %v1091_v61 = vmax.f32 %v926_v22, %v994_v21  ;;  %v402_v22 = vld [vmem:[%s5697_s29 + $0x38] sm:$0xff] }
  0xc8   : > { %v1159_v59 = vsel %vm8499_vm6, %v1118_v34, %v1138_v18  ;;  %v1324_v41 = vsel %vm8500_vm2, %v1283_v4, %v1303_v31  ;;  %v763_v53 = vmax.f32 %v723_v33, %v5849_v14  ;;  %v764_v51 = vmax.f32 %v724_v9, %v5853_v56 }
  0xc9   : > { %v1092_v54 = vmax.f32 %v927_v11, %v1052_v13  ;;  %vm479_vm5 = vcmp.lt.s32.totalorder %v431_v63, 16  ;;  %v645_v36 = vmax.f32 %v5670_v8, %v5741_v19  ;;  %v1256_v26 = vmax.f32 %v1091_v61, %v1216_v30 }
  0xca   : > { %v789_v20 = vrot.slane %v763_v53, 1  ;;  %v954_v46 = vrot.slane %v763_v53, 2  ;;  %v1119_v47 = vrot.slane %v763_v53, 7  ;;  %vm8501_vm3 = vcmp.ge.s32.totalorder %v431_v63, 0 }
  0xcb   : > { %vm5888_vm9 = vmand %vm8501_vm3, %vm479_vm5  ;;  %v8502_v0 = vmov 0  ;;  %v1257_v60 = vmax.f32 %v1092_v54, %v1159_v59  ;;  %v809_v44 = vrot.slane %v764_v51, 1  ;;  %v974_v33 = vrot.slane %v764_v51, 2 }
  0xcc   : > { %v8503_v0 = vsel %vm5888_vm9, 4294967295, %v8502_v0  ;;  %v1139_v16 = vrot.slane %v764_v51, 7  ;;  %v1421_v9 = vmax.f32 %v1256_v26, %v1381_v6  ;;  %v1284_v17 = vrot.slane %v763_v53, 6 }
  0xcd   : > { %v1304_v34 = vrot.slane %v764_v51, 6  ;;  %v5894_v8 = vsel %vm5888_vm9, %v401_v55, -1e+30  ;;  %v1422_v18 = vmax.f32 %v1257_v60, %v1324_v41  ;;  %vm8504_vm0 = vcmp.lt.s32.totalorder %v4975_v3, 7 }
  0xce   : > { %v830_v63 = vsel %vm8504_vm0, %v789_v20, %v809_v44  ;;  %vm8505_vm8 = vcmp.lt.s32.totalorder %v4975_v3, 6  ;;  %v1180_v31 = vsel %vm8499_vm6, %v1139_v16, %v1119_v47  ;;  %vm8506_vm2 = vcmask 31744   ;;  %vm8509_vm7 = vmmov %vm8504_vm0 }
  0xcf   : > { %v995_v4 = vsel %vm8505_vm8, %v954_v46, %v974_v33  ;;  %4673 = vmatprep.mubr.msk.f32.mxu0 %vm8506_vm2, %v1421_v9  ;;  %v928_v40 = vmax.f32 %v763_v53, %v830_v63  ;;  %vm8507_vm5 = vcmp.ge.s32.totalorder %v4975_v3, 1  ;;  %vm8508_vm3 = vcmp.lt.s32.totalorder %v4975_v3, 2  ;;  %vm8510_vm0 = vmmov %vm8506_vm2 }
  0xd0   : > { %v1218_v21 = vsel %vm8507_vm5, %v1180_v31, -1e+30  ;;  %v1345_v37 = vsel %vm8508_vm3, %v1304_v34, %v1284_v17  ;;  %v850_v49 = vsel %vm8509_vm7, %v809_v44, %v789_v20  ;;  %4674 = vmatmul.mubr.msk.f32.gmra.mxu0 %vm8510_vm0, %v1422_v18  ;;  %vm8511_vm8 = vcmp.ge.s32.totalorder %v4975_v3, 2  ;;  %v404_v20 = vld [vmem:[%s5697_s29 + $0x48] sm:$0xff] }
  0xd1   : > { %v1383_v15 = vsel %vm8511_vm8, %v1345_v37, -1e+30  ;;  %vm8512_vm6 = vcmp.lt.s32.totalorder %v4997_v12, 15  ;;  %vm8513_vm2 = vcmp.lt.s32.totalorder %v4975_v3, 6  ;;  %vm8514_vm5 = vcmp.lt.s32.totalorder %v4975_v3, 1 }
  0xd2   : > { %v889_v28 = vsel %vm8512_vm6, %v850_v49, -1e+30  ;;  %v1015_v5 = vsel %vm8513_vm2, %v974_v33, %v954_v46  ;;  %v1160_v30 = vsel %vm8514_vm5, %v1119_v47, %v1139_v16  ;;  %v1093_v6 = vmax.f32 %v928_v40, %v995_v4 }
  0xd3   : > { %v929_v11 = vmax.f32 %v764_v51, %v889_v28  ;;  %vm8515_vm7 = vcmp.lt.s32.totalorder %v4997_v12, 14  ;;  %v1325_v61 = vsel %vm8508_vm3, %v1284_v17, %v1304_v34  ;;  %v5925_v59 = vsel %vm5888_vm9, %v402_v22, -1e+30  ;;  %v403_v51 = vld [vmem:[%s5697_s29 + $0x40] sm:$0xff] }
  0xd4   : > { %v1054_v13 = vsel %vm8515_vm7, %v1015_v5, -1e+30  ;;  %v646_v41 = vmax.f32 %v5708_v23, %v5745_v42  ;;  %v685_v53 = vmax.f32 %v645_v36, %v5820_v29  ;;  %v432_v54 = vadd.s32 20, %v4973_v2 }
  0xd5   : > { %v1258_v55 = vmax.f32 %v1093_v6, %v1218_v21  ;;  %v1094_v26 = vmax.f32 %v929_v11, %v1054_v13  ;;  %v647_v46 = vmax.f32 %v5741_v19, %v5820_v29  ;;  %v648_v47 = vmax.f32 %v5745_v42, %v5824_v1 }
  0xd6   : > { %v686_v60 = vmax.f32 %v646_v41, %v5824_v1  ;;  %v725_v44 = vmax.f32 %v685_v53, %v5849_v14  ;;  %vm456_vm0 = vcmp.ge.s32.totalorder %v432_v54, 0  ;;  %vm480_vm8 = vcmp.lt.s32.totalorder %v432_v54, 16 }
  0xd7   : > { %v1423_v23 = vmax.f32 %v1258_v55, %v1383_v15  ;;  %v1259_v36 = vmax.f32 %v1094_v26, %v1160_v30  ;;  %vm5939_vm6 = vmand %vm456_vm0, %vm480_vm8  ;;  %v8516_v33 = vmov 0  ;;  %v687_v16 = vmax.f32 %v647_v46, %v5849_v14 }
  0xd8   : > { %v8517_v33 = vsel %vm5939_vm6, 4294967295, %v8516_v33  ;;  %v688_v9 = vmax.f32 %v648_v47, %v5853_v56  ;;  %v726_v19 = vmax.f32 %v686_v60, %v5853_v56  ;;  %v765_v42 = vmax.f32 %v725_v44, %v5894_v8  ;;  %v4436_v44 = vld [vmem:[%s8282_s3 + $0x4] sm:$0xf] }
  0xd9   : > { %v5949_v17 = vsel %vm5939_vm6, %v403_v51, -1e+30  ;;  %v5953_v34 = vsel %vm5939_vm6, %v404_v20, -1e+30  ;;  %vm8518_vm2 = vcmask 31744   ;;  %v1424_v18 = vmax.f32 %v1259_v36, %v1325_v61 }
  0xda   : > { %4676 = vmatprep.mubr.msk.f32.mxu0 %vm8518_vm2, %v1423_v23  ;;  %v727_v63 = vmax.f32 %v687_v16, %v5894_v8  ;;  %v728_v4 = vmax.f32 %v688_v9, %v5925_v59  ;;  %v5959_v31 = vadd.s32 21, %v4973_v2  ;;  %v766_v40 = vmax.f32 %v726_v19, %v5925_v59  ;;  %vm8519_vm5 = vmmov %vm8518_vm2 }
  0xdb   : > { %v790_v21 = vrot.slane %v765_v42, 1  ;;  %v955_v37 = vrot.slane %v765_v42, 2  ;;  %v1120_v49 = vrot.slane %v765_v42, 7  ;;  %4677 = vmatmul.mubr.msk.f32.gmra.mxu0 %vm8519_vm5, %v1424_v18  ;;  %v1285_v22 = vrot.slane %v765_v42, 6 }
  0xdc   : > { %v767_v15 = vmax.f32 %v727_v63, %v5949_v17  ;;  %v768_v28 = vmax.f32 %v728_v4, %v5953_v34  ;;  %v810_v5 = vrot.slane %v766_v40, 1  ;;  %v975_v30 = vrot.slane %v766_v40, 2 }
  0xdd   : > { %v1140_v6 = vrot.slane %v766_v40, 7  ;;  %v1305_v11 = vrot.slane %v766_v40, 6  ;;  %vm8520_vm7 = vcmp.lt.s32.totalorder %v4975_v3, 7  ;;  %vm8521_vm3 = vcmp.lt.s32.totalorder %v4975_v3, 6 }
  0xde   : > { %v791_v13 = vrot.slane %v767_v15, 1  ;;  %v811_v61 = vrot.slane %v768_v28, 1  ;;  %v956_v41 = vrot.slane %v767_v15, 2  ;;  %v976_v53 = vrot.slane %v768_v28, 2 }
  0xdf   : > { %v831_v54 = vsel %vm8520_vm7, %v790_v21, %v810_v5  ;;  %v996_v55 = vsel %vm8521_vm3, %v955_v37, %v975_v30  ;;  %vm8522_vm0 = vcmp.lt.s32.totalorder %v4975_v3, 1  ;;  %vm8523_vm8 = vcmp.lt.s32.totalorder %v4975_v3, 2 }
  0xe0   : > { %v1181_v26 = vsel %vm8522_vm0, %v1140_v6, %v1120_v49  ;;  %v1346_v51 = vsel %vm8523_vm8, %v1305_v11, %v1285_v22  ;;  %v930_v20 = vmax.f32 %v765_v42, %v831_v54  ;;  %vm8524_vm5 = vcmp.ge.s32.totalorder %v4975_v3, 1 }
  0xe1   : > { %v1220_v46 = vsel %vm8524_vm5, %v1181_v26, -1e+30  ;;  %vm8525_vm6 = vcmp.ge.s32.totalorder %v4975_v3, 2  ;;  %v851_v60 = vsel %vm8520_vm7, %v810_v5, %v790_v21  ;;  %vm8526_vm3 = vcmp.lt.s32.totalorder %v4997_v12, 15 }
  0xe2   : > { %v1385_v47 = vsel %vm8525_vm6, %v1346_v51, -1e+30  ;;  %v891_v23 = vsel %vm8526_vm3, %v851_v60, -1e+30  ;;  %vm8527_vm0 = vcmp.lt.s32.totalorder %v4975_v3, 6  ;;  %vm8528_vm8 = vcmp.lt.s32.totalorder %v4975_v3, 1 }
  0xe3   : > { %v1016_v36 = vsel %vm8527_vm0, %v975_v30, %v955_v37  ;;  %v1161_v16 = vsel %vm8528_vm8, %v1120_v49, %v1140_v6  ;;  %vm8529_vm5 = vcmp.lt.s32.totalorder %v4975_v3, 2  ;;  %vm8530_vm6 = vcmask 1043456  }
  0xe4   : > { %v1326_v9 = vsel %vm8529_vm5, %v1285_v22, %v1305_v11  ;;  %4694 = vmatprep.subr.msk.mxu1 %vm8530_vm6, %v4436_v44  ;;  %v1095_v19 = vmax.f32 %v930_v20, %v996_v55  ;;  %v931_v42 = vmax.f32 %v766_v40, %v891_v23  ;;  %vm8531_vm7 = vcmp.lt.s32.totalorder %v4997_v12, 14  ;;  %vm8533_vm3 = vmmov %vm8530_vm6  ;;  %v405_v23 = vld [vmem:[%s5697_s29 + $0x50] sm:$0xff] }
  0xe5   : > { %v1056_v18 = vsel %vm8531_vm7, %v1016_v36, -1e+30  ;;  %vm8532_vm2 = vcmp.lt.s32.totalorder %v4975_v3, 7  ;;  %4695 = vmatpush3.msk.msra.mxu1 %vm8533_vm3, %v4436_v44  ;;  %v997_v21 = vsel %vm8527_vm0, %v956_v41, %v976_v53  ;;  %v1121_v37 = vrot.slane %v767_v15, 7  ;;  %v406_v36 = vld [vmem:[%s5697_s29 + $0x58] sm:$0xff] }
  0xe6   : > { %v832_v63 = vsel %vm8532_vm2, %v791_v13, %v811_v61  ;;  %v1141_v49 = vrot.slane %v768_v28, 7  ;;  %v1260_v5 = vmax.f32 %v1095_v19, %v1220_v46  ;;  %v1096_v22 = vmax.f32 %v931_v42, %v1056_v18  ;;  %vm8534_vm5 = vmmov %vm8532_vm2 }
  0xe7   : > { %v932_v4 = vmax.f32 %v767_v15, %v832_v63  ;;  %v1286_v30 = vrot.slane %v767_v15, 6  ;;  %v1306_v6 = vrot.slane %v768_v28, 6  ;;  %v852_v54 = vsel %vm8534_vm5, %v811_v61, %v791_v13  ;;  %vm8535_vm2 = vmmov %vm8527_vm0 }
  0xe8   : > { %v1182_v40 = vsel %vm8528_vm8, %v1141_v49, %v1121_v37  ;;  %v1017_v55 = vsel %vm8535_vm2, %v976_v53, %v956_v41  ;;  %v1425_v26 = vmax.f32 %v1260_v5, %v1385_v47  ;;  %v1261_v51 = vmax.f32 %v1096_v22, %v1161_v16  ;;  %v408_v22 = vld [vmem:[%s5697_s29 + $0x68] sm:$0xff] }
  0xe9   : > { %v1097_v11 = vmax.f32 %v932_v4, %v997_v21  ;;  %vm8536_vm6 = vcmp.ge.s32.totalorder %v4975_v3, 1  ;;  %vm8537_vm7 = vcmp.lt.s32.totalorder %v4975_v3, 2  ;;  %vm8538_vm3 = vcmp.ge.s32.totalorder %v4975_v3, 2 }
  0xea   : > { %v1222_v20 = vsel %vm8536_vm6, %v1182_v40, -1e+30  ;;  %v1347_v15 = vsel %vm8537_vm7, %v1306_v6, %v1286_v30  ;;  %vm8539_vm0 = vcmp.lt.s32.totalorder %v4997_v12, 15  ;;  %vm8540_vm8 = vcmp.lt.s32.totalorder %v4997_v12, 14  ;;  %vm8543_vm6 = vmmov %vm8537_vm7 }
  0xeb   : > { %v1262_v46 = vmax.f32 %v1097_v11, %v1222_v20  ;;  %v1387_v60 = vsel %vm8538_vm3, %v1347_v15, -1e+30  ;;  %v893_v44 = vsel %vm8539_vm0, %v852_v54, -1e+30  ;;  %v1058_v13 = vsel %vm8540_vm8, %v1017_v55, -1e+30 }
  0xec   : > { %vm8541_vm5 = vcmask 31744   ;;  %v1426_v61 = vmax.f32 %v1261_v51, %v1326_v9  ;;  %v933_v41 = vmax.f32 %v768_v28, %v893_v44  ;;  %vm8542_vm2 = vcmp.lt.s32.totalorder %v4975_v3, 1 }
  0xed   : > { %4679 = vmatprep.mubr.msk.f32.mxu0 %vm8541_vm5, %v1425_v26  ;;  %v1162_v53 = vsel %vm8542_vm2, %v1121_v37, %v1141_v49  ;;  %v1327_v47 = vsel %vm8543_vm6, %v1286_v30, %v1306_v6  ;;  %v1427_v16 = vmax.f32 %v1262_v46, %v1387_v60  ;;  %vm481_vm7 = vcmp.lt.s32.totalorder %v5959_v31, 16  ;;  %vm8544_vm3 = vmmov %vm8541_vm5  ;;  %v407_v37 = vld [vmem:[%s5697_s29 + $0x60] sm:$0xff] }
  0xee   : > { %v649_v19 = vmax.f32 %v5820_v29, %v5849_v14  ;;  %v650_v42 = vmax.f32 %v5824_v1, %v5853_v56  ;;  %4680 = vmatmul.mubr.msk.f32.gmra.mxu0 %vm8544_vm3, %v1426_v61  ;;  %v1098_v28 = vmax.f32 %v933_v41, %v1058_v13  ;;  %vm8545_vm0 = vcmp.ge.s32.totalorder %v5959_v31, 0  ;;  %vm8548_vm5 = vmmov %vm8544_vm3 }
  0xef   : > { %vm6030_vm8 = vmand %vm8545_vm0, %vm481_vm7  ;;  %v8546_v9 = vmov 0  ;;  %v434_v18 = vadd.s32 22, %v4973_v2  ;;  %v651_v63 = vmax.f32 %v5849_v14, %v5894_v8  ;;  %v652_v29 = vmax.f32 %v5853_v56, %v5925_v59  ;;  %4682 = vmatprep.mubr.msk.f32.mxu0 %vm8548_vm5, %v1427_v16 }
  0xf0   : > { %v8547_v9 = vsel %vm6030_vm8, 4294967295, %v8546_v9  ;;  %v6042_v1 = vsel %vm6030_vm8, %v405_v23, -1e+30  ;;  %v6046_v31 = vsel %vm6030_vm8, %v406_v36, -1e+30  ;;  %v689_v4 = vmax.f32 %v649_v19, %v5894_v8 }
  0xf1   : > { %v690_v21 = vmax.f32 %v650_v42, %v5925_v59  ;;  %v1263_v49 = vmax.f32 %v1098_v28, %v1162_v53  ;;  %vm458_vm2 = vcmp.ge.s32.totalorder %v434_v18, 0  ;;  %vm482_vm6 = vcmp.lt.s32.totalorder %v434_v18, 16 }
  0xf2   : > { %v691_v14 = vmax.f32 %v651_v63, %v5949_v17  ;;  %v729_v56 = vmax.f32 %v689_v4, %v5949_v17  ;;  %vm506_vm7 = vmand %vm458_vm2, %vm482_vm6  ;;  %v692_v30 = vmax.f32 %v652_v29, %v5953_v34  ;;  %v435_v6 = vadd.s32 23, %v4973_v2 }
  0xf3   : > { %v730_v5 = vmax.f32 %v690_v21, %v5953_v34  ;;  %v1428_v11 = vmax.f32 %v1263_v49, %v1327_v47  ;;  %v6057_v40 = vsel %vm506_vm7, %v407_v37, -1e+30  ;;  %v6063_v51 = vsel %vm506_vm7, %v408_v22, -1e+30 }
  0xf4   : > { %v731_v54 = vmax.f32 %v691_v14, %v6042_v1  ;;  %v769_v55 = vmax.f32 %v729_v56, %v6042_v1  ;;  %v732_v20 = vmax.f32 %v692_v30, %v6046_v31  ;;  %v653_v2 = vmax.f32 %v5894_v8, %v5949_v17 }
  0xf5   : > { %v770_v26 = vmax.f32 %v730_v5, %v6046_v31  ;;  %4683 = vmatmul.mubr.msk.f32.gmra.mxu0 %vm8544_vm3, %v1428_v11  ;;  %vm8549_vm2 = vcmp.lt.s32.totalorder %v4975_v3, 7  ;;  %vm8550_vm6 = vcmp.lt.s32.totalorder %v4975_v3, 6  ;;  %vm8553_vm0 = vcmp.lt.s32.totalorder %v4975_v3, 1 }
  0xf6   : > { %v6067_v15 = vmax.f32 %v731_v54, %v6057_v40  ;;  %v792_v46 = vrot.slane %v769_v55, 1  ;;  %v957_v44 = vrot.slane %v769_v55, 2  ;;  %v1122_v61 = vrot.slane %v769_v55, 7  ;;  %vm8551_vm7 = vmmov %vm8549_vm2 }
  0xf7   : > { %v812_v60 = vrot.slane %v770_v26, 1  ;;  %v977_v13 = vrot.slane %v770_v26, 2  ;;  %v1142_v41 = vrot.slane %v770_v26, 7  ;;  %v1287_v53 = vrot.slane %v769_v55, 6  ;;  %vm8552_vm3 = vmmov %vm8550_vm6 }
  0xf8   : > { %v1307_v47 = vrot.slane %v770_v26, 6  ;;  %vm8554_vm5 = vcmp.lt.s32.totalorder %v4975_v3, 2  ;;  %vm8555_vm8 = vcmp.lt.s32.totalorder %v4997_v12, 15  ;;  %v772_v14 = vmax.f32 %v732_v20, %v6063_v51 }
  0xf9   : > { %v833_v23 = vsel %vm8549_vm2, %v792_v46, %v812_v60  ;;  %v998_v36 = vsel %vm8550_vm6, %v957_v44, %v977_v13  ;;  %v853_v16 = vsel %vm8551_vm7, %v812_v60, %v792_v46  ;;  %v1018_v8 = vsel %vm8552_vm3, %v977_v13, %v957_v44  ;;  %vm8559_vm3 = vmmov %vm8553_vm0 }
  0xfa   : > { %v934_v17 = vmax.f32 %v769_v55, %v833_v23  ;;  %v1183_v19 = vsel %vm8553_vm0, %v1142_v41, %v1122_v61  ;;  %v1348_v42 = vsel %vm8554_vm5, %v1307_v47, %v1287_v53  ;;  %v895_v28 = vsel %vm8555_vm8, %v853_v16, -1e+30  ;;  %vm8560_vm0 = vmmov %vm8554_vm5 }
  0xfb   : > { %vm8556_vm2 = vcmp.ge.s32.totalorder %v4975_v3, 1  ;;  %vm8557_vm6 = vcmp.ge.s32.totalorder %v4975_v3, 2  ;;  %v935_v29 = vmax.f32 %v770_v26, %v895_v28  ;;  %vm8558_vm7 = vcmp.lt.s32.totalorder %v4997_v12, 14 }
  0xfc   : > { %v1224_v18 = vsel %vm8556_vm2, %v1183_v19, -1e+30  ;;  %v1389_v63 = vsel %vm8557_vm6, %v1348_v42, -1e+30  ;;  %v1060_v4 = vsel %vm8558_vm7, %v1018_v8, -1e+30  ;;  %v1099_v21 = vmax.f32 %v934_v17, %v998_v36  ;;  %vm8563_vm2 = vmmov %vm8559_vm3 }
  0xfd   : > { %v1163_v37 = vsel %vm8559_vm3, %v1122_v61, %v1142_v41  ;;  %v1328_v49 = vsel %vm8560_vm0, %v1287_v53, %v1307_v47  ;;  %v1100_v56 = vmax.f32 %v935_v29, %v1060_v4  ;;  %v793_v5 = vrot.slane %v6067_v15, 1  ;;  %vm8564_vm6 = vmmov %vm8560_vm0  ;;  %v409_v8 = vld [vmem:[%s5697_s29 + $0x70] sm:$0xff]  ;;  %v410_v17 = vld [vmem:[%s5697_s29 + $0x78] sm:$0xff] }
  0xfe   : > { %v958_v22 = vrot.slane %v6067_v15, 2  ;;  %v1123_v30 = vrot.slane %v6067_v15, 7  ;;  %v1264_v11 = vmax.f32 %v1099_v21, %v1224_v18  ;;  %v813_v54 = vrot.slane %v772_v14, 1 }
  0xff   : > { %v978_v55 = vrot.slane %v772_v14, 2  ;;  %v1143_v26 = vrot.slane %v772_v14, 7  ;;  %v1265_v46 = vmax.f32 %v1100_v56, %v1163_v37  ;;  %v1288_v60 = vrot.slane %v6067_v15, 6 }
 0x100   : > { %v1308_v44 = vrot.slane %v772_v14, 6  ;;  %v654_v20 = vmax.f32 %v5925_v59, %v5953_v34  ;;  %v1429_v13 = vmax.f32 %v1264_v11, %v1389_v63  ;;  %vm8561_vm8 = vcmp.lt.s32.totalorder %v4975_v3, 7 }
 0x101   : > { %v834_v61 = vsel %vm8561_vm8, %v793_v5, %v813_v54  ;;  %vm8562_vm5 = vcmp.lt.s32.totalorder %v4975_v3, 6  ;;  %v1184_v53 = vsel %vm8563_vm2, %v1143_v26, %v1123_v30  ;;  %v1430_v47 = vmax.f32 %v1265_v46, %v1328_v49  ;;  %vm8567_vm0 = vmmov %vm8561_vm8 }
 0x102   : > { %v999_v41 = vsel %vm8562_vm5, %v958_v22, %v978_v55  ;;  %v936_v23 = vmax.f32 %v6067_v15, %v834_v61  ;;  %v1349_v36 = vsel %vm8564_vm6, %v1308_v44, %v1288_v60  ;;  %vm8565_vm7 = vcmask 31744   ;;  %vm8568_vm8 = vmmov %vm8562_vm5 }
 0x103   : > { %4685 = vmatprep.mubr.msk.f32.mxu0 %vm8565_vm7, %v1429_v13  ;;  %vm8566_vm3 = vcmp.ge.s32.totalorder %v4975_v3, 1  ;;  %v854_v34 = vsel %vm8567_vm0, %v813_v54, %v793_v5  ;;  %v1019_v16 = vsel %vm8568_vm8, %v978_v55, %v958_v22  ;;  %vm8569_vm5 = vcmp.lt.s32.totalorder %v435_v6, 16  ;;  %vm8573_vm6 = vmmov %vm8565_vm7 }
 0x104   : > { %v1226_v59 = vsel %vm8566_vm3, %v1184_v53, -1e+30  ;;  %vm8570_vm2 = vcmp.ge.s32.totalorder %v435_v6, 0  ;;  %4686 = vmatmul.mubr.msk.f32.gmra.mxu0 %vm8573_vm6, %v1430_v47  ;;  %v1101_v19 = vmax.f32 %v936_v23, %v999_v41  ;;  %vm8574_vm7 = vcmp.lt.s32.totalorder %v4997_v12, 15 }
 0x105   : > { %vm6122_vm9 = vmand %vm8570_vm2, %vm8569_vm5  ;;  %v897_v42 = vsel %vm8574_vm7, %v854_v34, -1e+30  ;;  %vm8575_vm3 = vcmp.lt.s32.totalorder %v4997_v12, 14  ;;  %vm8576_vm0 = vcmp.ge.s32.totalorder %v4975_v3, 2  ;;  %v693_v29 = vmax.f32 %v653_v2, %v6042_v1 }
 0x106   : > { %v1062_v28 = vsel %vm8575_vm3, %v1019_v16, -1e+30  ;;  %v1391_v18 = vsel %vm8576_vm0, %v1349_v36, -1e+30  ;;  %v937_v63 = vmax.f32 %v772_v14, %v897_v42  ;;  %v694_v6 = vmax.f32 %v654_v20, %v6046_v31  ;;  %vm8579_vm2 = vmmov %vm8573_vm6 }
 0x107   : > { %v1266_v4 = vmax.f32 %v1101_v19, %v1226_v59  ;;  %vm8577_vm8 = vcmp.lt.s32.totalorder %v4975_v3, 1  ;;  %v613_v37 = vsel %vm6122_vm9, %v409_v8, -1e+30  ;;  %v614_v49 = vsel %vm6122_vm9, %v410_v17, -1e+30  ;;  %vm8580_vm9 = vmmov %vm8579_vm2 }
 0x108   : > { %v1164_v21 = vsel %vm8577_vm8, %v1123_v30, %v1143_v26  ;;  %v1102_v56 = vmax.f32 %v937_v63, %v1062_v28  ;;  %v733_v5 = vmax.f32 %v693_v29, %v6057_v40  ;;  %v734_v22 = vmax.f32 %v694_v6, %v6063_v51  ;;  %vm8584_vm0 = vmmov %vm8577_vm8  ;;  %v4636_v6 = vpop.f32.mrf.mxu0 }
 0x109   : > { %v1431_v14 = vmax.f32 %v1266_v4, %v1391_v18  ;;  %vm8578_vm5 = vcmp.lt.s32.totalorder %v4975_v3, 2  ;;  %vm8581_vm6 = vcmp.lt.s32.totalorder %v4975_v3, 7  ;;  %vm8583_vm3 = vcmp.lt.s32.totalorder %v4975_v3, 6 }
 0x10a   : > { %v1329_v1 = vsel %vm8578_vm5, %v1288_v60, %v1308_v44  ;;  %v1267_v31 = vmax.f32 %v1102_v56, %v1164_v21  ;;  %v773_v2 = vmax.f32 %v733_v5, %v613_v37  ;;  %v774_v11 = vmax.f32 %v734_v22, %v614_v49  ;;  %vm8582_vm7 = vmmov %vm8581_vm6  ;;  %v1627_v4 = vpop.f32.mrf.mxu0 }
 0x10b   : > { %4688 = vmatprep.mubr.msk.f32.mxu0 %vm8579_vm2, %v1431_v14  ;;  %vm8585_vm8 = vcmp.lt.s32.totalorder %v4997_v12, 15  ;;  %vm8586_vm5 = vcmp.ge.s32.totalorder %v4975_v3, 1  ;;  %vm8587_vm2 = vcmp.lt.s32.totalorder %v4975_v3, 2  ;;  %v1843_v14 = vsel %vm5017_vm14, %v4636_v6, -1e+30 }
 0x10c   : > { %v1432_v30 = vmax.f32 %v1267_v31, %v1329_v1  ;;  %v794_v54 = vrot.slane %v773_v2, 1  ;;  %v814_v55 = vrot.slane %v774_v11, 1  ;;  %v959_v26 = vrot.slane %v773_v2, 2  ;;  %v4639_v21 = vpop.f32.mrf.mxu0 }
 0x10d   : > { %v979_v46 = vrot.slane %v774_v11, 2  ;;  %v1124_v20 = vrot.slane %v773_v2, 7  ;;  %v1144_v13 = vrot.slane %v774_v11, 7  ;;  %v1289_v61 = vrot.slane %v773_v2, 6 }
 0x10e   : > { %4689 = vmatmul.mubr.msk.f32.gmra.mxu0 %vm8580_vm9, %v1432_v30  ;;  %v835_v40 = vsel %vm8581_vm6, %v794_v54, %v814_v55  ;;  %v1309_v51 = vrot.slane %v774_v11, 6  ;;  %v855_v60 = vsel %vm8582_vm7, %v814_v55, %v794_v54  ;;  %vm8588_vm9 = vmmov %vm8583_vm3  ;;  %vm8589_vm6 = vcmp.lt.s32.totalorder %v4997_v12, 14  ;;  %v1637_v37 = vpop.f32.mrf.mxu0 }
 0x10f   : > { %v938_v44 = vmax.f32 %v773_v2, %v835_v40  ;;  %v1000_v41 = vsel %vm8583_vm3, %v959_v26, %v979_v46  ;;  %v1185_v53 = vsel %vm8584_vm0, %v1144_v13, %v1124_v20  ;;  %v899_v47 = vsel %vm8585_vm8, %v855_v60, -1e+30  ;;  %vm8590_vm7 = vmmov %vm8584_vm0 }
 0x110   : > { %v1228_v23 = vsel %vm8586_vm5, %v1185_v53, -1e+30  ;;  %v1350_v36 = vsel %vm8587_vm2, %v1309_v51, %v1289_v61  ;;  %v939_v59 = vmax.f32 %v774_v11, %v899_v47  ;;  %v1020_v34 = vsel %vm8588_vm9, %v979_v46, %v959_v26  ;;  %vm8592_vm0 = vmmov %vm8587_vm2  ;;  %v4642_v49 = vpop.f32.mrf.mxu0 }
 0x111   : > { %v1103_v16 = vmax.f32 %v938_v44, %v1000_v41  ;;  %v1064_v8 = vsel %vm8589_vm6, %v1020_v34, -1e+30  ;;  %v1165_v17 = vsel %vm8590_vm7, %v1124_v20, %v1144_v13  ;;  %vm8591_vm3 = vcmp.ge.s32.totalorder %v4975_v3, 2  ;;  %vm8597_vm2 = vmmov %vm8588_vm9 }
 0x112   : > { %v1393_v15 = vsel %vm8591_vm3, %v1350_v36, -1e+30  ;;  %v1104_v19 = vmax.f32 %v939_v59, %v1064_v8  ;;  %v1330_v42 = vsel %vm8592_vm0, %v1289_v61, %v1309_v51  ;;  %vm8593_vm8 = vcmask 31744   ;;  %v1647_v56 = vpop.f32.mrf.mxu0  ;;  %vm8598_vm9 = vmmov %vm8590_vm7 }
 0x113   : > { %v1268_v28 = vmax.f32 %v1103_v16, %v1228_v23  ;;  %vm8594_vm5 = vmmov %vm8593_vm8  ;;  %v1845_v22 = vsel %vm5022_vm1, %v4639_v21, -1e+30  ;;  %v1844_v1 = vsel %vm5022_vm1, %v1637_v37, -1e+30  ;;  %v1847_v31 = vsel %vm5034_vm4, %v4642_v49, -1e+30 }
 0x114   : > { %v1269_v18 = vmax.f32 %v1104_v19, %v1165_v17  ;;  %v4645_v5 = vpop.f32.mrf.mxu0  ;;  %v1883_v2 = vmax.f32 %v1843_v14, %v1845_v22  ;;  %v1842_v30 = vsel %vm5017_vm14, %v1627_v4, -1e+30  ;;  %v1846_v54 = vsel %vm5034_vm4, %v1647_v56, -1e+30  ;;  %vm8600_vm7 = vmmov %vm8597_vm2 }
 0x115   : > { %v1433_v63 = vmax.f32 %v1268_v28, %v1393_v15  ;;  %v6187_v55 = vsel %vm5066_vm11, %v4645_v5, -1e+30  ;;  %v1882_v26 = vmax.f32 %v1842_v30, %v1844_v1  ;;  %v1885_v59 = vmax.f32 %v1845_v22, %v1847_v31  ;;  %vm8601_vm3 = vmmov %vm8592_vm0 }
 0x116   : > { %v1434_v29 = vmax.f32 %v1269_v18, %v1330_v42  ;;  %v1657_v11 = vpop.f32.mrf.mxu0  ;;  %v1915_v46 = vmax.f32 %v1883_v2, %v1847_v31  ;;  %v1884_v34 = vmax.f32 %v1844_v1, %v1846_v54  ;;  %vm8595_vm14 = vcmp.lt.s32.totalorder %v4975_v3, 7 }
 0x117   : > { %4691 = vmatprep.mubr.msk.f32.mxu0 %vm8593_vm8, %v1433_v63  ;;  %v6191_v27 = vsel %vm5066_vm11, %v1657_v11, -1e+30  ;;  %v1914_v20 = vmax.f32 %v1882_v26, %v1846_v54  ;;  %v1917_v19 = vmax.f32 %v1885_v59, %v6187_v55  ;;  %vm8596_vm1 = vmmov %vm8595_vm14  ;;  %vm8599_vm6 = vcmp.lt.s32.totalorder %v4997_v12, 15 }
 0x118   : > { %4692 = vmatmul.mubr.msk.f32.gmra.mxu0 %vm8594_vm5, %v1434_v29  ;;  %v1947_v13 = vmax.f32 %v1915_v46, %v6187_v55  ;;  %v1916_v21 = vmax.f32 %v1884_v34, %v6191_v27  ;;  %vm8602_vm0 = vcmp.ge.s32.totalorder %v4975_v3, 1  ;;  %vm8603_vm8 = vcmp.lt.s32.totalorder %v4997_v12, 14 }
 0x119   : > { %v1946_v40 = vmax.f32 %v1914_v20, %v6191_v27  ;;  %v1887_v46 = vmax.f32 %v1847_v31, %v6187_v55  ;;  %vm8604_vm5 = vcmp.ge.s32.totalorder %v4975_v3, 2 }
 0x11a   : > { %v4648_v61 = vpop.f32.mrf.mxu0 }
 0x11b   : > { %v6196_v24 = vsel %vm5092_vm15, %v4648_v61, -1e+30 }
 0x11c   : > { %v1979_v51 = vmax.f32 %v1947_v13, %v6196_v24  ;;  %v1667_v60 = vpop.f32.mrf.mxu0  ;;  %v1949_v37 = vmax.f32 %v1917_v19, %v6196_v24 }
 0x11d   : > { %v6202_v44 = vsel %vm5092_vm15, %v1667_v60, -1e+30 }
 0x11e   : > { %v1978_v41 = vmax.f32 %v1946_v40, %v6202_v44  ;;  %v2026_v47 = vrot.slane %v1979_v51, 1  ;;  %v2154_v8 = vrot.slane %v1979_v51, 2  ;;  %v2282_v17 = vrot.slane %v1979_v51, 7 }
 0x11f   : > { %v2410_v28 = vrot.slane %v1979_v51, 6  ;;  %v1948_v1 = vmax.f32 %v1916_v21, %v6202_v44 }
 0x120   : > { %v2010_v53 = vrot.slane %v1978_v41, 1  ;;  %v2138_v23 = vrot.slane %v1978_v41, 2  ;;  %v2266_v36 = vrot.slane %v1978_v41, 7  ;;  %v2394_v15 = vrot.slane %v1978_v41, 6 }
 0x122   : > { %v2042_v16 = vsel %vm8595_vm14, %v2010_v53, %v2026_v47  ;;  %v2058_v18 = vsel %vm8596_vm1, %v2026_v47, %v2010_v53  ;;  %v2170_v63 = vsel %vm8597_vm2, %v2138_v23, %v2154_v8  ;;  %v2314_v29 = vsel %vm8598_vm9, %v2282_v17, %v2266_v36  ;;  %vm8605_vm14 = vmmov %vm8598_vm9 }
 0x123   : > { %v2106_v42 = vmax.f32 %v1978_v41, %v2042_v16  ;;  %v2075_v6 = vsel %vm8599_vm6, %v2058_v18, -1e+30  ;;  %v2186_v4 = vsel %vm8600_vm7, %v2154_v8, %v2138_v23  ;;  %v2442_v14 = vsel %vm8601_vm3, %v2410_v28, %v2394_v15  ;;  %vm8606_vm1 = vmmov %vm8601_vm3 }
 0x124   : > { %v2107_v5 = vmax.f32 %v1979_v51, %v2075_v6  ;;  %v2330_v30 = vsel %vm8602_vm0, %v2314_v29, -1e+30  ;;  %v2203_v26 = vsel %vm8603_vm8, %v2186_v4, -1e+30  ;;  %v2458_v51 = vsel %vm8604_vm5, %v2442_v14, -1e+30  ;;  %vm8612_vm0 = vmmov %vm8605_vm14 }
 0x125   : > { %v2234_v56 = vmax.f32 %v2106_v42, %v2170_v63  ;;  %v2298_v60 = vsel %vm8605_vm14, %v2266_v36, %v2282_v17  ;;  %v1886_v41 = vmax.f32 %v1846_v54, %v6191_v27  ;;  %v1919_v53 = vmax.f32 %v1887_v46, %v6196_v24  ;;  %vm8614_vm5 = vmmov %vm8606_vm1 }
 0x126   : > { %v2235_v61 = vmax.f32 %v2107_v5, %v2203_v26  ;;  %v2426_v23 = vsel %vm8606_vm1, %v2394_v15, %v2410_v28  ;;  %vm8607_vm2 = vcmask 31744   ;;  %vm8608_vm9 = vcmp.lt.s32.totalorder %v4975_v3, 7 }
 0x127   : > { %v2362_v13 = vmax.f32 %v2234_v56, %v2330_v30  ;;  %v1918_v8 = vmax.f32 %v1886_v41, %v6202_v44  ;;  %vm8609_vm6 = vmmov %vm8608_vm9  ;;  %vm8611_vm3 = vcmp.lt.s32.totalorder %v4997_v12, 15  ;;  %vm8613_vm8 = vcmp.lt.s32.totalorder %v4975_v3, 6 }
 0x128   : > { %v4651_v49 = vpop.f32.mrf.mxu0  ;;  %v2363_v31 = vmax.f32 %v2235_v61, %v2298_v60  ;;  %vm8610_vm7 = vmmov %vm8607_vm2  ;;  %vm8616_vm1 = vcmp.ge.s32.totalorder %v4975_v3, 1 }
 0x129   : > { %v6222_v22 = vsel %vm5204_vm10, %v4651_v49, -1e+30  ;;  %v2490_v47 = vmax.f32 %v2362_v13, %v2458_v51  ;;  %vm8615_vm14 = vmmov %vm8613_vm8 }
 0x12a   : > { %v1981_v2 = vmax.f32 %v1949_v37, %v6222_v22  ;;  %v1677_v11 = vpop.f32.mrf.mxu0  ;;  %v2491_v19 = vmax.f32 %v2363_v31, %v2426_v23  ;;  %v1951_v36 = vmax.f32 %v1919_v53, %v6222_v22 }
 0x12b   : > { %v6235_v20 = vsel %vm5204_vm10, %v1677_v11, -1e+30  ;;  %4696 = vmatprep.mubr.msk.f32.mxu1 %vm8607_vm2, %v2490_v47  ;;  %vm8617_vm2 = vcmp.ge.s32.totalorder %v4975_v3, 2 }
 0x12c   : > { %v1980_v40 = vmax.f32 %v1948_v1, %v6235_v20  ;;  %v2027_v34 = vrot.slane %v1981_v2, 1  ;;  %v2283_v17 = vrot.slane %v1981_v2, 7  ;;  %4697 = vmatmul.mubr.msk.f32.vlgmr.msra.gmra.mxu1 %vm8610_vm7, %v2491_v19  ;;  %v2155_v29 = vrot.slane %v1981_v2, 2  ;;  %vm8620_vm7 = vmmov %vm8614_vm5 }
 0x12d   : > { %v2411_v6 = vrot.slane %v1981_v2, 6  ;;  %v1950_v21 = vmax.f32 %v1918_v8, %v6235_v20 }
 0x12e   : > { %v2011_v59 = vrot.slane %v1980_v40, 1  ;;  %v2267_v16 = vrot.slane %v1980_v40, 7  ;;  %v2139_v42 = vrot.slane %v1980_v40, 2  ;;  %v2395_v18 = vrot.slane %v1980_v40, 6 }
 0x130   : > { %v2043_v54 = vsel %vm8608_vm9, %v2011_v59, %v2027_v34  ;;  %v2059_v63 = vsel %vm8609_vm6, %v2027_v34, %v2011_v59  ;;  %v2315_v49 = vsel %vm8612_vm0, %v2283_v17, %v2267_v16  ;;  %v2171_v14 = vsel %vm8613_vm8, %v2139_v42, %v2155_v29  ;;  %vm8619_vm6 = vmmov %vm8612_vm0 }
 0x131   : > { %v2108_v28 = vmax.f32 %v1980_v40, %v2043_v54  ;;  %v2077_v4 = vsel %vm8611_vm3, %v2059_v63, -1e+30  ;;  %v2443_v1 = vsel %vm8614_vm5, %v2411_v6, %v2395_v18  ;;  %v2187_v46 = vsel %vm8615_vm14, %v2155_v29, %v2139_v42  ;;  %vm8623_vm8 = vmmov %vm8619_vm6 }
 0x132   : > { %v2109_v11 = vmax.f32 %v1981_v2, %v2077_v4  ;;  %v2332_v61 = vsel %vm8616_vm1, %v2315_v49, -1e+30  ;;  %v2460_v51 = vsel %vm8617_vm2, %v2443_v1, -1e+30  ;;  %vm8618_vm9 = vcmp.lt.s32.totalorder %v4997_v12, 14  ;;  %vm8626_vm2 = vmmov %vm8620_vm7 }
 0x133   : > { %v6253_v15 = vpop.f32.mrf.mxu0  ;;  %v2236_v26 = vmax.f32 %v2108_v28, %v2171_v14  ;;  %v2205_v2 = vsel %vm8618_vm9, %v2187_v46, -1e+30  ;;  %v2299_v60 = vsel %vm8619_vm6, %v2267_v16, %v2283_v17  ;;  %v2427_v59 = vsel %vm8620_vm7, %v2395_v18, %v2411_v6  ;;  %vm8627_vm9 = vmmov %vm8615_vm14 }
 0x134   : > { %v6262_v37 = vsel %vm5255_vm13, %v6253_v15, -1e+30  ;;  %v2237_v41 = vmax.f32 %v2109_v11, %v2205_v2  ;;  %vm8621_vm3 = vcmp.lt.s32.totalorder %v4975_v3, 7  ;;  %vm8622_vm0 = vcmask 31744  }
 0x135   : > { %v1983_v56 = vmax.f32 %v1951_v36, %v6262_v37  ;;  %v6267_v5 = vpop.f32.mrf.mxu0  ;;  %v2364_v40 = vmax.f32 %v2236_v26, %v2332_v61  ;;  %vm8624_vm5 = vmmov %vm8621_vm3  ;;  %v1889_v18 = vmax.f32 %v6187_v55, %v6196_v24  ;;  %vm8625_vm1 = vcmp.lt.s32.totalorder %v4997_v12, 15 }
 0x136   : > { %v6276_v30 = vsel %vm5255_vm13, %v6267_v5, -1e+30  ;;  %v2365_v19 = vmax.f32 %v2237_v41, %v2299_v60  ;;  %v1888_v11 = vmax.f32 %v6191_v27, %v6202_v44  ;;  %vm8628_vm6 = vmmov %vm8622_vm0  ;;  %vm8629_vm7 = vcmp.ge.s32.totalorder %v4975_v3, 1 }
 0x137   : > { %v1982_v13 = vmax.f32 %v1950_v21, %v6276_v30  ;;  %v2028_v47 = vrot.slane %v1983_v56, 1  ;;  %v2492_v23 = vmax.f32 %v2364_v40, %v2460_v51  ;;  %v2284_v8 = vrot.slane %v1983_v56, 7 }
 0x138   : > { %v2156_v36 = vrot.slane %v1983_v56, 2  ;;  %v2412_v17 = vrot.slane %v1983_v56, 6  ;;  %v2493_v29 = vmax.f32 %v2365_v19, %v2427_v59  ;;  %v1921_v46 = vmax.f32 %v1889_v18, %v6222_v22 }
 0x139   : > { %v2012_v53 = vrot.slane %v1982_v13, 1  ;;  %v2140_v31 = vrot.slane %v1982_v13, 2  ;;  %v2268_v34 = vrot.slane %v1982_v13, 7  ;;  %v2396_v54 = vrot.slane %v1982_v13, 6  ;;  %4699 = vmatprep.mubr.msk.f32.mxu1 %vm8622_vm0, %v2492_v23 }
 0x13a   : > { %4700 = vmatmul.mubr.msk.f32.gmra.mxu1 %vm8628_vm6, %v2493_v29  ;;  %vm8631_vm0 = vcmp.ge.s32.totalorder %v4975_v3, 2  ;;  %v1953_v2 = vmax.f32 %v1921_v46, %v6262_v37  ;;  %v1891_v19 = vmax.f32 %v6196_v24, %v6222_v22 }
 0x13b   : > { %v2044_v42 = vsel %vm8621_vm3, %v2012_v53, %v2028_v47  ;;  %v2316_v16 = vsel %vm8623_vm8, %v2284_v8, %v2268_v34  ;;  %v2060_v28 = vsel %vm8624_vm5, %v2028_v47, %v2012_v53  ;;  %v2172_v6 = vsel %vm8615_vm14, %v2140_v31, %v2156_v36  ;;  %vm8632_vm5 = vmmov %vm8626_vm2 }
 0x13c   : > { %v2110_v63 = vmax.f32 %v1982_v13, %v2044_v42  ;;  %v2079_v4 = vsel %vm8625_vm1, %v2060_v28, -1e+30  ;;  %v2444_v49 = vsel %vm8626_vm2, %v2412_v17, %v2396_v54  ;;  %v2188_v1 = vsel %vm8627_vm9, %v2156_v36, %v2140_v31  ;;  %vm8633_vm14 = vmmov %vm8628_vm6 }
 0x13d   : > { %v2111_v14 = vmax.f32 %v1983_v56, %v2079_v4  ;;  %v2334_v55 = vsel %vm8629_vm7, %v2316_v16, -1e+30  ;;  %vm8630_vm3 = vcmp.lt.s32.totalorder %v4997_v12, 14  ;;  %v1920_v56 = vmax.f32 %v1888_v11, %v6235_v20  ;;  %vm8634_vm1 = vmmov %vm8628_vm6 }
 0x13e   : > { %v2238_v21 = vmax.f32 %v2110_v63, %v2172_v6  ;;  %v2207_v26 = vsel %vm8630_vm3, %v2188_v1, -1e+30  ;;  %v2462_v51 = vsel %vm8631_vm0, %v2444_v49, -1e+30  ;;  %v2300_v27 = vsel %vm8623_vm8, %v2268_v34, %v2284_v8  ;;  %vm8637_vm6 = vmmov %vm8623_vm8 }
 0x13f   : > { %v2239_v61 = vmax.f32 %v2111_v14, %v2207_v26  ;;  %v1952_v47 = vmax.f32 %v1920_v56, %v6276_v30  ;;  %v2428_v23 = vsel %vm8632_vm5, %v2396_v54, %v2412_v17  ;;  %v1890_v42 = vmax.f32 %v6202_v44, %v6235_v20  ;;  %vm8638_vm7 = vmmov %vm8632_vm5 }
 0x140   : > { %v2366_v13 = vmax.f32 %v2238_v21, %v2334_v55  ;;  %v1923_v54 = vmax.f32 %v1891_v19, %v6262_v37  ;;  %vm8635_vm2 = vnez %v8369_v7  ;;  %v1893_v44 = vmax.f32 %v6222_v22, %v6262_v37 }
 0x141   : > { %v2367_v53 = vmax.f32 %v2239_v61, %v2300_v27  ;;  %v1922_v63 = vmax.f32 %v1890_v42, %v6276_v30  ;;  %vm8636_vm9 = vcmp.lt.s32.totalorder %v4975_v3, 7  ;;  %v1892_v22 = vmax.f32 %v6235_v20, %v6276_v30  ;;  %v4470_v42 = vld [vmem:[%s8282_s3 + $0x8] sm:$0xf] }
 0x142   : > { %v2494_v41 = vmax.f32 %v2366_v13, %v2462_v51  ;;  %vm8639_vm3 = vmmov %vm8636_vm9  ;;  %vm8640_vm0 = vcmp.lt.s32.totalorder %v4975_v3, 6  ;;  %vm8641_vm8 = vcmp.lt.s32.totalorder %v4997_v12, 15 }
 0x143   : > { %v2495_v8 = vmax.f32 %v2367_v53, %v2428_v23  ;;  %vm8642_vm5 = vmmov %vm8640_vm0 }
 0x144   : > { %4702 = vmatprep.mubr.msk.f32.mxu1 %vm8633_vm14, %v2494_v41  ;;  %vm8643_vm14 = vcmp.ge.s32.totalorder %v4975_v3, 1 }
 0x145   : > { %v6317_v40 = vpop.f32.mrf.mxu0  ;;  %4703 = vmatmul.mubr.msk.f32.gmra.mxu1 %vm8634_vm1, %v2495_v8  ;;  %vm8644_vm1 = vcmp.ge.s32.totalorder %v4975_v3, 2 }
 0x146   : > { %v6327_v60 = vsel %vm5293_vm12, %v6317_v40, -1e+30 }
 0x147   : > { %v6330_v31 = vpop.f32.mrf.mxu0  ;;  %v1985_v59 = vmax.f32 %v1953_v2, %v6327_v60  ;;  %v1955_v6 = vmax.f32 %v1923_v54, %v6327_v60  ;;  %v1925_v2 = vmax.f32 %v1893_v44, %v6327_v60 }
 0x148   : > { %v6338_v34 = vsel %vm5293_vm12, %v6330_v31, -1e+30 }
 0x149   : > { %v1984_v36 = vmax.f32 %v1952_v47, %v6338_v34  ;;  %v2029_v24 = vrot.slane %v1985_v59, 1  ;;  %v1954_v4 = vmax.f32 %v1922_v63, %v6338_v34  ;;  %v2285_v11 = vrot.slane %v1985_v59, 7 }
 0x14a   : > { %v2413_v55 = vrot.slane %v1985_v59, 6  ;;  %v2157_v13 = vrot.slane %v1985_v59, 2 }
 0x14b   : > { %v2013_v17 = vrot.slane %v1984_v36, 1  ;;  %v2269_v18 = vrot.slane %v1984_v36, 7  ;;  %v2397_v29 = vrot.slane %v1984_v36, 6  ;;  %v2141_v49 = vrot.slane %v1984_v36, 2 }
 0x14c   : > { %v6349_v16 = vpop.f32.mrf.mxu0 }
 0x14d   : > { %v6354_v28 = vsel %vm8635_vm2, %v6349_v16, -1e+30  ;;  %v2045_v1 = vsel %vm8636_vm9, %v2013_v17, %v2029_v24  ;;  %v2317_v56 = vsel %vm8637_vm6, %v2285_v11, %v2269_v18  ;;  %v2445_v51 = vsel %vm8638_vm7, %v2413_v55, %v2397_v29 }
 0x14e   : > { %v6360_v21 = vpop.f32.mrf.mxu0  ;;  %v6372_v26 = vmax.f32 %v1955_v6, %v6354_v28  ;;  %v2112_v61 = vmax.f32 %v1984_v36, %v2045_v1  ;;  %v2061_v27 = vsel %vm8639_vm3, %v2029_v24, %v2013_v17  ;;  %v2173_v20 = vsel %vm8640_vm0, %v2141_v49, %v2157_v13 }
 0x14f   : > { %v6365_v14 = vsel %vm8635_vm2, %v6360_v21, -1e+30  ;;  %v2081_v41 = vsel %vm8641_vm8, %v2061_v27, -1e+30  ;;  %v2189_v53 = vsel %vm8642_vm5, %v2157_v13, %v2141_v49  ;;  %v2336_v23 = vsel %vm8643_vm14, %v2317_v56, -1e+30 }
 0x150   : > { %v6375_v46 = vmax.f32 %v1954_v4, %v6365_v14  ;;  %v2240_v47 = vmax.f32 %v2112_v61, %v2173_v20  ;;  %v2464_v8 = vsel %vm8644_vm1, %v2445_v51, -1e+30  ;;  %v2113_v19 = vmax.f32 %v1985_v59, %v2081_v41 }
 0x151   : > { %vm8645_vm9 = vcmp.lt.s32.totalorder %v4997_v12, 14  ;;  %v2030_v63 = vrot.slane %v6372_v26, 1  ;;  %vm8646_vm6 = vcmask 1043456   ;;  %vm8647_vm7 = vcmp.lt.s32.totalorder %v4975_v3, 1 }
 0x152   : > { %v2209_v36 = vsel %vm8645_vm9, %v2189_v53, -1e+30  ;;  %v2014_v54 = vrot.slane %v6375_v46, 1  ;;  %v2142_v17 = vrot.slane %v6375_v46, 2  ;;  %4744 = vmatprep.subr.msk.mxu1 %vm8646_vm6, %v4470_v42  ;;  %v2368_v24 = vmax.f32 %v2240_v47, %v2336_v23  ;;  %vm8648_vm3 = vmmov %vm8646_vm6 }
 0x153   : > { %v2241_v44 = vmax.f32 %v2113_v19, %v2209_v36  ;;  %v2301_v59 = vsel %vm8647_vm7, %v2269_v18, %v2285_v11  ;;  %v2270_v6 = vrot.slane %v6375_v46, 7  ;;  %4745 = vmatpush3.msk.msra.mxu1 %vm8648_vm3, %v4470_v42  ;;  %vm8649_vm0 = vcmp.lt.s32.totalorder %v4975_v3, 7  ;;  %vm8651_vm14 = vmmov %vm8647_vm7 }
 0x154   : > { %v2046_v4 = vsel %vm8649_vm0, %v2014_v54, %v2030_v63  ;;  %v2158_v49 = vrot.slane %v6372_v26, 2  ;;  %v2286_v1 = vrot.slane %v6372_v26, 7  ;;  %v2398_v13 = vrot.slane %v6375_v46, 6  ;;  %vm8652_vm1 = vmmov %vm8649_vm0 }
 0x155   : > { %v2496_v61 = vmax.f32 %v2368_v24, %v2464_v8  ;;  %v2369_v56 = vmax.f32 %v2241_v44, %v2301_v59  ;;  %vm8650_vm8 = vcmp.lt.s32.totalorder %v4975_v3, 2  ;;  %v2114_v18 = vmax.f32 %v6375_v46, %v2046_v4  ;;  %vm8657_vm0 = vmmov %vm8642_vm5 }
 0x156   : > { %v2429_v51 = vsel %vm8650_vm8, %v2397_v29, %v2413_v55  ;;  %v2174_v11 = vsel %vm8642_vm5, %v2142_v17, %v2158_v49  ;;  %v2318_v27 = vsel %vm8651_vm14, %v2286_v1, %v2270_v6  ;;  %v2414_v20 = vrot.slane %v6372_v26, 6  ;;  %vm8655_vm7 = vmmov %vm8650_vm8 }
 0x157   : > { %v2062_v41 = vsel %vm8652_vm1, %v2030_v63, %v2014_v54  ;;  %v1924_v53 = vmax.f32 %v1892_v22, %v6338_v34  ;;  %v1957_v47 = vmax.f32 %v1925_v2, %v6354_v28  ;;  %vm8653_vm9 = vcmask 31744  }
 0x158   : > { %4705 = vmatprep.mubr.msk.f32.mxu1 %vm8653_vm9, %v2496_v61  ;;  %v2497_v29 = vmax.f32 %v2369_v56, %v2429_v51  ;;  %v2242_v55 = vmax.f32 %v2114_v18, %v2174_v11  ;;  %vm8654_vm6 = vnez %v8379_v57  ;;  %v2446_v8 = vsel %vm8655_vm7, %v2414_v20, %v2398_v13  ;;  %vm8658_vm8 = vmmov %vm8653_vm9 }
 0x159   : > { %vm8656_vm3 = vcmp.lt.s32.totalorder %v4997_v12, 15  ;;  %v2190_v22 = vsel %vm8657_vm0, %v2158_v49, %v2142_v17  ;;  %v1956_v2 = vmax.f32 %v1924_v53, %v6365_v14  ;;  %vm8659_vm5 = vcmp.ge.s32.totalorder %v4975_v3, 1  ;;  %vm8663_vm7 = vmmov %vm8658_vm8 }
 0x15a   : > { %v2083_v19 = vsel %vm8656_vm3, %v2062_v41, -1e+30  ;;  %4706 = vmatmul.mubr.msk.f32.gmra.mxu1 %vm8658_vm8, %v2497_v29  ;;  %v2338_v54 = vsel %vm8659_vm5, %v2318_v27, -1e+30  ;;  %v1895_v63 = vmax.f32 %v6262_v37, %v6327_v60  ;;  %v1894_v59 = vmax.f32 %v6276_v30, %v6338_v34 }
 0x15b   : > { %v2370_v17 = vmax.f32 %v2242_v55, %v2338_v54  ;;  %v2115_v44 = vmax.f32 %v6372_v26, %v2083_v19  ;;  %vm8660_vm14 = vcmp.ge.s32.totalorder %v4975_v3, 2  ;;  %vm8661_vm1 = vcmp.lt.s32.totalorder %v4997_v12, 14 }
 0x15c   : > { %v2466_v49 = vsel %vm8660_vm14, %v2446_v8, -1e+30  ;;  %v2211_v37 = vsel %vm8661_vm1, %v2190_v22, -1e+30  ;;  %v1927_v61 = vmax.f32 %v1895_v63, %v6354_v28  ;;  %v1926_v18 = vmax.f32 %v1894_v59, %v6365_v14  ;;  %vm8669_vm1 = vmmov %vm8663_vm7 }
 0x15d   : > { %v6424_v23 = vpop.f32.mrf.mxu0  ;;  %v2498_v56 = vmax.f32 %v2370_v17, %v2466_v49  ;;  %v2243_v51 = vmax.f32 %v2115_v44, %v2211_v37  ;;  %vm8662_vm9 = vcmp.lt.s32.totalorder %v4975_v3, 1  ;;  %vm8664_vm3 = vcmp.lt.s32.totalorder %v4975_v3, 2 }
 0x15e   : > { %v6430_v46 = vsel %vm8654_vm6, %v6424_v23, -1e+30  ;;  %v2302_v26 = vsel %vm8662_vm9, %v2270_v6, %v2286_v1  ;;  %v2430_v41 = vsel %vm8664_vm3, %v2398_v13, %v2414_v20  ;;  %vm8665_vm0 = vcmp.lt.s32.totalorder %v4975_v3, 7  ;;  %vm8668_vm14 = vmmov %vm8662_vm9 }
 0x15f   : > { %v6440_v42 = vmax.f32 %v1957_v47, %v6430_v46  ;;  %v6442_v36 = vpop.f32.mrf.mxu0  ;;  %4708 = vmatprep.mubr.msk.f32.mxu1 %vm8663_vm7, %v2498_v56  ;;  %v2371_v27 = vmax.f32 %v2243_v51, %v2302_v26  ;;  %vm8666_vm8 = vmmov %vm8665_vm0  ;;  %v1959_v8 = vmax.f32 %v1927_v61, %v6430_v46  ;;  %vm8667_vm5 = vnez %v8393_v48 }
 0x160   : > { %v6452_v24 = vsel %vm8654_vm6, %v6442_v36, -1e+30  ;;  %vm8670_vm9 = vcmp.lt.s32.totalorder %v4975_v3, 6  ;;  %vm8671_vm7 = vcmp.lt.s32.totalorder %v4997_v12, 15  ;;  %v1897_v37 = vmax.f32 %v6327_v60, %v6354_v28 }
 0x161   : > { %v6458_v4 = vmax.f32 %v1956_v2, %v6452_v24  ;;  %v2031_v11 = vrot.slane %v6440_v42, 1  ;;  %v2287_v55 = vrot.slane %v6440_v42, 7  ;;  %v2499_v22 = vmax.f32 %v2371_v27, %v2430_v41 }
 0x162   : > { %v2159_v20 = vrot.slane %v6440_v42, 2  ;;  %v2415_v63 = vrot.slane %v6440_v42, 6  ;;  %v1958_v17 = vmax.f32 %v1926_v18, %v6452_v24  ;;  %v1896_v18 = vmax.f32 %v6338_v34, %v6365_v14 }
 0x163   : > { %v2015_v30 = vrot.slane %v6458_v4, 1  ;;  %v2143_v53 = vrot.slane %v6458_v4, 2  ;;  %v2271_v47 = vrot.slane %v6458_v4, 7  ;;  %v2399_v6 = vrot.slane %v6458_v4, 6  ;;  %4709 = vmatmul.mubr.msk.f32.gmra.mxu1 %vm8669_vm1, %v2499_v22 }
 0x164   : > { %v1929_v60 = vmax.f32 %v1897_v37, %v6430_v46  ;;  %vm8675_vm1 = vcmp.lt.s32.totalorder %v4997_v12, 14  ;;  %v1928_v22 = vmax.f32 %v1896_v18, %v6452_v24 }
 0x165   : > { %v2047_v29 = vsel %vm8665_vm0, %v2015_v30, %v2031_v11  ;;  %v2063_v1 = vsel %vm8666_vm8, %v2031_v11, %v2015_v30  ;;  %v2319_v54 = vsel %vm8668_vm14, %v2287_v55, %v2271_v47  ;;  %v2447_v51 = vsel %vm8664_vm3, %v2415_v63, %v2399_v6  ;;  %vm8673_vm8 = vmmov %vm8670_vm9 }
 0x166   : > { %v2116_v13 = vmax.f32 %v6458_v4, %v2047_v29  ;;  %v2175_v4 = vsel %vm8670_vm9, %v2143_v53, %v2159_v20  ;;  %v2085_v49 = vsel %vm8671_vm7, %v2063_v1, -1e+30  ;;  %vm8672_vm0 = vcmp.ge.s32.totalorder %v4975_v3, 1 }
 0x167   : > { %v2340_v30 = vsel %vm8672_vm0, %v2319_v54, -1e+30  ;;  %v2117_v27 = vmax.f32 %v6440_v42, %v2085_v49  ;;  %v2191_v41 = vsel %vm8673_vm8, %v2159_v20, %v2143_v53  ;;  %vm8674_vm14 = vcmp.ge.s32.totalorder %v4975_v3, 2 }
 0x168   : > { %v6482_v19 = vpop.f32.mrf.mxu0  ;;  %v2244_v56 = vmax.f32 %v2116_v13, %v2175_v4  ;;  %v2468_v29 = vsel %vm8674_vm14, %v2447_v51, -1e+30  ;;  %v2213_v34 = vsel %vm8675_vm1, %v2191_v41, -1e+30  ;;  %vm8676_vm9 = vcmp.lt.s32.totalorder %v4975_v3, 1 }
 0x169   : > { %v6489_v2 = vsel %vm8667_vm5, %v6482_v19, -1e+30  ;;  %v2245_v54 = vmax.f32 %v2117_v27, %v2213_v34  ;;  %v2303_v42 = vsel %vm8676_vm9, %v2271_v47, %v2287_v55  ;;  %vm8677_vm7 = vcmp.lt.s32.totalorder %v4975_v3, 7  ;;  %vm8681_vm1 = vmmov %vm8676_vm9 }
 0x16a   : > { %v6496_v44 = vmax.f32 %v1959_v8, %v6489_v2  ;;  %v6498_v59 = vpop.f32.mrf.mxu0  ;;  %v2372_v11 = vmax.f32 %v2244_v56, %v2340_v30  ;;  %vm8678_vm3 = vcmask 31744   ;;  %v1961_v18 = vmax.f32 %v1929_v60, %v6489_v2  ;;  %vm8682_vm9 = vmmov %vm8677_vm7 }
 0x16b   : > { %v6510_v61 = vsel %vm8667_vm5, %v6498_v59, -1e+30  ;;  %v2373_v49 = vmax.f32 %v2245_v54, %v2303_v42  ;;  %vm8679_vm0 = vcmp.lt.s32.totalorder %v4975_v3, 2  ;;  %vm8680_vm14 = vnez %v8418_v25 }
 0x16c   : > { %v6517_v26 = vmax.f32 %v1958_v17, %v6510_v61  ;;  %v2032_v8 = vrot.slane %v6496_v44, 1  ;;  %v2500_v13 = vmax.f32 %v2372_v11, %v2468_v29  ;;  %v2160_v20 = vrot.slane %v6496_v44, 2 }
 0x16d   : > { %v2288_v56 = vrot.slane %v6496_v44, 7  ;;  %v2431_v47 = vsel %vm8679_vm0, %v2399_v6, %v2415_v63  ;;  %v2416_v11 = vrot.slane %v6496_v44, 6  ;;  %v1960_v60 = vmax.f32 %v1928_v22, %v6510_v61 }
 0x16e   : > { %v2016_v1 = vrot.slane %v6517_v26, 1  ;;  %v2144_v17 = vrot.slane %v6517_v26, 2  ;;  %v2272_v4 = vrot.slane %v6517_v26, 7  ;;  %4711 = vmatprep.mubr.msk.f32.mxu1 %vm8678_vm3, %v2500_v13  ;;  %v2400_v51 = vrot.slane %v6517_v26, 6 }
 0x16f   : > { %v2501_v41 = vmax.f32 %v2373_v49, %v2431_v47  ;;  %v1899_v13 = vmax.f32 %v6354_v28, %v6430_v46  ;;  %v1898_v54 = vmax.f32 %v6365_v14, %v6452_v24 }
 0x170   : > { %v2048_v53 = vsel %vm8677_vm7, %v2016_v1, %v2032_v8  ;;  %v2176_v55 = vsel %vm8673_vm8, %v2144_v17, %v2160_v20  ;;  %v2064_v63 = vsel %vm8682_vm9, %v2032_v8, %v2016_v1  ;;  %vm8683_vm7 = vmmov %vm8678_vm3  ;;  %v2192_v28 = vsel %vm8673_vm8, %v2160_v20, %v2144_v17 }
 0x171   : > { %v2118_v37 = vmax.f32 %v6517_v26, %v2048_v53  ;;  %v2320_v26 = vsel %vm8681_vm1, %v2288_v56, %v2272_v4  ;;  %4712 = vmatmul.mubr.msk.f32.gmra.mxu1 %vm8683_vm7, %v2501_v41  ;;  %vm8684_vm3 = vmmov %vm8679_vm0  ;;  %vm8685_vm0 = vcmp.ge.s32.totalorder %v4975_v3, 1  ;;  %v1931_v14 = vmax.f32 %v1899_v13, %v6489_v2 }
 0x172   : > { %v2448_v22 = vsel %vm8684_vm3, %v2416_v11, %v2400_v51  ;;  %v2342_v1 = vsel %vm8685_vm0, %v2320_v26, -1e+30  ;;  %v1930_v8 = vmax.f32 %v1898_v54, %v6510_v61  ;;  %vm8686_vm1 = vcmp.lt.s32.totalorder %v4997_v12, 15 }
 0x173   : > { %v2246_v29 = vmax.f32 %v2118_v37, %v2176_v55  ;;  %v2087_v37 = vsel %vm8686_vm1, %v2064_v63, -1e+30  ;;  %vm8687_vm9 = vcmp.ge.s32.totalorder %v4975_v3, 2  ;;  %vm8688_vm7 = vcmp.lt.s32.totalorder %v4997_v12, 14 }
 0x174   : > { %v2119_v47 = vmax.f32 %v6496_v44, %v2087_v37  ;;  %v2215_v17 = vsel %vm8688_vm7, %v2192_v28, -1e+30  ;;  %vm8689_vm3 = vcmp.lt.s32.totalorder %v4975_v3, 1  ;;  %vm8690_vm0 = vcmp.lt.s32.totalorder %v4975_v3, 7 }
 0x175   : > { %v6544_v30 = vpop.f32.mrf.mxu0  ;;  %v2374_v49 = vmax.f32 %v2246_v29, %v2342_v1  ;;  %v2304_v13 = vsel %vm8689_vm3, %v2272_v4, %v2288_v56  ;;  %vm8691_vm8 = vcmask 31744   ;;  %vm8692_vm1 = vnez %v8421_v38 }
 0x176   : > { %v6554_v27 = vsel %vm8680_vm14, %v6544_v30, -1e+30  ;;  %v2247_v63 = vmax.f32 %v2119_v47, %v2215_v17  ;;  %vm8694_vm7 = vcmp.lt.s32.totalorder %v4975_v3, 6 }
 0x177   : > { %v6560_v34 = vmax.f32 %v1961_v18, %v6554_v27  ;;  %v6562_v6 = vpop.f32.mrf.mxu0  ;;  %v2470_v18 = vsel %vm8687_vm9, %v2448_v22, -1e+30  ;;  %vm8693_vm9 = vcmp.lt.s32.totalorder %v4975_v3, 2 }
 0x178   : > { %v6573_v42 = vsel %vm8680_vm14, %v6562_v6, -1e+30  ;;  %v2502_v26 = vmax.f32 %v2374_v49, %v2470_v18  ;;  %v2375_v4 = vmax.f32 %v2247_v63, %v2304_v13  ;;  %v2432_v56 = vsel %vm8693_vm9, %v2400_v51, %v2416_v11 }
 0x179   : > { %v6579_v53 = vmax.f32 %v1960_v60, %v6573_v42  ;;  %v2033_v41 = vrot.slane %v6560_v34, 1  ;;  %v1963_v60 = vmax.f32 %v1931_v14, %v6554_v27  ;;  %v1962_v54 = vmax.f32 %v1930_v8, %v6573_v42 }
 0x17a   : > { %4714 = vmatprep.mubr.msk.f32.mxu1 %vm8691_vm8, %v2502_v26  ;;  %v2161_v28 = vrot.slane %v6560_v34, 2  ;;  %v2289_v49 = vrot.slane %v6560_v34, 7  ;;  %v2417_v26 = vrot.slane %v6560_v34, 6  ;;  %v2503_v11 = vmax.f32 %v2375_v4, %v2432_v56 }
 0x17b   : > { %v2017_v55 = vrot.slane %v6579_v53, 1  ;;  %v2145_v20 = vrot.slane %v6579_v53, 2  ;;  %v2273_v29 = vrot.slane %v6579_v53, 7  ;;  %v2401_v8 = vrot.slane %v6579_v53, 6 }
 0x17c   : > { %v1901_v13 = vmax.f32 %v6430_v46, %v6489_v2  ;;  %4715 = vmatmul.mubr.msk.f32.gmra.mxu1 %vm8691_vm8, %v2503_v11  ;;  %vm8695_vm9 = vcmp.ge.s32.totalorder %v4975_v3, 1  ;;  %v1900_v46 = vmax.f32 %v6452_v24, %v6510_v61  ;;  %vm8700_vm8 = vcmp.lt.s32.totalorder %v4997_v12, 14 }
 0x17d   : > { %v2049_v44 = vsel %vm8690_vm0, %v2017_v55, %v2033_v41  ;;  %v2177_v18 = vsel %vm8694_vm7, %v2145_v20, %v2161_v28  ;;  %v2321_v47 = vsel %vm8689_vm3, %v2289_v49, %v2273_v29  ;;  %v2065_v17 = vsel %vm8690_vm0, %v2033_v41, %v2017_v55 }
 0x17e   : > { %v2120_v1 = vmax.f32 %v6579_v53, %v2049_v44  ;;  %v2344_v55 = vsel %vm8695_vm9, %v2321_v47, -1e+30  ;;  %vm8696_vm7 = vcmp.lt.s32.totalorder %v4975_v3, 2  ;;  %vm8697_vm3 = vcmp.lt.s32.totalorder %v4997_v12, 15 }
 0x17f   : > { %v2449_v41 = vsel %vm8696_vm7, %v2417_v26, %v2401_v8  ;;  %vm8698_vm0 = vcmp.lt.s32.totalorder %v4975_v3, 6  ;;  %vm8701_vm9 = vcmp.lt.s32.totalorder %v4975_v3, 1  ;;  %vm8703_vm7 = vcmask 31744  }
 0x180   : > { %v6604_v22 = vpop.f32.mrf.mxu0  ;;  %v2248_v53 = vmax.f32 %v2120_v1, %v2177_v18  ;;  %v2193_v1 = vsel %vm8698_vm0, %v2161_v28, %v2145_v20  ;;  %v2305_v47 = vsel %vm8701_vm9, %v2273_v29, %v2289_v49  ;;  %v1933_v29 = vmax.f32 %v1901_v13, %v6554_v27 }
 0x181   : > { %v6613_v14 = vsel %vm8692_vm1, %v6604_v22, -1e+30  ;;  %v2217_v18 = vsel %vm8700_vm8, %v2193_v1, -1e+30  ;;  %vm8705_vm8 = vmmov %vm8701_vm9  ;;  %v1932_v13 = vmax.f32 %v1900_v46, %v6573_v42 }
 0x182   : > { %v6618_v37 = vpop.f32.mrf.mxu0  ;;  %v6628_v63 = vmax.f32 %v1963_v60, %v6613_v14  ;;  %v2089_v60 = vsel %vm8697_vm3, %v2065_v17, -1e+30  ;;  %v2376_v4 = vmax.f32 %v2248_v53, %v2344_v55  ;;  %vm8704_vm3 = vcmp.lt.s32.totalorder %v4975_v3, 2 }
 0x183   : > { %v6633_v51 = vsel %vm8692_vm1, %v6618_v37, -1e+30  ;;  %vm8699_vm1 = vcmp.ge.s32.totalorder %v4975_v3, 2  ;;  %v2121_v56 = vmax.f32 %v6560_v34, %v2089_v60  ;;  %v2433_v1 = vsel %vm8704_vm3, %v2401_v8, %v2417_v26 }
 0x184   : > { %v6638_v44 = vmax.f32 %v1962_v54, %v6633_v51  ;;  %v2472_v54 = vsel %vm8699_vm1, %v2449_v41, -1e+30  ;;  %v2034_v11 = vrot.slane %v6628_v63, 1  ;;  %v2162_v53 = vrot.slane %v6628_v63, 2 }
 0x185   : > { %v2504_v20 = vmax.f32 %v2376_v4, %v2472_v54  ;;  %v2249_v28 = vmax.f32 %v2121_v56, %v2217_v18  ;;  %vm8702_vm1 = vcmp.lt.s32.totalorder %v4975_v3, 7  ;;  %v2290_v41 = vrot.slane %v6628_v63, 7 }
 0x186   : > { %v2018_v17 = vrot.slane %v6638_v44, 1  ;;  %v2146_v24 = vrot.slane %v6638_v44, 2  ;;  %v2274_v34 = vrot.slane %v6638_v44, 7  ;;  %v2402_v60 = vrot.slane %v6638_v44, 6  ;;  %vm8706_vm9 = vmmov %vm8702_vm1 }
 0x187   : > { %4717 = vmatprep.mubr.msk.f32.mxu1 %vm8703_vm7, %v2504_v20  ;;  %v2377_v49 = vmax.f32 %v2249_v28, %v2305_v47  ;;  %v2418_v18 = vrot.slane %v6628_v63, 6  ;;  %v1965_v47 = vmax.f32 %v1933_v29, %v6613_v14  ;;  %vm8708_vm7 = vmmov %vm8704_vm3  ;;  %vm8709_vm3 = vcmp.lt.s32.totalorder %v4997_v12, 15 }
 0x188   : > { %v2050_v55 = vsel %vm8702_vm1, %v2018_v17, %v2034_v11  ;;  %v2178_v54 = vsel %vm8698_vm0, %v2146_v24, %v2162_v53  ;;  %v2322_v56 = vsel %vm8705_vm8, %v2290_v41, %v2274_v34  ;;  %v2066_v38 = vsel %vm8706_vm9, %v2034_v11, %v2018_v17 }
 0x189   : > { %v2122_v4 = vmax.f32 %v6638_v44, %v2050_v55  ;;  %v2505_v8 = vmax.f32 %v2377_v49, %v2433_v1  ;;  %v1903_v44 = vmax.f32 %v6489_v2, %v6554_v27  ;;  %vm8707_vm1 = vnez %v8438_v35 }
 0x18a   : > { %v2450_v55 = vsel %vm8708_vm7, %v2418_v18, %v2402_v60  ;;  %v2091_v46 = vsel %vm8709_vm3, %v2066_v38, -1e+30  ;;  %v1964_v17 = vmax.f32 %v1932_v13, %v6633_v51  ;;  %vm8711_vm0 = vcmask 31744  }
 0x18b   : > { %v2250_v26 = vmax.f32 %v2122_v4, %v2178_v54  ;;  %4718 = vmatmul.mubr.msk.f32.gmra.mxu1 %vm8711_vm0, %v2505_v8  ;;  %vm8712_vm8 = vcmp.ge.s32.totalorder %v4975_v3, 1  ;;  %vm8713_vm9 = vcmp.lt.s32.totalorder %v4975_v3, 6  ;;  %v1902_v1 = vmax.f32 %v6510_v61, %v6573_v42 }
 0x18c   : > { %v2346_v2 = vsel %vm8712_vm8, %v2322_v56, -1e+30  ;;  %v2194_v49 = vsel %vm8713_vm9, %v2162_v53, %v2146_v24  ;;  %v2123_v54 = vmax.f32 %v6628_v63, %v2091_v46  ;;  %v1935_v13 = vmax.f32 %v1903_v44, %v6613_v14 }
 0x18d   : > { %v2378_v4 = vmax.f32 %v2250_v26, %v2346_v2  ;;  %vm8714_vm7 = vcmp.ge.s32.totalorder %v4975_v3, 2  ;;  %v1934_v24 = vmax.f32 %v1902_v1, %v6633_v51  ;;  %vm8715_vm3 = vcmp.lt.s32.totalorder %v4997_v12, 14 }
 0x18e   : > { %v2474_v56 = vsel %vm8714_vm7, %v2450_v55, -1e+30  ;;  %v2219_v61 = vsel %vm8715_vm3, %v2194_v49, -1e+30  ;;  %vm8716_vm0 = vcmp.lt.s32.totalorder %v4975_v3, 1  ;;  %vm8717_vm8 = vcmask 31744  }
 0x18f   : > { %v2506_v53 = vmax.f32 %v2378_v4, %v2474_v56  ;;  %v2306_v8 = vsel %vm8716_vm0, %v2274_v34, %v2290_v41  ;;  %v2251_v2 = vmax.f32 %v2123_v54, %v2219_v61  ;;  %vm8718_vm9 = vcmp.lt.s32.totalorder %v4975_v3, 2 }
 0x190   : > { %v6681_v20 = vpop.f32.mrf.mxu0  ;;  %v2434_v44 = vsel %vm8718_vm9, %v2402_v60, %v2418_v18  ;;  %vm8719_vm7 = vcmp.lt.s32.totalorder %v4975_v3, 7  ;;  %vm8721_vm0 = vcmp.lt.s32.totalorder %v4997_v12, 15  ;;  %vm8723_vm9 = vcmp.lt.s32.totalorder %v4975_v3, 1 }
 0x191   : > { %v6688_v28 = vsel %vm8707_vm1, %v6681_v20, -1e+30  ;;  %4720 = vmatprep.mubr.msk.f32.mxu1 %vm8717_vm8, %v2506_v53  ;;  %v2379_v4 = vmax.f32 %v2251_v2, %v2306_v8  ;;  %vm8720_vm3 = vmmov %vm8719_vm7  ;;  %vm8722_vm8 = vnez %v8455_v62 }
 0x192   : > { %v1997_v11 = vmax.f32 %v1965_v47, %v6688_v28  ;;  %v6696_v29 = vpop.f32.mrf.mxu0  ;;  %v1967_v26 = vmax.f32 %v1935_v13, %v6688_v28 }
 0x193   : > { %8710 = vst [vmem:[#allocation7_spill] sm:$0xff] %v6696_v29  ;;  %v6708_v38 = vsel %vm8707_vm1, %v6696_v29, -1e+30  ;;  %v2507_v18 = vmax.f32 %v2379_v4, %v2434_v44  ;;  %vm8728_vm1 = vcmp.ge.s32.totalorder %v4975_v3, 1 }
 0x194   : > { %v1996_v47 = vmax.f32 %v1964_v17, %v6708_v38  ;;  %v2035_v46 = vrot.slane %v1997_v11, 1  ;;  %v2291_v56 = vrot.slane %v1997_v11, 7  ;;  %v2163_v13 = vrot.slane %v1997_v11, 2 }
 0x195   : > { %v2419_v61 = vrot.slane %v1997_v11, 6  ;;  %v1966_v2 = vmax.f32 %v1934_v24, %v6708_v38 }
 0x196   : > { %v2019_v63 = vrot.slane %v1996_v47, 1  ;;  %v2147_v55 = vrot.slane %v1996_v47, 2  ;;  %v2275_v17 = vrot.slane %v1996_v47, 7  ;;  %v2403_v1 = vrot.slane %v1996_v47, 6 }
 0x198   : > { %v2051_v49 = vsel %vm8719_vm7, %v2019_v63, %v2035_v46  ;;  %v2067_v34 = vsel %vm8720_vm3, %v2035_v46, %v2019_v63  ;;  %v2323_v8 = vsel %vm8723_vm9, %v2291_v56, %v2275_v17  ;;  %vm8724_vm7 = vcmp.lt.s32.totalorder %v4975_v3, 6 }
 0x199   : > { %v2124_v54 = vmax.f32 %v1996_v47, %v2051_v49  ;;  %v2093_v53 = vsel %vm8721_vm0, %v2067_v34, -1e+30  ;;  %v2179_v47 = vsel %vm8724_vm7, %v2147_v55, %v2163_v13  ;;  %vm8725_vm3 = vcmp.lt.s32.totalorder %v4975_v3, 2  ;;  %vm8727_vm9 = vmmov %vm8724_vm7 }
 0x19a   : > { %v2451_v46 = vsel %vm8725_vm3, %v2419_v61, %v2403_v1  ;;  %vm8726_vm0 = vcmask 31744   ;;  %v2125_v4 = vmax.f32 %v1997_v11, %v2093_v53  ;;  %v2195_v24 = vsel %vm8727_vm9, %v2163_v13, %v2147_v55 }
 0x19b   : > { %v4678_v41 = vpop.f32.mrf.mxu0  ;;  %4721 = vmatmul.mubr.msk.f32.gmra.mxu1 %vm8726_vm0, %v2507_v18  ;;  %v2252_v44 = vmax.f32 %v2124_v54, %v2179_v47  ;;  %v2348_v34 = vsel %vm8728_vm1, %v2323_v8, -1e+30  ;;  %vm8729_vm7 = vcmp.ge.s32.totalorder %v4975_v3, 2  ;;  %vm8730_vm3 = vcmp.lt.s32.totalorder %v4997_v12, 14 }
 0x19c   : > { %v6732_v60 = vsel %vm8722_vm8, %v4678_v41, -1e+30  ;;  %v2476_v29 = vsel %vm8729_vm7, %v2451_v46, -1e+30  ;;  %vm8732_vm0 = vcmp.lt.s32.totalorder %v4975_v3, 2  ;;  %vm8733_vm1 = vcmp.lt.s32.totalorder %v4975_v3, 7 }
 0x19d   : > { %v1999_v35 = vmax.f32 %v1967_v26, %v6732_v60  ;;  %v1767_v63 = vpop.f32.mrf.mxu0  ;;  %v2380_v41 = vmax.f32 %v2252_v44, %v2348_v34  ;;  %v2435_v13 = vsel %vm8732_vm0, %v2403_v1, %v2419_v61  ;;  %vm8734_vm9 = vcmask 31744   ;;  %vm8735_vm7 = vmmov %vm8733_vm1 }
 0x19e   : > { %v6744_v49 = vsel %vm8722_vm8, %v1767_v63, -1e+30  ;;  %v2221_v63 = vsel %vm8730_vm3, %v2195_v24, -1e+30  ;;  %vm8731_vm8 = vcmp.lt.s32.totalorder %v4975_v3, 1  ;;  %v1905_v1 = vmax.f32 %v6554_v27, %v6613_v14 }
 0x19f   : > { %v1998_v26 = vmax.f32 %v1966_v2, %v6744_v49  ;;  %v2307_v18 = vsel %vm8731_vm8, %v2275_v17, %v2291_v56  ;;  %v2253_v54 = vmax.f32 %v2125_v4, %v2221_v63  ;;  %v2036_v53 = vrot.slane %v1999_v35, 1 }
 0x1a0   : > { %v2508_v55 = vmax.f32 %v2380_v41, %v2476_v29  ;;  %v2292_v8 = vrot.slane %v1999_v35, 7  ;;  %v2164_v34 = vrot.slane %v1999_v35, 2  ;;  %v2420_v56 = vrot.slane %v1999_v35, 6 }
 0x1a1   : > { %v2020_v11 = vrot.slane %v1998_v26, 1  ;;  %v2148_v47 = vrot.slane %v1998_v26, 2  ;;  %v2276_v2 = vrot.slane %v1998_v26, 7  ;;  %v2381_v44 = vmax.f32 %v2253_v54, %v2307_v18 }
 0x1a2   : > { %v2404_v62 = vrot.slane %v1998_v26, 6  ;;  %4723 = vmatprep.mubr.msk.f32.mxu1 %vm8734_vm9, %v2508_v55  ;;  %vm8736_vm3 = vcmp.lt.s32.totalorder %v4975_v3, 6  ;;  %vm8737_vm0 = vcmp.lt.s32.totalorder %v4997_v12, 15  ;;  %v1937_v55 = vmax.f32 %v1905_v1, %v6688_v28 }
 0x1a3   : > { %v2052_v46 = vsel %vm8733_vm1, %v2020_v11, %v2036_v53  ;;  %v2324_v17 = vsel %vm8731_vm8, %v2292_v8, %v2276_v2  ;;  %v2068_v29 = vsel %vm8735_vm7, %v2036_v53, %v2020_v11  ;;  %v2509_v61 = vmax.f32 %v2381_v44, %v2435_v13  ;;  %vm8739_vm9 = vmmov %vm8736_vm3 }
 0x1a4   : > { %v2126_v24 = vmax.f32 %v1998_v26, %v2052_v46  ;;  %v2180_v4 = vsel %vm8736_vm3, %v2148_v47, %v2164_v34  ;;  %v2095_v41 = vsel %vm8737_vm0, %v2068_v29, -1e+30  ;;  %vm8738_vm1 = vcmp.lt.s32.totalorder %v4975_v3, 2 }
 0x1a5   : > { %v2452_v26 = vsel %vm8738_vm1, %v2420_v56, %v2404_v62  ;;  %v2127_v18 = vmax.f32 %v1999_v35, %v2095_v41  ;;  %v2196_v54 = vsel %vm8739_vm9, %v2164_v34, %v2148_v47  ;;  %v1904_v11 = vmax.f32 %v6573_v42, %v6633_v51 }
 0x1a6   : > { %v2254_v63 = vmax.f32 %v2126_v24, %v2180_v4  ;;  %vm8740_vm8 = vcmask 31744   ;;  %vm8741_vm7 = vcmp.ge.s32.totalorder %v4975_v3, 1  ;;  %vm8742_vm3 = vcmp.lt.s32.totalorder %v4997_v12, 14 }
 0x1a7   : > { %4724 = vmatmul.mubr.msk.f32.gmra.mxu1 %vm8740_vm8, %v2509_v61  ;;  %v2350_v27 = vsel %vm8741_vm7, %v2324_v17, -1e+30  ;;  %v2223_v53 = vsel %vm8742_vm3, %v2196_v54, -1e+30  ;;  %v1936_v35 = vmax.f32 %v1904_v11, %v6708_v38  ;;  %vm8743_vm0 = vcmp.ge.s32.totalorder %v4975_v3, 2 }
 0x1a8   : > { %v2382_v13 = vmax.f32 %v2254_v63, %v2350_v27  ;;  %v2255_v44 = vmax.f32 %v2127_v18, %v2223_v53  ;;  %v2478_v47 = vsel %vm8743_vm0, %v2452_v26, -1e+30  ;;  %vm8744_vm1 = vcmp.lt.s32.totalorder %v4975_v3, 1 }
 0x1a9   : > { %v2308_v42 = vsel %vm8744_vm1, %v2276_v2, %v2292_v8  ;;  %v1969_v34 = vmax.f32 %v1937_v55, %v6732_v60  ;;  %vm8745_vm9 = vnez %v8474_v45  ;;  %v1907_v1 = vmax.f32 %v6613_v14, %v6688_v28 }
 0x1aa   : > { %v2510_v17 = vmax.f32 %v2382_v13, %v2478_v47  ;;  %v2383_v29 = vmax.f32 %v2255_v44, %v2308_v42  ;;  %v1968_v61 = vmax.f32 %v1936_v35, %v6744_v49  ;;  %vm8746_vm8 = vcmp.lt.s32.totalorder %v4975_v3, 2 }
 0x1ab   : > { %v2436_v41 = vsel %vm8746_vm8, %v2404_v62, %v2420_v56  ;;  %v1906_v2 = vmax.f32 %v6633_v51, %v6708_v38  ;;  %vm8747_vm7 = vcmask 31744   ;;  %v1939_v14 = vmax.f32 %v1907_v1, %v6732_v60 }
 0x1ac   : > { %4726 = vmatprep.mubr.msk.f32.mxu1 %vm8747_vm7, %v2510_v17  ;;  %v2511_v26 = vmax.f32 %v2383_v29, %v2436_v41  ;;  %v1909_v54 = vmax.f32 %v6688_v28, %v6732_v60  ;;  %vm8748_vm3 = vmmov %vm8747_vm7  ;;  %vm8749_vm0 = vnez %v8486_v10  ;;  %vm8750_vm1 = vcmp.lt.s32.totalorder %v4975_v3, 7 }
 0x1ad   : > { %v1938_v62 = vmax.f32 %v1906_v2, %v6744_v49  ;;  %vm8751_vm8 = vcmp.lt.s32.totalorder %v4975_v3, 1  ;;  %vm8752_vm7 = vcmp.lt.s32.totalorder %v4975_v3, 6 }
 0x1ae   : > { %v4681_v46 = vpop.f32.mrf.mxu0  ;;  %4727 = vmatmul.mubr.msk.f32.gmra.mxu1 %vm8748_vm3, %v2511_v26  ;;  %vm8753_vm3 = vcmp.lt.s32.totalorder %v4975_v3, 2 }
 0x1af   : > { %v6793_v24 = vsel %vm8745_vm9, %v4681_v46, -1e+30 }
 0x1b0   : > { %v1777_v4 = vpop.f32.mrf.mxu0  ;;  %v2001_v8 = vmax.f32 %v1969_v34, %v6793_v24  ;;  %v1971_v56 = vmax.f32 %v1939_v14, %v6793_v24  ;;  %v1941_v46 = vmax.f32 %v1909_v54, %v6793_v24 }
 0x1b1   : > { %v6805_v63 = vsel %vm8745_vm9, %v1777_v4, -1e+30  ;;  %v1908_v4 = vmax.f32 %v6708_v38, %v6744_v49  ;;  %vm8757_vm9 = vcmp.lt.s32.totalorder %v4997_v12, 15 }
 0x1b2   : > { %v2000_v18 = vmax.f32 %v1968_v61, %v6805_v63  ;;  %v2037_v13 = vrot.slane %v2001_v8, 1  ;;  %v2293_v44 = vrot.slane %v2001_v8, 7  ;;  %v1970_v42 = vmax.f32 %v1938_v62, %v6805_v63 }
 0x1b3   : > { %v2165_v34 = vrot.slane %v2001_v8, 2  ;;  %v2421_v61 = vrot.slane %v2001_v8, 6 }
 0x1b4   : > { %v2021_v11 = vrot.slane %v2000_v18, 1  ;;  %v2149_v27 = vrot.slane %v2000_v18, 2  ;;  %v2277_v53 = vrot.slane %v2000_v18, 7  ;;  %v2405_v35 = vrot.slane %v2000_v18, 6 }
 0x1b5   : > { %v4684_v51 = vpop.f32.mrf.mxu0 }
 0x1b6   : > { %v6817_v55 = vsel %vm8749_vm0, %v4684_v51, -1e+30  ;;  %v2053_v29 = vsel %vm8750_vm1, %v2021_v11, %v2037_v13  ;;  %v2325_v1 = vsel %vm8751_vm8, %v2293_v44, %v2277_v53  ;;  %v2181_v2 = vsel %vm8752_vm7, %v2149_v27, %v2165_v34 }
 0x1b7   : > { %v6821_v28 = vmax.f32 %v1971_v56, %v6817_v55  ;;  %v1787_v47 = vpop.f32.mrf.mxu0  ;;  %v1973_v41 = vmax.f32 %v1941_v46, %v6817_v55  ;;  %v2128_v54 = vmax.f32 %v2000_v18, %v2053_v29  ;;  %v2453_v62 = vsel %vm8753_vm3, %v2421_v61, %v2405_v35 }
 0x1b8   : > { %v6826_v17 = vsel %vm8749_vm0, %v1787_v47, -1e+30  ;;  %vm8754_vm1 = vcmp.ge.s32.totalorder %v4975_v3, 1  ;;  %vm8755_vm8 = vcmp.ge.s32.totalorder %v4975_v3, 2  ;;  %vm8756_vm0 = vcmp.lt.s32.totalorder %v4975_v3, 7 }
 0x1b9   : > { %v2038_v26 = vrot.slane %v6821_v28, 1  ;;  %v6839_v14 = vmax.f32 %v1970_v42, %v6826_v17  ;;  %v2352_v51 = vsel %vm8754_vm1, %v2325_v1, -1e+30  ;;  %v2480_v38 = vsel %vm8755_vm8, %v2453_v62, -1e+30 }
 0x1ba   : > { %v2069_v56 = vsel %vm8756_vm0, %v2037_v13, %v2021_v11  ;;  %v2197_v46 = vsel %vm8752_vm7, %v2165_v34, %v2149_v27  ;;  %v2256_v42 = vmax.f32 %v2128_v54, %v2181_v2  ;;  %vm8758_vm3 = vcmp.lt.s32.totalorder %v4975_v3, 1 }
 0x1bb   : > { %v2022_v47 = vrot.slane %v6839_v14, 1  ;;  %v2097_v18 = vsel %vm8757_vm9, %v2069_v56, -1e+30  ;;  %v2309_v29 = vsel %vm8758_vm3, %v2277_v53, %v2293_v44  ;;  %vm8759_vm1 = vcmp.lt.s32.totalorder %v4997_v12, 14  ;;  %vm8760_vm9 = vmmov %vm8752_vm7 }
 0x1bc   : > { %v2129_v10 = vmax.f32 %v2001_v8, %v2097_v18  ;;  %v2225_v1 = vsel %vm8759_vm1, %v2197_v46, -1e+30  ;;  %v2150_v62 = vrot.slane %v6839_v14, 2  ;;  %v2166_v11 = vrot.slane %v6821_v28, 2  ;;  %vm8761_vm8 = vmmov %vm8758_vm3 }
 0x1bd   : > { %v2384_v13 = vmax.f32 %v2256_v42, %v2352_v51  ;;  %v2054_v27 = vsel %vm8756_vm0, %v2022_v47, %v2038_v26  ;;  %v2278_v34 = vrot.slane %v6839_v14, 7  ;;  %v2294_v2 = vrot.slane %v6821_v28, 7  ;;  %vm8762_vm7 = vmmov %vm8756_vm0 }
 0x1be   : > { %v2257_v54 = vmax.f32 %v2129_v10, %v2225_v1  ;;  %v2130_v56 = vmax.f32 %v6839_v14, %v2054_v27  ;;  %v2182_v8 = vsel %vm8760_vm9, %v2150_v62, %v2166_v11  ;;  %v2406_v53 = vrot.slane %v6839_v14, 6 }
 0x1bf   : > { %v2512_v44 = vmax.f32 %v2384_v13, %v2480_v38  ;;  %v2326_v46 = vsel %vm8761_vm8, %v2294_v2, %v2278_v34  ;;  %v2422_v51 = vrot.slane %v6821_v28, 6  ;;  %v2070_v42 = vsel %vm8762_vm7, %v2038_v26, %v2022_v47 }
 0x1c0   : > { %v2385_v18 = vmax.f32 %v2257_v54, %v2309_v29  ;;  %vm8763_vm3 = vcmp.lt.s32.totalorder %v4975_v3, 2  ;;  %v2258_v1 = vmax.f32 %v2130_v56, %v2182_v8  ;;  %vm8764_vm1 = vcmp.lt.s32.totalorder %v4997_v12, 15 }
 0x1c1   : > { %v2437_v10 = vsel %vm8763_vm3, %v2405_v35, %v2421_v61  ;;  %v2099_v27 = vsel %vm8764_vm1, %v2070_v42, -1e+30  ;;  %vm8765_vm0 = vcmask 31744   ;;  %vm8766_vm9 = vcmp.ge.s32.totalorder %v4975_v3, 1  ;;  %vm8767_vm8 = vmmov %vm8763_vm3 }
 0x1c2   : > { %4729 = vmatprep.mubr.msk.f32.mxu1 %vm8765_vm0, %v2512_v44  ;;  %v2354_v14 = vsel %vm8766_vm9, %v2326_v46, -1e+30  ;;  %v2454_v38 = vsel %vm8767_vm8, %v2422_v51, %v2406_v53  ;;  %v2131_v13 = vmax.f32 %v6821_v28, %v2099_v27  ;;  %vm8768_vm7 = vcmp.lt.s32.totalorder %v4975_v3, 6 }
 0x1c3   : > { %v2198_v26 = vsel %vm8768_vm7, %v2166_v11, %v2150_v62  ;;  %v1940_v35 = vmax.f32 %v1908_v4, %v6805_v63  ;;  %vm8769_vm3 = vnez %v8503_v0  ;;  %v2513_v47 = vmax.f32 %v2385_v18, %v2437_v10 }
 0x1c4   : > { %v4687_v45 = vpop.f32.mrf.mxu0  ;;  %v2386_v29 = vmax.f32 %v2258_v1, %v2354_v14  ;;  %v1911_v54 = vmax.f32 %v6732_v60, %v6793_v24  ;;  %vm8770_vm1 = vcmp.ge.s32.totalorder %v4975_v3, 2  ;;  %vm8771_vm0 = vcmp.lt.s32.totalorder %v4997_v12, 14 }
 0x1c5   : > { %v1877_v61 = vsel %vm8769_vm3, %v4687_v45, -1e+30  ;;  %v2482_v44 = vsel %vm8770_vm1, %v2454_v38, -1e+30  ;;  %v2227_v28 = vsel %vm8771_vm0, %v2198_v26, -1e+30  ;;  %v1972_v62 = vmax.f32 %v1940_v35, %v6826_v17 }
 0x1c6   : > { %v6890_v56 = vmax.f32 %v1973_v41, %v1877_v61  ;;  %v1797_v8 = vpop.f32.mrf.mxu0  ;;  %vm8772_vm9 = vcmask 31744   ;;  %v2514_v45 = vmax.f32 %v2386_v29, %v2482_v44  ;;  %v2259_v11 = vmax.f32 %v2131_v13, %v2227_v28 }
 0x1c7   : > { %v1876_v4 = vsel %vm8769_vm3, %v1797_v8, -1e+30  ;;  %4730 = vmatmul.mubr.msk.f32.gmra.mxu1 %vm8772_vm9, %v2513_v47  ;;  %v1910_v60 = vmax.f32 %v6744_v49, %v6805_v63  ;;  %vm8773_vm8 = vcmp.lt.s32.totalorder %v4975_v3, 1  ;;  %v1913_v46 = vmax.f32 %v6793_v24, %v6817_v55  ;;  %vm8774_vm7 = vmmov %vm8772_vm9 }
 0x1c8   : > { %v2310_v41 = vsel %vm8773_vm8, %v2278_v34, %v2294_v2  ;;  %v1943_v42 = vmax.f32 %v1911_v54, %v6817_v55  ;;  %v2004_v18 = vmax.f32 %v1972_v62, %v1876_v4  ;;  %4732 = vmatprep.mubr.msk.f32.mxu1 %vm8774_vm7, %v2514_v45  ;;  %v1912_v1 = vmax.f32 %v6805_v63, %v6826_v17  ;;  %vm8776_vm0 = vmmov %vm8774_vm7 }
 0x1c9   : > { %v2387_v10 = vmax.f32 %v2259_v11, %v2310_v41  ;;  %v1942_v27 = vmax.f32 %v1910_v60, %v6826_v17  ;;  %v2039_v14 = vrot.slane %v6890_v56, 1  ;;  %vm8775_vm1 = vcmp.lt.s32.totalorder %v4975_v3, 2 }
 0x1ca   : > { %v2438_v49 = vsel %vm8775_vm1, %v2406_v53, %v2422_v51  ;;  %v2023_v34 = vrot.slane %v2004_v18, 1  ;;  %v2151_v2 = vrot.slane %v2004_v18, 2  ;;  %v2279_v38 = vrot.slane %v2004_v18, 7 }
 0x1cb   : > { %v2515_v24 = vmax.f32 %v2387_v10, %v2438_v49  ;;  %v1945_v13 = vmax.f32 %v1913_v46, %v1877_v61  ;;  %v1975_v55 = vmax.f32 %v1943_v42, %v1877_v61  ;;  %v2295_v26 = vrot.slane %v6890_v56, 7 }
 0x1cc   : > { %v2407_v35 = vrot.slane %v2004_v18, 6  ;;  %v2167_v47 = vrot.slane %v6890_v56, 2  ;;  %vm8777_vm9 = vcmp.lt.s32.totalorder %v4975_v3, 7  ;;  %v2423_v17 = vrot.slane %v6890_v56, 6 }
 0x1cd   : > { %4733 = vmatmul.mubr.msk.f32.gmra.mxu1 %vm8776_vm0, %v2515_v24  ;;  %v2055_v63 = vsel %vm8777_vm9, %v2023_v34, %v2039_v14  ;;  %vm8778_vm8 = vmmov %vm8777_vm9  ;;  %v1974_v51 = vmax.f32 %v1942_v27, %v1876_v4  ;;  %vm8779_vm7 = vnez %v8517_v33  ;;  %vm8780_vm1 = vcmp.lt.s32.totalorder %v4975_v3, 1 }
 0x1ce   : > { %v4690_v29 = vpop.f32.mrf.mxu0  ;;  %v2071_v53 = vsel %vm8778_vm8, %v2039_v14, %v2023_v34  ;;  %v2132_v54 = vmax.f32 %v2004_v18, %v2055_v63  ;;  %v2327_v8 = vsel %vm8780_vm1, %v2295_v26, %v2279_v38  ;;  %vm8781_vm0 = vcmp.lt.s32.totalorder %v4975_v3, 6 }
 0x1cf   : > { %v1879_v61 = vsel %vm8779_vm7, %v4690_v29, -1e+30  ;;  %v2183_v62 = vsel %vm8781_vm0, %v2151_v2, %v2167_v47  ;;  %vm8782_vm9 = vcmp.lt.s32.totalorder %v4975_v3, 2  ;;  %vm8783_vm3 = vcmp.lt.s32.totalorder %v4997_v12, 15  ;;  %vm8784_vm8 = vmmov %vm8781_vm0 }
 0x1d0   : > { %v6926_v44 = vmax.f32 %v1975_v55, %v1879_v61  ;;  %v1807_v28 = vpop.f32.mrf.mxu0  ;;  %v2455_v45 = vsel %vm8782_vm9, %v2423_v17, %v2407_v35  ;;  %v2101_v11 = vsel %vm8783_vm3, %v2071_v53, -1e+30  ;;  %v2260_v41 = vmax.f32 %v2132_v54, %v2183_v62 }
 0x1d1   : > { %v1878_v60 = vsel %vm8779_vm7, %v1807_v28, -1e+30  ;;  %v2133_v46 = vmax.f32 %v6890_v56, %v2101_v11  ;;  %v2199_v42 = vsel %vm8784_vm8, %v2167_v47, %v2151_v2  ;;  %v1944_v18 = vmax.f32 %v1912_v1, %v1876_v4 }
 0x1d2   : > { %vm8785_vm1 = vcmp.ge.s32.totalorder %v4975_v3, 1  ;;  %v1977_v27 = vmax.f32 %v1945_v13, %v1879_v61  ;;  %v2006_v14 = vmax.f32 %v1974_v51, %v1878_v60  ;;  %vm8786_vm0 = vcmp.lt.s32.totalorder %v4997_v12, 14 }
 0x1d3   : > { %v2356_v10 = vsel %vm8785_vm1, %v2327_v8, -1e+30  ;;  %v2229_v34 = vsel %vm8786_vm0, %v2199_v42, -1e+30  ;;  %v2040_v24 = vrot.slane %v6926_v44, 1  ;;  %vm8787_vm3 = vcmp.ge.s32.totalorder %v4975_v3, 2 }
 0x1d4   : > { %v2388_v49 = vmax.f32 %v2260_v41, %v2356_v10  ;;  %v2484_v33 = vsel %vm8787_vm3, %v2455_v45, -1e+30  ;;  %v2261_v55 = vmax.f32 %v2133_v46, %v2229_v34  ;;  %vm8788_vm7 = vcmp.lt.s32.totalorder %v4975_v3, 1 }
 0x1d5   : > { %v2311_v56 = vsel %vm8788_vm7, %v2279_v38, %v2295_v26  ;;  %v2024_v2 = vrot.slane %v2006_v14, 1  ;;  %v2152_v4 = vrot.slane %v2006_v14, 2  ;;  %v2280_v1 = vrot.slane %v2006_v14, 7 }
 0x1d6   : > { %v2516_v47 = vmax.f32 %v2388_v49, %v2484_v33  ;;  %v2168_v13 = vrot.slane %v6926_v44, 2  ;;  %v2296_v29 = vrot.slane %v6926_v44, 7  ;;  %v2389_v63 = vmax.f32 %v2261_v55, %v2311_v56 }
 0x1d7   : > { %v2408_v53 = vrot.slane %v2006_v14, 6  ;;  %v1976_v51 = vmax.f32 %v1944_v18, %v1878_v60  ;;  %vm8789_vm9 = vcmask 31744   ;;  %vm8790_vm8 = vcmp.lt.s32.totalorder %v4975_v3, 2 }
 0x1d8   : > { %4735 = vmatprep.mubr.msk.f32.mxu1 %vm8789_vm9, %v2516_v47  ;;  %v2439_v61 = vsel %vm8790_vm8, %v2407_v35, %v2423_v17  ;;  %vm8791_vm1 = vcmp.lt.s32.totalorder %v4975_v3, 7  ;;  %v4693_v26 = vpop.f32.mrf.mxu0  ;;  %vm8793_vm3 = vcmp.lt.s32.totalorder %v4975_v3, 6  ;;  %v2424_v45 = vrot.slane %v6926_v44, 6 }
 0x1d9   : > { %v2056_v54 = vsel %vm8791_vm1, %v2024_v2, %v2040_v24  ;;  %vm8792_vm0 = vmmov %vm8791_vm1  ;;  %v2517_v8 = vmax.f32 %v2389_v63, %v2439_v61  ;;  %v2184_v62 = vsel %vm8793_vm3, %v2152_v4, %v2168_v13  ;;  %vm8794_vm7 = vnez %v8547_v9 }
 0x1da   : > { %v2072_v38 = vsel %vm8792_vm0, %v2040_v24, %v2024_v2  ;;  %v2134_v28 = vmax.f32 %v2006_v14, %v2056_v54  ;;  %v1881_v11 = vsel %vm8794_vm7, %v4693_v26, -1e+30  ;;  %vm8795_vm9 = vcmp.lt.s32.totalorder %v4975_v3, 1  ;;  %vm8797_vm1 = vmmov %vm8793_vm3  ;;  %v1817_v46 = vpop.f32.mrf.mxu0 }
 0x1db   : > { %v2328_v35 = vsel %vm8795_vm9, %v2296_v29, %v2280_v1  ;;  %vm8796_vm8 = vcmp.lt.s32.totalorder %v4997_v12, 15  ;;  %v2200_v60 = vsel %vm8797_vm1, %v2168_v13, %v2152_v4  ;;  %v2009_v41 = vmax.f32 %v1977_v27, %v1881_v11 }
 0x1dc   : > { %v2103_v17 = vsel %vm8796_vm8, %v2072_v38, -1e+30  ;;  %vm8798_vm0 = vcmask 31744   ;;  %v2262_v42 = vmax.f32 %v2134_v28, %v2184_v62  ;;  %vm8799_vm3 = vcmp.lt.s32.totalorder %v4975_v3, 2 }
 0x1dd   : > { %4736 = vmatmul.mubr.msk.f32.gmra.mxu1 %vm8798_vm0, %v2517_v8  ;;  %v2456_v18 = vsel %vm8799_vm3, %v2424_v45, %v2408_v53  ;;  %v2135_v10 = vmax.f32 %v6926_v44, %v2103_v17  ;;  %v1880_v14 = vsel %vm8794_vm7, %v1817_v46, -1e+30  ;;  %vm8800_vm9 = vcmp.ge.s32.totalorder %v4975_v3, 1  ;;  %vm8804_vm7 = vmmov %vm8799_vm3 }
 0x1de   : > { %v2008_v49 = vmax.f32 %v1976_v51, %v1880_v14  ;;  %v2358_v34 = vsel %vm8800_vm9, %v2328_v35, -1e+30  ;;  %vm8801_vm8 = vcmp.lt.s32.totalorder %v4997_v12, 14  ;;  %vm8802_vm1 = vcmp.ge.s32.totalorder %v4975_v3, 2 }
 0x1df   : > { %v2231_v24 = vsel %vm8801_vm8, %v2200_v60, -1e+30  ;;  %v2390_v27 = vmax.f32 %v2262_v42, %v2358_v34  ;;  %v2486_v33 = vsel %vm8802_vm1, %v2456_v18, -1e+30  ;;  %vm8803_vm0 = vcmp.lt.s32.totalorder %v4975_v3, 1 }
 0x1e0   : > { %v2263_v55 = vmax.f32 %v2135_v10, %v2231_v24  ;;  %v2312_v56 = vsel %vm8803_vm0, %v2280_v1, %v2296_v29  ;;  %v2041_v2 = vrot.slane %v2009_v41, 1  ;;  %v2025_v44 = vrot.slane %v2008_v49, 1  ;;  %vm8807_vm8 = vmmov %vm8803_vm0 }
 0x1e1   : > { %v2153_v4 = vrot.slane %v2008_v49, 2  ;;  %v2281_v9 = vrot.slane %v2008_v49, 7  ;;  %v2297_v47 = vrot.slane %v2009_v41, 7  ;;  %v2518_v13 = vmax.f32 %v2390_v27, %v2486_v33 }
 0x1e2   : > { %v2391_v63 = vmax.f32 %v2263_v55, %v2312_v56  ;;  %v2409_v51 = vrot.slane %v2008_v49, 6  ;;  %v2169_v61 = vrot.slane %v2009_v41, 2  ;;  %v2440_v54 = vsel %vm8804_vm7, %v2408_v53, %v2424_v45 }
 0x1e3   : > { %vm8805_vm3 = vcmp.lt.s32.totalorder %v4975_v3, 7  ;;  %vm8806_vm9 = vcmask 31744   ;;  %v2329_v1 = vsel %vm8807_vm8, %v2297_v47, %v2281_v9  ;;  %v2425_v29 = vrot.slane %v2009_v41, 6 }
 0x1e4   : > { %v2057_v38 = vsel %vm8805_vm3, %v2025_v44, %v2041_v2  ;;  %4738 = vmatprep.mubr.msk.f32.mxu1 %vm8806_vm9, %v2518_v13  ;;  %v2519_v26 = vmax.f32 %v2391_v63, %v2440_v54  ;;  %vm8808_vm1 = vcmp.lt.s32.totalorder %v4975_v3, 6  ;;  %vm8809_vm0 = vmmov %vm8805_vm3  ;;  %vm8812_vm3 = vcmp.lt.s32.totalorder %v4975_v3, 2 }
 0x1e5   : > { %v2136_v8 = vmax.f32 %v2008_v49, %v2057_v38  ;;  %v2185_v28 = vsel %vm8808_vm1, %v2153_v4, %v2169_v61  ;;  %v2073_v62 = vsel %vm8809_vm0, %v2041_v2, %v2025_v44  ;;  %vm8810_vm14 = vmmov %vm8808_vm1  ;;  %v2457_v11 = vsel %vm8812_vm3, %v2425_v29, %v2409_v51 }
 0x1e6   : > { %v2201_v53 = vsel %vm8810_vm14, %v2169_v61, %v2153_v4  ;;  %vm8811_vm7 = vmmov %vm8806_vm9  ;;  %vm8813_vm9 = vcmp.lt.s32.totalorder %v4997_v12, 15  ;;  %vm8814_vm8 = vcmp.ge.s32.totalorder %v4975_v3, 1  ;;  %vm8815_vm1 = vcmp.lt.s32.totalorder %v4997_v12, 14 }
 0x1e7   : > { %4739 = vmatmul.mubr.msk.f32.gmra.mxu1 %vm8811_vm7, %v2519_v26  ;;  %v2264_v45 = vmax.f32 %v2136_v8, %v2185_v28  ;;  %v2105_v35 = vsel %vm8813_vm9, %v2073_v62, -1e+30  ;;  %v2360_v17 = vsel %vm8814_vm8, %v2329_v1, -1e+30  ;;  %v2233_v42 = vsel %vm8815_vm1, %v2201_v53, -1e+30  ;;  %vm8818_vm9 = vmmov %vm8811_vm7 }
 0x1e8   : > { %v2137_v60 = vmax.f32 %v2009_v41, %v2105_v35  ;;  %vm8816_vm0 = vcmp.ge.s32.totalorder %v4975_v3, 2  ;;  %vm8817_vm14 = vcmp.lt.s32.totalorder %v4975_v3, 1  ;;  %v2441_v24 = vsel %vm8812_vm3, %v2409_v51, %v2425_v29  ;;  %v4848_v1 = vld [vmem:[%s5226_s14 + $0x8] sm:$0xff] }
 0x1e9   : > { %v2392_v46 = vmax.f32 %v2264_v45, %v2360_v17  ;;  %v2488_v18 = vsel %vm8816_vm0, %v2457_v11, -1e+30  ;;  %v2313_v49 = vsel %vm8817_vm14, %v2281_v9, %v2297_v47  ;;  %v1827_v29 = vadd.f32 %v4848_v1, %v6253_v15  ;;  %v4849_v45 = vld [vmem:[%s5226_s14] sm:$0xff]  ;;  %v4496_v17 = vld [vmem:[%s8282_s3 + $0xc] sm:$0xf] }
 0x1ea   : > { %v2265_v10 = vmax.f32 %v2137_v60, %v2233_v42  ;;  %v1826_v11 = vadd.f32 %v4849_v45, %v6267_v5  ;;  %vm8821_vm8 = vcmp.lt.s32.totalorder %v4975_v3, 7  ;;  %vm8823_vm0 = vcmp.lt.s32.totalorder %v4975_v3, 6 }
 0x1eb   : > { %v2520_v14 = vmax.f32 %v2392_v46, %v2488_v18  ;;  %vm8822_vm1 = vmmov %vm8821_vm8  ;;  %vm8824_vm14 = vcmp.lt.s32.totalorder %v4997_v12, 15  ;;  %vm8826_vm3 = vcmp.lt.s32.totalorder %v4975_v3, 1 }
 0x1ec   : > { %v2393_v34 = vmax.f32 %v2265_v10, %v2313_v49  ;;  %v4698_v41 = vpop.f32.mrf.mxu1  ;;  %v4850_v10 = vld [vmem:[%s5226_s14 + $0x18] sm:$0xff] }
 0x1ed   : > { %4741 = vmatprep.mubr.msk.f32.mxu1 %vm8811_vm7, %v2520_v14  ;;  %v2865_v47 = vsel %vm5034_vm4, %v4698_v41, -1e+30  ;;  %v1829_v14 = vadd.f32 %v4850_v10, %v6317_v40  ;;  %vm8825_vm7 = vmmov %vm8823_vm0 }
 0x1ee   : > { %v2521_v27 = vmax.f32 %v2393_v34, %v2441_v24  ;;  %v2689_v33 = vpop.f32.mrf.mxu1  ;;  %v4851_v34 = vld [vmem:[%s5226_s14 + $0x10] sm:$0xff] }
 0x1ef   : > { %v2864_v54 = vsel %vm5034_vm4, %v2689_v33, -1e+30  ;;  %vm8819_vm4 = vcmask 1043456   ;;  %v1828_v24 = vadd.f32 %v4851_v34, %v6330_v31  ;;  %v4853_v33 = vld [vmem:[%s5226_s14 + $0x20] sm:$0xff] }
 0x1f0   : > { %4742 = vmatmul.mubr.msk.f32.gmra.mxu1 %vm8818_vm9, %v2521_v27  ;;  %4782 = vmatprep.subr.msk.mxu0 %vm8819_vm4, %v4496_v17  ;;  %v4852_v27 = vld [vmem:[%s5226_s14 + $0x28] sm:$0xff]  ;;  %vm8827_vm9 = vcmp.lt.s32.totalorder %v4997_v12, 14 }
 0x1f1   : > { %v7069_v41 = vadd.f32 %v4852_v27, %v6349_v16 }
 0x1fa   : > { %v4701_v55 = vpop.f32.mrf.mxu1 }
 0x1fb   : > { %v2867_v9 = vsel %vm5066_vm11, %v4701_v55, -1e+30  ;;  %v7073_v55 = vadd.f32 %v4853_v33, %v6360_v21 }
 0x1fc   : > { %v2699_v56 = vpop.f32.mrf.mxu1  ;;  %v2897_v51 = vmax.f32 %v2865_v47, %v2867_v9 }
 0x1fd   : > { %v2866_v13 = vsel %vm5066_vm11, %v2699_v56, -1e+30  ;;  %vm8820_vm11 = vmmov %vm8819_vm4  ;;  %vm8828_vm4 = vcmp.lt.s32.totalorder %v4975_v3, 2 }
 0x1fe   : > { %v2896_v43 = vmax.f32 %v2864_v54, %v2866_v13  ;;  %4783 = vmatpush3.msk.msra.mxu0 %vm8820_vm11, %v4496_v17  ;;  %vm8829_vm11 = vcmp.ge.s32.totalorder %v4975_v3, 1 }
 0x205   : > { %v4704_v2 = vpop.f32.mrf.mxu1 }
 0x206   : > { %v7020_v63 = vsel %vm5092_vm15, %v4704_v2, -1e+30 }
 0x207   : > { %v2709_v44 = vpop.f32.mrf.mxu1  ;;  %v2921_v8 = vmax.f32 %v2897_v51, %v7020_v63  ;;  %v4854_v51 = vld [vmem:[%s5226_s14 + $0x38] sm:$0xff]  ;;  %v2899_v16 = vmax.f32 %v2867_v9, %v7020_v63 }
 0x208   : > { %v7026_v38 = vsel %vm5092_vm15, %v2709_v44, -1e+30  ;;  %v7077_v40 = vadd.f32 %v4854_v51, %v6424_v23 }
 0x209   : > { %v2920_v32 = vmax.f32 %v2896_v43, %v7026_v38  ;;  %v2898_v23 = vmax.f32 %v2866_v13, %v7026_v38 }
 0x21a   : > { %v4707_v4 = vpop.f32.mrf.mxu1 }
 0x21b   : > { %v7030_v26 = vsel %vm5204_vm10, %v4707_v4, -1e+30 }
 0x21c   : > { %v2719_v61 = vpop.f32.mrf.mxu1  ;;  %v2945_v62 = vmax.f32 %v2921_v8, %v7030_v26 }
 0x21d   : > { %v7037_v28 = vsel %vm5204_vm10, %v2719_v61, -1e+30  ;;  %v4855_v61 = vld [vmem:[%s5226_s14 + $0x30] sm:$0xff] }
 0x21e   : > { %v2944_v60 = vmax.f32 %v2920_v32, %v7037_v28  ;;  %v7081_v31 = vadd.f32 %v4855_v61, %v6442_v36 }
 0x223   : > { %v4710_v53 = vpop.f32.mrf.mxu1 }
 0x224   : > { %v7043_v35 = vadd.f32 %v4710_v53, %v1827_v29  ;;  %v7047_v15 = vsel %vm5255_vm13, %v4710_v53, -1e+30  ;;  %v2923_v29 = vmax.f32 %v2899_v16, %v7030_v26  ;;  %v4856_v16 = vld [vmem:[%s5226_s14 + $0x48] sm:$0xff] }
 0x225   : > { %v2969_v46 = vmax.f32 %v2945_v62, %v7047_v15  ;;  %v2729_v42 = vpop.f32.mrf.mxu1 }
 0x226   : > { %v7055_v5 = vadd.f32 %v2729_v42, %v1826_v11  ;;  %v7059_v18 = vsel %vm5255_vm13, %v2729_v42, -1e+30  ;;  %v2922_v11 = vmax.f32 %v2898_v23, %v7037_v28  ;;  %v2947_v17 = vmax.f32 %v2923_v29, %v7047_v15  ;;  %v4858_v23 = vld [vmem:[%s5226_s14 + $0x58] sm:$0xff] }
 0x227   : > { %v2968_v49 = vmax.f32 %v2944_v60, %v7059_v18  ;;  %v3004_v56 = vrot.slane %v2969_v46, 1  ;;  %v3100_v4 = vrot.slane %v2969_v46, 2  ;;  %v3196_v54 = vrot.slane %v2969_v46, 7 }
 0x228   : > { %v3292_v53 = vrot.slane %v2969_v46, 6  ;;  %v2946_v27 = vmax.f32 %v2922_v11, %v7059_v18  ;;  %v7139_v29 = vadd.f32 %v4858_v23, %v6544_v30  ;;  %v2901_v11 = vmax.f32 %v7020_v63, %v7030_v26 }
 0x229   : > { %v2992_v2 = vrot.slane %v2968_v49, 1  ;;  %v3088_v44 = vrot.slane %v2968_v49, 2  ;;  %v3184_v47 = vrot.slane %v2968_v49, 7  ;;  %v3280_v1 = vrot.slane %v2968_v49, 6 }
 0x22b   : > { %v3016_v21 = vsel %vm8821_vm8, %v2992_v2, %v3004_v56  ;;  %v3028_v43 = vsel %vm8822_vm1, %v3004_v56, %v2992_v2  ;;  %v3124_v8 = vsel %vm8823_vm0, %v3100_v4, %v3088_v44  ;;  %v3112_v9 = vsel %vm8825_vm7, %v3088_v44, %v3100_v4  ;;  %vm8830_vm8 = vmmov %vm8826_vm3 }
 0x22c   : > { %v3064_v32 = vmax.f32 %v2968_v49, %v3016_v21  ;;  %v3041_v36 = vsel %vm8824_vm14, %v3028_v43, -1e+30  ;;  %v3220_v62 = vsel %vm8826_vm3, %v3196_v54, %v3184_v47  ;;  %v3137_v42 = vsel %vm8827_vm9, %v3124_v8, -1e+30  ;;  %vm8832_vm0 = vmmov %vm8828_vm4 }
 0x22d   : > { %v3065_v45 = vmax.f32 %v2969_v46, %v3041_v36  ;;  %v3316_v34 = vsel %vm8828_vm4, %v3292_v53, %v3280_v1  ;;  %v3208_v2 = vsel %vm8830_vm8, %v3184_v47, %v3196_v54  ;;  %v7126_v21 = vadd.f32 %v4856_v16, %v6482_v19 }
 0x22e   : > { %v3160_v13 = vmax.f32 %v3064_v32, %v3112_v9  ;;  %vm8831_vm1 = vcmp.ge.s32.totalorder %v4975_v3, 2  ;;  %v3304_v47 = vsel %vm8832_vm0, %v3280_v1, %v3292_v53  ;;  %v2900_v1 = vmax.f32 %v7026_v38, %v7037_v28 }
 0x22f   : > { %v3161_v46 = vmax.f32 %v3065_v45, %v3137_v42  ;;  %v3328_v8 = vsel %vm8831_vm1, %v3316_v34, -1e+30  ;;  %vm8833_vm14 = vcmask 31744   ;;  %vm8835_vm3 = vcmp.lt.s32.totalorder %v4975_v3, 7 }
 0x230   : > { %vm8834_vm7 = vmmov %vm8833_vm14  ;;  %v2925_v38 = vmax.f32 %v2901_v11, %v7047_v15  ;;  %vm8837_vm4 = vcmp.lt.s32.totalorder %v4997_v12, 15  ;;  %vm8840_vm0 = vcmp.lt.s32.totalorder %v4997_v12, 14 }
 0x231   : > { %v4713_v60 = vpop.f32.mrf.mxu1  ;;  %v3257_v61 = vmax.f32 %v3161_v46, %v3208_v2  ;;  %vm8836_vm9 = vmmov %vm8835_vm3 }
 0x232   : > { %v7102_v10 = vadd.f32 %v4713_v60, %v1829_v14  ;;  %v7106_v49 = vsel %vm5293_vm12, %v4713_v60, -1e+30  ;;  %v3232_v14 = vsel %vm8829_vm11, %v3220_v62, -1e+30  ;;  %vm8838_vm11 = vcmp.lt.s32.totalorder %v4975_v3, 6 }
 0x233   : > { %v7112_v33 = vmax.f32 %v2947_v17, %v7106_v49  ;;  %v2739_v56 = vpop.f32.mrf.mxu1  ;;  %v3256_v51 = vmax.f32 %v3160_v13, %v3232_v14  ;;  %v3353_v36 = vmax.f32 %v3257_v61, %v3304_v47  ;;  %vm8839_vm1 = vmmov %vm8838_vm11  ;;  %v2924_v14 = vmax.f32 %v2900_v1, %v7059_v18 }
 0x234   : > { %v7118_v44 = vadd.f32 %v2739_v56, %v1828_v24  ;;  %v7122_v4 = vsel %vm5293_vm12, %v2739_v56, -1e+30  ;;  %v4857_v24 = vld [vmem:[%s5226_s14 + $0x40] sm:$0xff]  ;;  %v2949_v2 = vmax.f32 %v2925_v38, %v7106_v49  ;;  %v2902_v1 = vmax.f32 %v7037_v28, %v7059_v18 }
 0x235   : > { %v2970_v43 = vmax.f32 %v2946_v27, %v7122_v4  ;;  %v7135_v54 = vadd.f32 %v4857_v24, %v6498_v59  ;;  %v3352_v32 = vmax.f32 %v3256_v51, %v3328_v8  ;;  %v3005_v9 = vrot.slane %v7112_v33, 1 }
 0x236   : > { %v2903_v59 = vmax.f32 %v7030_v26, %v7047_v15  ;;  %v3101_v30 = vrot.slane %v7112_v33, 2  ;;  %v3197_v17 = vrot.slane %v7112_v33, 7  ;;  %v3293_v26 = vrot.slane %v7112_v33, 6 }
 0x237   : > { %v2993_v19 = vrot.slane %v2970_v43, 1  ;;  %v3089_v62 = vrot.slane %v2970_v43, 2  ;;  %v3185_v45 = vrot.slane %v2970_v43, 7  ;;  %4746 = vmatprep.mubr.msk.f32.mxu1 %vm8833_vm14, %v3352_v32  ;;  %v3281_v60 = vrot.slane %v2970_v43, 6 }
 0x238   : > { %4747 = vmatmul.mubr.msk.f32.vlgmr.msra.gmra.mxu1 %vm8834_vm7, %v3353_v36  ;;  %vm8841_vm14 = vcmp.lt.s32.totalorder %v4975_v3, 2  ;;  %v2948_v24 = vmax.f32 %v2924_v14, %v7122_v4  ;;  %vm8842_vm7 = vcmp.ge.s32.totalorder %v4975_v3, 1 }
 0x239   : > { %v3017_v53 = vsel %vm8835_vm3, %v2993_v19, %v3005_v9  ;;  %v3029_v63 = vsel %vm8836_vm9, %v3005_v9, %v2993_v19  ;;  %v3113_v34 = vsel %vm8838_vm11, %v3089_v62, %v3101_v30  ;;  %v3221_v46 = vsel %vm8830_vm8, %v3197_v17, %v3185_v45  ;;  %vm8843_vm3 = vmmov %vm8830_vm8 }
 0x23a   : > { %v3066_v13 = vmax.f32 %v2970_v43, %v3017_v53  ;;  %v3043_v42 = vsel %vm8837_vm4, %v3029_v63, -1e+30  ;;  %v3125_v56 = vsel %vm8839_vm1, %v3101_v30, %v3089_v62  ;;  %v3234_v36 = vsel %vm8842_vm7, %v3221_v46, -1e+30  ;;  %vm8845_vm4 = vmmov %vm8841_vm14 }
 0x23b   : > { %v3067_v27 = vmax.f32 %v7112_v33, %v3043_v42  ;;  %v3139_v16 = vsel %vm8840_vm0, %v3125_v56, -1e+30  ;;  %v3317_v33 = vsel %vm8841_vm14, %v3293_v26, %v3281_v60  ;;  %vm8844_vm9 = vcmp.ge.s32.totalorder %v4975_v3, 2  ;;  %vm8851_vm7 = vmmov %vm8843_vm3 }
 0x23c   : > { %v4716_v51 = vpop.f32.mrf.mxu1  ;;  %v3162_v61 = vmax.f32 %v3066_v13, %v3113_v34  ;;  %v3330_v53 = vsel %vm8844_vm9, %v3317_v33, -1e+30  ;;  %v2904_v13 = vmax.f32 %v7059_v18, %v7122_v4  ;;  %v2926_v46 = vmax.f32 %v2902_v1, %v7122_v4  ;;  %vm8853_vm9 = vmmov %vm8845_vm4 }
 0x23d   : > { %v7172_v43 = vadd.f32 %v4716_v51, %v7069_v41  ;;  %v7176_v8 = vsel %vm8635_vm2, %v4716_v51, -1e+30  ;;  %v3163_v47 = vmax.f32 %v3067_v27, %v3139_v16  ;;  %v3209_v41 = vsel %vm8843_vm3, %v3185_v45, %v3197_v17 }
 0x23e   : > { %v7182_v23 = vmax.f32 %v2949_v2, %v7176_v8  ;;  %v2749_v32 = vpop.f32.mrf.mxu1  ;;  %v3258_v62 = vmax.f32 %v3162_v61, %v3234_v36  ;;  %v3305_v45 = vsel %vm8845_vm4, %v3281_v60, %v3293_v26  ;;  %v2927_v17 = vmax.f32 %v2903_v59, %v7106_v49 }
 0x23f   : > { %v7189_v19 = vadd.f32 %v2749_v32, %v7073_v55  ;;  %v7193_v9 = vsel %vm8635_vm2, %v2749_v32, -1e+30  ;;  %v3259_v11 = vmax.f32 %v3163_v47, %v3209_v41  ;;  %v2905_v55 = vmax.f32 %v7047_v15, %v7106_v49 }
 0x240   : > { %v2972_v30 = vmax.f32 %v2948_v24, %v7193_v9  ;;  %v3354_v63 = vmax.f32 %v3258_v62, %v3330_v53  ;;  %v3006_v28 = vrot.slane %v7182_v23, 1  ;;  %v2907_v27 = vmax.f32 %v7106_v49, %v7176_v8 }
 0x241   : > { %v3355_v38 = vmax.f32 %v3259_v11, %v3305_v45  ;;  %vm8846_vm11 = vcmask 31744   ;;  %v2951_v59 = vmax.f32 %v2927_v17, %v7176_v8  ;;  %vm8848_vm1 = vcmp.lt.s32.totalorder %v4975_v3, 7 }
 0x242   : > { %v2994_v42 = vrot.slane %v2972_v30, 1  ;;  %v3186_v34 = vrot.slane %v2972_v30, 7  ;;  %4749 = vmatprep.mubr.msk.f32.mxu1 %vm8846_vm11, %v3354_v63  ;;  %v3090_v60 = vrot.slane %v2972_v30, 2  ;;  %v3282_v15 = vrot.slane %v2972_v30, 6  ;;  %vm8847_vm8 = vmmov %vm8846_vm11 }
 0x243   : > { %4750 = vmatmul.mubr.msk.f32.gmra.mxu1 %vm8847_vm8, %v3355_v38  ;;  %v3198_v26 = vrot.slane %v7182_v23, 7  ;;  %vm8849_vm0 = vmmov %vm8848_vm1  ;;  %v3102_v51 = vrot.slane %v7182_v23, 2  ;;  %v3294_v61 = vrot.slane %v7182_v23, 6  ;;  %vm8850_vm14 = vcmp.lt.s32.totalorder %v4997_v12, 15 }
 0x244   : > { %v3018_v18 = vsel %vm8848_vm1, %v2994_v42, %v3006_v28  ;;  %v3030_v56 = vsel %vm8849_vm0, %v3006_v28, %v2994_v42  ;;  %v2950_v33 = vmax.f32 %v2926_v46, %v7193_v9  ;;  %vm8852_vm3 = vcmp.lt.s32.totalorder %v4975_v3, 6  ;;  %vm8858_vm0 = vmmov %vm8851_vm7 }
 0x245   : > { %v3068_v2 = vmax.f32 %v2972_v30, %v3018_v18  ;;  %v3045_v16 = vsel %vm8850_vm14, %v3030_v56, -1e+30  ;;  %v3222_v32 = vsel %vm8851_vm7, %v3198_v26, %v3186_v34  ;;  %v3114_v62 = vsel %vm8852_vm3, %v3090_v60, %v3102_v51  ;;  %vm8854_vm4 = vmmov %vm8852_vm3 }
 0x246   : > { %v3318_v11 = vsel %vm8853_vm9, %v3294_v61, %v3282_v15  ;;  %v3126_v45 = vsel %vm8854_vm4, %v3102_v51, %v3090_v60  ;;  %v2929_v17 = vmax.f32 %v2905_v55, %v7176_v8  ;;  %v2928_v63 = vmax.f32 %v2904_v13, %v7193_v9  ;;  %vm8859_vm14 = vmmov %vm8853_vm9 }
 0x247   : > { %v3164_v53 = vmax.f32 %v3068_v2, %v3114_v62  ;;  %vm8855_vm11 = vcmp.ge.s32.totalorder %v4975_v3, 1  ;;  %vm8856_vm8 = vcmp.ge.s32.totalorder %v4975_v3, 2  ;;  %vm8857_vm1 = vcmp.lt.s32.totalorder %v4997_v12, 14  ;;  %vm8862_vm9 = vmmov %vm8858_vm0 }
 0x248   : > { %v3332_v42 = vsel %vm8856_vm8, %v3318_v11, -1e+30  ;;  %v3141_v28 = vsel %vm8857_vm1, %v3126_v45, -1e+30  ;;  %v3210_v46 = vsel %vm8858_vm0, %v3186_v34, %v3198_v26  ;;  %v3306_v56 = vsel %vm8859_vm14, %v3282_v15, %v3294_v61  ;;  %vm8866_vm1 = vmmov %vm8859_vm14 }
 0x249   : > { %vm8860_vm7 = vcmp.lt.s32.totalorder %v4975_v3, 7  ;;  %vm8861_vm3 = vcmask 31744   ;;  %vm8865_vm8 = vcmp.lt.s32.totalorder %v4997_v12, 15  ;;  %vm8868_vm14 = vcmp.ge.s32.totalorder %v4975_v3, 1 }
 0x24a   : > { %vm8863_vm4 = vmmov %vm8860_vm7 }
 0x24b   : > { %v4719_v14 = vpop.f32.mrf.mxu1  ;;  %vm8867_vm0 = vmmov %vm8861_vm3 }
 0x24c   : > { %v7225_v47 = vadd.f32 %v4719_v14, %v7077_v40  ;;  %v7229_v24 = vsel %vm8654_vm6, %v4719_v14, -1e+30  ;;  %v3069_v40 = vmax.f32 %v7182_v23, %v3045_v16  ;;  %v3236_v23 = vsel %vm8855_vm11, %v3222_v32, -1e+30 }
 0x24d   : > { %v7234_v36 = vmax.f32 %v2951_v59, %v7229_v24  ;;  %v2759_v41 = vpop.f32.mrf.mxu1  ;;  %vm8864_vm11 = vcmp.lt.s32.totalorder %v4975_v3, 6 }
 0x24e   : > { %v7242_v1 = vadd.f32 %v2759_v41, %v7081_v31  ;;  %v7246_v30 = vsel %vm8654_vm6, %v2759_v41, -1e+30  ;;  %v3260_v31 = vmax.f32 %v3164_v53, %v3236_v23  ;;  %v3165_v60 = vmax.f32 %v3069_v40, %v3141_v28 }
 0x24f   : > { %v7253_v38 = vmax.f32 %v2950_v33, %v7246_v30  ;;  %v3007_v13 = vrot.slane %v7234_v36, 1  ;;  %v3199_v2 = vrot.slane %v7234_v36, 7  ;;  %v3103_v34 = vrot.slane %v7234_v36, 2 }
 0x250   : > { %v3356_v18 = vmax.f32 %v3260_v31, %v3332_v42  ;;  %v3261_v51 = vmax.f32 %v3165_v60, %v3210_v46  ;;  %v3295_v15 = vrot.slane %v7234_v36, 6  ;;  %v2953_v41 = vmax.f32 %v2929_v17, %v7229_v24 }
 0x251   : > { %v2995_v55 = vrot.slane %v7253_v38, 1  ;;  %v3091_v59 = vrot.slane %v7253_v38, 2  ;;  %v3187_v14 = vrot.slane %v7253_v38, 7  ;;  %v3283_v26 = vrot.slane %v7253_v38, 6 }
 0x252   : > { %4752 = vmatprep.mubr.msk.f32.mxu1 %vm8861_vm3, %v3356_v18  ;;  %v3357_v11 = vmax.f32 %v3261_v51, %v3306_v56  ;;  %v2906_v31 = vmax.f32 %v7122_v4, %v7193_v9  ;;  %v2952_v42 = vmax.f32 %v2928_v63, %v7246_v30  ;;  %v4859_v63 = vld [vmem:[%s5226_s14 + $0x50] sm:$0xff]  ;;  %v2931_v56 = vmax.f32 %v2907_v27, %v7229_v24  ;;  %vm8870_vm3 = vmmov %vm8864_vm11 }
 0x253   : > { %v3019_v16 = vsel %vm8860_vm7, %v2995_v55, %v3007_v13  ;;  %v3223_v32 = vsel %vm8862_vm9, %v3199_v2, %v3187_v14  ;;  %v3031_v61 = vsel %vm8863_vm4, %v3007_v13, %v2995_v55  ;;  %v3115_v40 = vsel %vm8864_vm11, %v3091_v59, %v3103_v34  ;;  %vm8872_vm4 = vmmov %vm8867_vm0 }
 0x254   : > { %v3070_v33 = vmax.f32 %v7253_v38, %v3019_v16  ;;  %v3047_v53 = vsel %vm8865_vm8, %v3031_v61, -1e+30  ;;  %v3319_v17 = vsel %vm8866_vm1, %v3295_v15, %v3283_v26  ;;  %4753 = vmatmul.mubr.msk.f32.gmra.mxu1 %vm8867_vm0, %v3357_v11  ;;  %v1836_v18 = vadd.f32 %v4859_v63, %v6562_v6  ;;  %v4860_v16 = vld [vmem:[%s5226_s14 + $0x68] sm:$0xff] }
 0x255   : > { %v3071_v4 = vmax.f32 %v7234_v36, %v3047_v53  ;;  %vm8869_vm7 = vcmp.ge.s32.totalorder %v4975_v3, 2  ;;  %v3127_v6 = vsel %vm8870_vm3, %v3103_v34, %v3091_v59  ;;  %vm8871_vm9 = vcmp.lt.s32.totalorder %v4997_v12, 14 }
 0x256   : > { %v3166_v23 = vmax.f32 %v3070_v33, %v3115_v40  ;;  %v1839_v33 = vadd.f32 %v4860_v16, %v6604_v22  ;;  %v3143_v49 = vsel %vm8871_vm9, %v3127_v6, -1e+30  ;;  %vm8873_vm11 = vcmp.lt.s32.totalorder %v4975_v3, 1 }
 0x257   : > { %v3167_v22 = vmax.f32 %v3071_v4, %v3143_v49  ;;  %v3211_v59 = vsel %vm8873_vm11, %v3187_v14, %v3199_v2  ;;  %vm8874_vm8 = vcmp.lt.s32.totalorder %v4975_v3, 7  ;;  %vm8875_vm1 = vnez %v8418_v25 }
 0x258   : > { %vm8876_vm0 = vcmp.lt.s32.totalorder %v4975_v3, 2  ;;  %vm8880_vm9 = vmmov %vm8874_vm8  ;;  %v2908_v6 = vmax.f32 %v7193_v9, %v7246_v30 }
 0x259   : > { %v3307_v2 = vsel %vm8876_vm0, %v3283_v26, %v3295_v15 }
 0x25b   : > { %v4722_v62 = vpop.f32.mrf.mxu1 }
 0x25c   : > { %v7287_v45 = vadd.f32 %v4722_v62, %v7126_v21  ;;  %v7291_v38 = vsel %vm8667_vm5, %v4722_v62, -1e+30  ;;  %v3238_v21 = vsel %vm8868_vm14, %v3223_v32, -1e+30  ;;  %v2930_v32 = vmax.f32 %v2906_v31, %v7246_v30  ;;  %vm8877_vm14 = vmmov %vm8873_vm11 }
 0x25d   : > { %v7299_v28 = vmax.f32 %v2953_v41, %v7291_v38  ;;  %v2769_v46 = vpop.f32.mrf.mxu1  ;;  %v3262_v13 = vmax.f32 %v3166_v23, %v3238_v21  ;;  %v2955_v61 = vmax.f32 %v2931_v56, %v7291_v38  ;;  %v3263_v31 = vmax.f32 %v3167_v22, %v3211_v59 }
 0x25e   : > { %v7305_v60 = vadd.f32 %v2769_v46, %v7135_v54  ;;  %v7309_v55 = vsel %vm8667_vm5, %v2769_v46, -1e+30  ;;  %v3334_v54 = vsel %vm8869_vm7, %v3319_v17, -1e+30  ;;  %vm8878_vm7 = vmmov %vm8870_vm3  ;;  %vm8882_vm11 = vcmask 31744  }
 0x25f   : > { %v7319_v51 = vmax.f32 %v2952_v42, %v7309_v55  ;;  %v3358_v36 = vmax.f32 %v3262_v13, %v3334_v54  ;;  %v3008_v41 = vrot.slane %v7299_v28, 1  ;;  %v2954_v62 = vmax.f32 %v2930_v32, %v7309_v55  ;;  %vm8879_vm3 = vmmov %vm8876_vm0 }
 0x260   : > { %v3200_v53 = vrot.slane %v7299_v28, 7  ;;  %v3104_v46 = vrot.slane %v7299_v28, 2  ;;  %v3296_v21 = vrot.slane %v7299_v28, 6  ;;  %v3359_v15 = vmax.f32 %v3263_v31, %v3307_v2  ;;  %vm8884_vm0 = vmmov %vm8878_vm7 }
 0x261   : > { %v2996_v27 = vrot.slane %v7319_v51, 1  ;;  %4755 = vmatprep.mubr.msk.f32.mxu1 %vm8872_vm4, %v3358_v36  ;;  %v3092_v11 = vrot.slane %v7319_v51, 2  ;;  %v3188_v40 = vrot.slane %v7319_v51, 7  ;;  %v3284_v23 = vrot.slane %v7319_v51, 6 }
 0x262   : > { %v2909_v36 = vmax.f32 %v7176_v8, %v7229_v24  ;;  %vm8881_vm4 = vcmp.ge.s32.totalorder %v4975_v3, 1  ;;  %4756 = vmatmul.mubr.msk.f32.gmra.mxu1 %vm8882_vm11, %v3359_v15 }
 0x263   : > { %v3020_v34 = vsel %vm8874_vm8, %v2996_v27, %v3008_v41  ;;  %v3224_v4 = vsel %vm8877_vm14, %v3200_v53, %v3188_v40  ;;  %v3032_v54 = vsel %vm8880_vm9, %v3008_v41, %v2996_v27  ;;  %vm8883_vm8 = vcmp.lt.s32.totalorder %v4997_v12, 15  ;;  %vm8889_vm9 = vmmov %vm8882_vm11 }
 0x264   : > { %v3072_v42 = vmax.f32 %v7319_v51, %v3020_v34  ;;  %v3116_v51 = vsel %vm8878_vm7, %v3092_v11, %v3104_v46  ;;  %v3240_v49 = vsel %vm8881_vm4, %v3224_v4, -1e+30  ;;  %v3049_v22 = vsel %vm8883_vm8, %v3032_v54, -1e+30 }
 0x265   : > { %v3128_v8 = vsel %vm8884_vm0, %v3104_v46, %v3092_v11  ;;  %v2933_v9 = vmax.f32 %v2909_v36, %v7291_v38  ;;  %vm8885_vm14 = vcmp.ge.s32.totalorder %v4975_v3, 2  ;;  %v3073_v34 = vmax.f32 %v7299_v28, %v3049_v22  ;;  %v8887_v46 = vld [vmem:[#allocation2_spill] sm:$0xff] }
 0x266   : > { %v3168_v32 = vmax.f32 %v3072_v42, %v3116_v51  ;;  %vm8886_vm7 = vcmp.lt.s32.totalorder %v4997_v12, 14  ;;  %vm8890_vm4 = vcmp.lt.s32.totalorder %v4975_v3, 1  ;;  %vm8891_vm11 = vcmp.lt.s32.totalorder %v4975_v3, 7 }
 0x267   : > { %v4725_v17 = vpop.f32.mrf.mxu1  ;;  %v3145_v31 = vsel %vm8886_vm7, %v3128_v8, -1e+30  ;;  %v3212_v15 = vsel %vm8890_vm4, %v3188_v40, %v3200_v53  ;;  %vm8892_vm8 = vcmp.lt.s32.totalorder %v4975_v3, 2  ;;  %vm8894_vm7 = vmmov %vm8889_vm9 }
 0x268   : > { %v7347_v13 = vadd.f32 %v4725_v17, %v7139_v29  ;;  %v7351_v14 = vsel %vm8875_vm1, %v4725_v17, -1e+30  ;;  %v3320_v29 = vsel %vm8879_vm3, %v3296_v21, %v3284_v23  ;;  %v3264_v41 = vmax.f32 %v3168_v32, %v3240_v49  ;;  %vm8896_vm4 = vmmov %vm8884_vm0 }
 0x269   : > { %v7358_v63 = vmax.f32 %v2955_v61, %v7351_v14  ;;  %v2779_v56 = vpop.f32.mrf.mxu1  ;;  %v3336_v59 = vsel %vm8885_vm14, %v3320_v29, -1e+30  ;;  %vm8888_vm3 = vnez %v8887_v46  ;;  %v2957_v28 = vmax.f32 %v2933_v9, %v7351_v14  ;;  %vm8893_vm14 = vmmov %vm8891_vm11 }
 0x26a   : > { %v7366_v16 = vadd.f32 %v2779_v56, %v1836_v18  ;;  %v7370_v26 = vsel %vm8875_vm1, %v2779_v56, -1e+30  ;;  %v4861_v18 = vld [vmem:[%s5226_s14 + $0x60] sm:$0xff]  ;;  %v3169_v56 = vmax.f32 %v3073_v34, %v3145_v31  ;;  %v3308_v53 = vsel %vm8892_vm8, %v3284_v23, %v3296_v21 }
 0x26b   : > { %v7377_v61 = vmax.f32 %v2954_v62, %v7370_v26  ;;  %v1838_v27 = vadd.f32 %v4861_v18, %v6618_v37  ;;  %v2932_v62 = vmax.f32 %v2908_v6, %v7309_v55  ;;  %v3360_v37 = vmax.f32 %v3264_v41, %v3336_v59  ;;  %v4862_v18 = vld [vmem:[%s5226_s14 + $0x78] sm:$0xff] }
 0x26c   : > { %v3009_v2 = vrot.slane %v7358_v63, 1  ;;  %v3265_v6 = vmax.f32 %v3169_v56, %v3212_v15  ;;  %v7420_v41 = vadd.f32 %v4862_v18, %v6681_v20  ;;  %v3201_v20 = vrot.slane %v7358_v63, 7 }
 0x26d   : > { %v2997_v42 = vrot.slane %v7377_v61, 1  ;;  %v3093_v51 = vrot.slane %v7377_v61, 2  ;;  %v2956_v29 = vmax.f32 %v2932_v62, %v7370_v26  ;;  %4758 = vmatprep.mubr.msk.f32.mxu1 %vm8889_vm9, %v3360_v37  ;;  %v3189_v62 = vrot.slane %v7377_v61, 7 }
 0x26e   : > { %v4728_v17 = vpop.f32.mrf.mxu1  ;;  %v3285_v59 = vrot.slane %v7377_v61, 6  ;;  %v3297_v34 = vrot.slane %v7358_v63, 6  ;;  %v2911_v23 = vmax.f32 %v7229_v24, %v7291_v38  ;;  %vm8895_vm9 = vcmp.lt.s32.totalorder %v4997_v12, 15 }
 0x26f   : > { %v7397_v11 = vadd.f32 %v4728_v17, %v1839_v33  ;;  %v7401_v4 = vsel %vm8888_vm3, %v4728_v17, -1e+30  ;;  %v3105_v33 = vrot.slane %v7358_v63, 2  ;;  %v3021_v49 = vsel %vm8891_vm11, %v2997_v42, %v3009_v2 }
 0x270   : > { %v2789_v54 = vpop.f32.mrf.mxu1  ;;  %v7423_v22 = vmax.f32 %v2957_v28, %v7401_v4  ;;  %v3074_v8 = vmax.f32 %v7377_v61, %v3021_v49  ;;  %v3033_v17 = vsel %vm8893_vm14, %v3009_v2, %v2997_v42  ;;  %vm8897_vm11 = vcmp.lt.s32.totalorder %v4975_v3, 1 }
 0x271   : > { %v7410_v32 = vadd.f32 %v2789_v54, %v1838_v27  ;;  %v7414_v36 = vsel %vm8888_vm3, %v2789_v54, -1e+30  ;;  %v3361_v27 = vmax.f32 %v3265_v6, %v3308_v53  ;;  %v3117_v9 = vsel %vm8884_vm0, %v3093_v51, %v3105_v33 }
 0x272   : > { %v7426_v40 = vmax.f32 %v2956_v29, %v7414_v36  ;;  %v3170_v21 = vmax.f32 %v3074_v8, %v3117_v9  ;;  %v3051_v37 = vsel %vm8895_vm9, %v3033_v17, -1e+30  ;;  %v3129_v31 = vsel %vm8896_vm4, %v3105_v33, %v3093_v51  ;;  %vm8901_vm9 = vmmov %vm8897_vm11 }
 0x273   : > { %4759 = vmatmul.mubr.msk.f32.gmra.mxu1 %vm8894_vm7, %v3361_v27  ;;  %v3225_v61 = vsel %vm8897_vm11, %v3201_v20, %v3189_v62  ;;  %v3321_v56 = vsel %vm8892_vm8, %v3297_v34, %v3285_v59  ;;  %v3075_v42 = vmax.f32 %v7358_v63, %v3051_v37  ;;  %v2910_v24 = vmax.f32 %v7246_v30, %v7309_v55  ;;  %vm8903_vm11 = vmmov %vm8892_vm8 }
 0x274   : > { %v2998_v2 = vrot.slane %v7426_v40, 1  ;;  %vm8898_vm0 = vcmp.ge.s32.totalorder %v4975_v3, 1  ;;  %vm8899_vm14 = vcmp.ge.s32.totalorder %v4975_v3, 2  ;;  %vm8900_vm7 = vcmp.lt.s32.totalorder %v4997_v12, 14  ;;  %vm8904_vm8 = vmmov %vm8901_vm9 }
 0x275   : > { %v3242_v28 = vsel %vm8898_vm0, %v3225_v61, -1e+30  ;;  %v3338_v29 = vsel %vm8899_vm14, %v3321_v56, -1e+30  ;;  %v3147_v51 = vsel %vm8900_vm7, %v3129_v31, -1e+30  ;;  %v3213_v6 = vsel %vm8901_vm9, %v3189_v62, %v3201_v20 }
 0x276   : > { %v3266_v54 = vmax.f32 %v3170_v21, %v3242_v28  ;;  %v3171_v15 = vmax.f32 %v3075_v42, %v3147_v51  ;;  %v3010_v33 = vrot.slane %v7423_v22, 1  ;;  %v3094_v63 = vrot.slane %v7426_v40, 2  ;;  %v8910_v28 = vld [vmem:[#allocation7_spill] sm:$0xff] }
 0x277   : > { %v3106_v30 = vrot.slane %v7423_v22, 2  ;;  %v3190_v49 = vrot.slane %v7426_v40, 7  ;;  %v3202_v18 = vrot.slane %v7423_v22, 7  ;;  %vm8902_vm4 = vcmp.lt.s32.totalorder %v4975_v3, 7 }
 0x278   : > { %v3362_v53 = vmax.f32 %v3266_v54, %v3338_v29  ;;  %v3267_v27 = vmax.f32 %v3171_v15, %v3213_v6  ;;  %v3022_v8 = vsel %vm8902_vm4, %v2998_v2, %v3010_v33  ;;  %v3286_v9 = vrot.slane %v7426_v40, 6  ;;  %vm8905_vm0 = vmmov %vm8902_vm4 }
 0x279   : > { %v3309_v17 = vsel %vm8903_vm11, %v3285_v59, %v3297_v34  ;;  %v3076_v21 = vmax.f32 %v7426_v40, %v3022_v8  ;;  %v3226_v62 = vsel %vm8904_vm8, %v3202_v18, %v3190_v49  ;;  %v3034_v20 = vsel %vm8905_vm0, %v3010_v33, %v2998_v2  ;;  %v4863_v2 = vld [vmem:[%s5226_s14 + $0x70] sm:$0xff]  ;;  %v8915_v8 = vld [vmem:[#allocation3_spill] sm:$0xff]  ;;  %s8214_s14 = scalar_lea.vmem %s8283_s4, %s4384_s11 }
 0x27a   : > { %vm8906_vm14 = vcmask 31744   ;;  %v3363_v37 = vmax.f32 %v3267_v27, %v3309_v17  ;;  %vm8907_vm7 = vcmp.lt.s32.totalorder %v4975_v3, 6  ;;  %v3298_v61 = vrot.slane %v7423_v22, 6 }
 0x27b   : > { %4761 = vmatprep.mubr.msk.f32.mxu1 %vm8906_vm14, %v3362_v53  ;;  %v3118_v31 = vsel %vm8907_vm7, %v3094_v63, %v3106_v30  ;;  %vm8908_vm9 = vcmp.lt.s32.totalorder %v4997_v12, 15  ;;  %v2935_v59 = vmax.f32 %v2911_v23, %v7351_v14  ;;  %vm8909_vm4 = vmmov %vm8907_vm7  ;;  %v1840_v29 = vadd.f32 %v4863_v2, %v8910_v28 }
 0x27c   : > { %v3053_v56 = vsel %vm8908_vm9, %v3034_v20, -1e+30  ;;  %v3172_v40 = vmax.f32 %v3076_v21, %v3118_v31  ;;  %v3130_v42 = vsel %vm8909_vm4, %v3106_v30, %v3094_v63  ;;  %vm8911_vm11 = vmmov %vm8906_vm14  ;;  %vm8912_vm8 = vcmp.ge.s32.totalorder %v4975_v3, 1 }
 0x27d   : > { %v3077_v34 = vmax.f32 %v7423_v22, %v3053_v56  ;;  %4762 = vmatmul.mubr.msk.f32.gmra.mxu1 %vm8911_vm11, %v3363_v37  ;;  %v3244_v51 = vsel %vm8912_vm8, %v3226_v62, -1e+30  ;;  %vm8913_vm0 = vcmp.lt.s32.totalorder %v4975_v3, 2  ;;  %vm8914_vm14 = vcmp.lt.s32.totalorder %v4997_v12, 14 }
 0x27e   : > { %v3322_v54 = vsel %vm8913_vm0, %v3298_v61, %v3286_v9  ;;  %v3149_v23 = vsel %vm8914_vm14, %v3130_v42, -1e+30  ;;  %v2934_v15 = vmax.f32 %v2910_v24, %v7370_v26  ;;  %v2959_v22 = vmax.f32 %v2935_v59, %v7401_v4  ;;  %vm8919_vm11 = vmmov %vm8913_vm0 }
 0x27f   : > { %v3268_v63 = vmax.f32 %v3172_v40, %v3244_v51  ;;  %v3173_v6 = vmax.f32 %v3077_v34, %v3149_v23  ;;  %v2913_v30 = vmax.f32 %v7291_v38, %v7351_v14  ;;  %v2912_v53 = vmax.f32 %v7309_v55, %v7370_v26  ;;  %v8921_v23 = vld [vmem:[#allocation4_spill] sm:$0xff] }
 0x280   : > { %vm8916_vm7 = vnez %v8915_v8  ;;  %v2958_v24 = vmax.f32 %v2934_v15, %v7414_v36  ;;  %vm8917_vm9 = vcmp.ge.s32.totalorder %v4975_v3, 2  ;;  %vm8918_vm4 = vcmp.lt.s32.totalorder %v4975_v3, 1 }
 0x281   : > { %v3340_v20 = vsel %vm8917_vm9, %v3322_v54, -1e+30  ;;  %v3214_v38 = vsel %vm8918_vm4, %v3190_v49, %v3202_v18  ;;  %v2937_v56 = vmax.f32 %v2913_v30, %v7401_v4  ;;  %v3310_v40 = vsel %vm8919_vm11, %v3286_v9, %v3298_v61 }
 0x282   : > { %v3364_v37 = vmax.f32 %v3268_v63, %v3340_v20  ;;  %v3269_v31 = vmax.f32 %v3173_v6, %v3214_v38  ;;  %v2915_v34 = vmax.f32 %v7351_v14, %v7401_v4  ;;  %v2914_v49 = vmax.f32 %v7370_v26, %v7414_v36 }
 0x283   : > { %v2936_v18 = vmax.f32 %v2912_v53, %v7414_v36  ;;  %vm8920_vm8 = vcmask 31744   ;;  %vm8922_vm0 = vnez %v8921_v23  ;;  %vm8924_vm9 = vcmp.lt.s32.totalorder %v4975_v3, 7  ;;  %v8939_v23 = vld [vmem:[#allocation5_spill] sm:$0xff] }
 0x284   : > { %4764 = vmatprep.mubr.msk.f32.mxu1 %vm8920_vm8, %v3364_v37  ;;  %v3365_v42 = vmax.f32 %v3269_v31, %v3310_v40  ;;  %vm8923_vm14 = vmmov %vm8920_vm8  ;;  %vm8925_vm11 = vcmp.lt.s32.totalorder %v4975_v3, 6  ;;  %vm8926_vm8 = vcmp.lt.s32.totalorder %v4975_v3, 2 }
 0x286   : > { %4765 = vmatmul.mubr.msk.f32.gmra.mxu1 %vm8923_vm14, %v3365_v42  ;;  %vm8927_vm14 = vcmp.ge.s32.totalorder %v4975_v3, 1 }
 0x287   : > { %v4731_v33 = vpop.f32.mrf.mxu1 }
 0x288   : > { %v7503_v27 = vadd.f32 %v4731_v33, %v7420_v41  ;;  %v7507_v17 = vsel %vm8916_vm7, %v4731_v33, -1e+30 }
 0x289   : > { %v7511_v21 = vmax.f32 %v2959_v22, %v7507_v17  ;;  %v2799_v62 = vpop.f32.mrf.mxu1  ;;  %v2961_v28 = vmax.f32 %v2937_v56, %v7507_v17  ;;  %v2939_v15 = vmax.f32 %v2915_v34, %v7507_v17 }
 0x28a   : > { %v7517_v55 = vadd.f32 %v2799_v62, %v1840_v29  ;;  %v7521_v41 = vsel %vm8916_vm7, %v2799_v62, -1e+30 }
 0x28b   : > { %v2982_v59 = vmax.f32 %v2958_v24, %v7521_v41  ;;  %v3011_v14 = vrot.slane %v7511_v21, 1  ;;  %v3203_v26 = vrot.slane %v7511_v21, 7  ;;  %v2960_v63 = vmax.f32 %v2936_v18, %v7521_v41 }
 0x28c   : > { %v3107_v6 = vrot.slane %v7511_v21, 2  ;;  %v3299_v62 = vrot.slane %v7511_v21, 6  ;;  %v2938_v38 = vmax.f32 %v2914_v49, %v7521_v41 }
 0x28d   : > { %v4734_v2 = vpop.f32.mrf.mxu1  ;;  %v2999_v29 = vrot.slane %v2982_v59, 1  ;;  %v3095_v51 = vrot.slane %v2982_v59, 2  ;;  %v3191_v54 = vrot.slane %v2982_v59, 7  ;;  %v3287_v61 = vrot.slane %v2982_v59, 6 }
 0x28e   : > { %v7536_v9 = vsel %vm8922_vm0, %v4734_v2, -1e+30 }
 0x28f   : > { %v7543_v22 = vmax.f32 %v2961_v28, %v7536_v9  ;;  %v2809_v33 = vpop.f32.mrf.mxu1  ;;  %v3023_v53 = vsel %vm8924_vm9, %v2999_v29, %v3011_v14  ;;  %v3227_v24 = vsel %vm8918_vm4, %v3203_v26, %v3191_v54  ;;  %v2963_v20 = vmax.f32 %v2939_v15, %v7536_v9 }
 0x290   : > { %v7549_v30 = vsel %vm8922_vm0, %v2809_v33, -1e+30  ;;  %v3119_v37 = vsel %vm8925_vm11, %v3095_v51, %v3107_v6  ;;  %v3078_v40 = vmax.f32 %v2982_v59, %v3023_v53  ;;  %v3323_v34 = vsel %vm8926_vm8, %v3299_v62, %v3287_v61 }
 0x291   : > { %v3012_v31 = vrot.slane %v7543_v22, 1  ;;  %v7562_v56 = vmax.f32 %v2960_v63, %v7549_v30  ;;  %v3246_v18 = vsel %vm8927_vm14, %v3227_v24, -1e+30  ;;  %vm8928_vm9 = vcmp.ge.s32.totalorder %v4975_v3, 2 }
 0x292   : > { %v3342_v42 = vsel %vm8928_vm9, %v3323_v34, -1e+30  ;;  %vm8929_vm4 = vcmp.lt.s32.totalorder %v4975_v3, 7  ;;  %v3131_v2 = vsel %vm8925_vm11, %v3107_v6, %v3095_v51  ;;  %v3174_v15 = vmax.f32 %v3078_v40, %v3119_v37 }
 0x293   : > { %v3035_v49 = vsel %vm8929_vm4, %v3011_v14, %v2999_v29  ;;  %v3000_v28 = vrot.slane %v7562_v56, 1  ;;  %vm8930_vm0 = vcmp.lt.s32.totalorder %v4997_v12, 15  ;;  %vm8931_vm8 = vcmp.lt.s32.totalorder %v4975_v3, 1  ;;  %vm8933_vm9 = vmmov %vm8929_vm4 }
 0x294   : > { %v3055_v59 = vsel %vm8930_vm0, %v3035_v49, -1e+30  ;;  %v3215_v33 = vsel %vm8931_vm8, %v3191_v54, %v3203_v26  ;;  %vm8932_vm14 = vcmp.lt.s32.totalorder %v4997_v12, 14  ;;  %v3096_v24 = vrot.slane %v7562_v56, 2  ;;  %vm8934_vm0 = vmmov %vm8925_vm11 }
 0x295   : > { %v3079_v63 = vmax.f32 %v7511_v21, %v3055_v59  ;;  %v3151_v53 = vsel %vm8932_vm14, %v3131_v2, -1e+30  ;;  %v3108_v29 = vrot.slane %v7543_v22, 2  ;;  %v3270_v14 = vmax.f32 %v3174_v15, %v3246_v18  ;;  %vm8935_vm4 = vmmov %vm8931_vm8 }
 0x296   : > { %v3024_v51 = vsel %vm8933_vm9, %v3000_v28, %v3012_v31  ;;  %v3192_v6 = vrot.slane %v7562_v56, 7  ;;  %v3204_v37 = vrot.slane %v7543_v22, 7  ;;  %v3288_v26 = vrot.slane %v7562_v56, 6  ;;  %vm8936_vm11 = vmmov %vm8933_vm9 }
 0x297   : > { %v3175_v40 = vmax.f32 %v3079_v63, %v3151_v53  ;;  %v3080_v54 = vmax.f32 %v7562_v56, %v3024_v51  ;;  %v3120_v21 = vsel %vm8934_vm0, %v3096_v24, %v3108_v29  ;;  %v3366_v34 = vmax.f32 %v3270_v14, %v3342_v42 }
 0x298   : > { %v3228_v49 = vsel %vm8935_vm4, %v3204_v37, %v3192_v6  ;;  %v3300_v18 = vrot.slane %v7543_v22, 6  ;;  %v3036_v2 = vsel %vm8936_vm11, %v3012_v31, %v3000_v28  ;;  %vm8937_vm8 = vcmp.lt.s32.totalorder %v4975_v3, 2 }
 0x299   : > { %v3271_v59 = vmax.f32 %v3175_v40, %v3215_v33  ;;  %v3311_v63 = vsel %vm8937_vm8, %v3287_v61, %v3299_v62  ;;  %v3176_v53 = vmax.f32 %v3080_v54, %v3120_v21  ;;  %vm8938_vm14 = vcmp.lt.s32.totalorder %v4997_v12, 15  ;;  %vm8942_vm4 = vmmov %vm8937_vm8 }
 0x29a   : > { %v3057_v51 = vsel %vm8938_vm14, %v3036_v2, -1e+30  ;;  %vm8940_vm9 = vnez %v8939_v23  ;;  %vm8941_vm0 = vcmask 31744   ;;  %v3324_v42 = vsel %vm8942_vm4, %v3300_v18, %v3288_v26 }
 0x29b   : > { %4767 = vmatprep.mubr.msk.f32.mxu1 %vm8941_vm0, %v3366_v34  ;;  %v3081_v14 = vmax.f32 %v7543_v22, %v3057_v51  ;;  %vm8943_vm11 = vcmp.lt.s32.totalorder %v4975_v3, 6  ;;  %v2917_v61 = vmax.f32 %v7401_v4, %v7507_v17  ;;  %v3367_v33 = vmax.f32 %v3271_v59, %v3311_v63  ;;  %vm8945_vm14 = vmmov %vm8941_vm0 }
 0x29c   : > { %v3132_v31 = vsel %vm8943_vm11, %v3108_v29, %v3096_v24  ;;  %vm8944_vm8 = vcmp.ge.s32.totalorder %v4975_v3, 1  ;;  %v2916_v54 = vmax.f32 %v7414_v36, %v7521_v41  ;;  %v2962_v21 = vmax.f32 %v2938_v38, %v7549_v30 }
 0x29d   : > { %v4737_v15 = vpop.f32.mrf.mxu1  ;;  %v3248_v40 = vsel %vm8944_vm8, %v3228_v49, -1e+30  ;;  %v2919_v24 = vmax.f32 %v7507_v17, %v7536_v9  ;;  %v2941_v4 = vmax.f32 %v2917_v61, %v7536_v9  ;;  %4768 = vmatmul.mubr.msk.f32.gmra.mxu1 %vm8945_vm14, %v3367_v33  ;;  %vm8946_vm0 = vcmp.ge.s32.totalorder %v4975_v3, 2  ;;  %vm8949_vm8 = vmmov %vm8945_vm14 }
 0x29e   : > { %v2891_v56 = vsel %vm8940_vm9, %v4737_v15, -1e+30  ;;  %v3272_v34 = vmax.f32 %v3176_v53, %v3248_v40  ;;  %vm8947_vm4 = vcmp.lt.s32.totalorder %v4997_v12, 14  ;;  %v2918_v36 = vmax.f32 %v7521_v41, %v7549_v30 }
 0x29f   : > { %v7611_v62 = vmax.f32 %v2963_v20, %v2891_v56  ;;  %v2819_v28 = vpop.f32.mrf.mxu1  ;;  %v3344_v20 = vsel %vm8946_vm0, %v3324_v42, -1e+30  ;;  %v3153_v29 = vsel %vm8947_vm4, %v3132_v31, -1e+30  ;;  %v2940_v15 = vmax.f32 %v2916_v54, %v7549_v30  ;;  %v8952_v54 = vld [vmem:[#allocation6_spill] sm:$0xff] }
 0x2a0   : > { %v2890_v22 = vsel %vm8940_vm9, %v2819_v28, -1e+30  ;;  %v3368_v49 = vmax.f32 %v3272_v34, %v3344_v20  ;;  %v3177_v2 = vmax.f32 %v3081_v14, %v3153_v29  ;;  %v2943_v59 = vmax.f32 %v2919_v24, %v2891_v56 }
 0x2a1   : > { %v2986_v38 = vmax.f32 %v2962_v21, %v2890_v22  ;;  %v3013_v17 = vrot.slane %v7611_v62, 1  ;;  %vm8948_vm11 = vcmp.lt.s32.totalorder %v4975_v3, 1  ;;  %v2965_v31 = vmax.f32 %v2941_v4, %v2891_v56 }
 0x2a2   : > { %v3216_v9 = vsel %vm8948_vm11, %v3192_v6, %v3204_v37  ;;  %4770 = vmatprep.mubr.msk.f32.mxu1 %vm8949_vm8, %v3368_v49  ;;  %v3205_v41 = vrot.slane %v7611_v62, 7  ;;  %vm8950_vm14 = vcmp.lt.s32.totalorder %v4975_v3, 2  ;;  %v3109_v30 = vrot.slane %v7611_v62, 2 }
 0x2a3   : > { %v3001_v63 = vrot.slane %v2986_v38, 1  ;;  %v3097_v53 = vrot.slane %v2986_v38, 2  ;;  %v3193_v51 = vrot.slane %v2986_v38, 7  ;;  %v3273_v42 = vmax.f32 %v3177_v2, %v3216_v9 }
 0x2a4   : > { %v3312_v14 = vsel %vm8950_vm14, %v3288_v26, %v3300_v18  ;;  %v3289_v61 = vrot.slane %v2986_v38, 6  ;;  %vm8951_vm0 = vcmp.lt.s32.totalorder %v4975_v3, 7  ;;  %v3301_v37 = vrot.slane %v7611_v62, 6 }
 0x2a5   : > { %v3369_v33 = vmax.f32 %v3273_v42, %v3312_v14  ;;  %v3025_v6 = vsel %vm8951_vm0, %v3001_v63, %v3013_v17  ;;  %v2964_v40 = vmax.f32 %v2940_v15, %v2890_v22  ;;  %vm8953_vm4 = vnez %v8952_v54 }
 0x2a6   : > { %v3082_v56 = vmax.f32 %v2986_v38, %v3025_v6  ;;  %v3229_v34 = vsel %vm8948_vm11, %v3205_v41, %v3193_v51  ;;  %vm8954_vm14 = vcmp.lt.s32.totalorder %v4975_v3, 6  ;;  %vm8955_vm0 = vcmp.lt.s32.totalorder %v4975_v3, 2 }
 0x2a7   : > { %v4740_v28 = vpop.f32.mrf.mxu1  ;;  %4771 = vmatmul.mubr.msk.f32.gmra.mxu1 %vm8949_vm8, %v3369_v33  ;;  %v3121_v18 = vsel %vm8954_vm14, %v3097_v53, %v3109_v30  ;;  %v3325_v4 = vsel %vm8955_vm0, %v3301_v37, %v3289_v61  ;;  %vm8956_vm9 = vcmp.lt.s32.totalorder %v4975_v3, 7  ;;  %vm8957_vm11 = vcmp.lt.s32.totalorder %v4997_v12, 15  ;;  %vm8958_vm7 = vmmov %vm8954_vm14 }
 0x2a8   : > { %v2893_v21 = vsel %vm8953_vm4, %v4740_v28, -1e+30  ;;  %v3037_v20 = vsel %vm8956_vm9, %v3013_v17, %v3001_v63  ;;  %v3178_v38 = vmax.f32 %v3082_v56, %v3121_v18  ;;  %v3133_v2 = vsel %vm8958_vm7, %v3109_v30, %v3097_v53 }
 0x2a9   : > { %v7646_v24 = vmax.f32 %v2965_v31, %v2893_v21  ;;  %v2829_v26 = vpop.f32.mrf.mxu1  ;;  %v3059_v49 = vsel %vm8957_vm11, %v3037_v20, -1e+30  ;;  %v2942_v15 = vmax.f32 %v2918_v36, %v2890_v22  ;;  %v2967_v9 = vmax.f32 %v2943_v59, %v2893_v21 }
 0x2aa   : > { %v2892_v29 = vsel %vm8953_vm4, %v2829_v26, -1e+30  ;;  %vm8959_vm8 = vcmp.ge.s32.totalorder %v4975_v3, 1  ;;  %vm8960_vm14 = vcmp.ge.s32.totalorder %v4975_v3, 2  ;;  %v3083_v63 = vmax.f32 %v7611_v62, %v3059_v49 }
 0x2ab   : > { %v3250_v42 = vsel %vm8959_vm8, %v3229_v34, -1e+30  ;;  %v2988_v31 = vmax.f32 %v2964_v40, %v2892_v29  ;;  %v3346_v17 = vsel %vm8960_vm14, %v3325_v4, -1e+30  ;;  %v3014_v28 = vrot.slane %v7646_v24, 1 }
 0x2ac   : > { %v3274_v14 = vmax.f32 %v3178_v38, %v3250_v42  ;;  %v3110_v33 = vrot.slane %v7646_v24, 2  ;;  %v3206_v6 = vrot.slane %v7646_v24, 7  ;;  %vm8961_vm7 = vcmp.lt.s32.totalorder %v4997_v12, 14 }
 0x2ad   : > { %v3155_v22 = vsel %vm8961_vm7, %v3133_v2, -1e+30  ;;  %v3002_v36 = vrot.slane %v2988_v31, 1  ;;  %v3098_v59 = vrot.slane %v2988_v31, 2  ;;  %v3194_v53 = vrot.slane %v2988_v31, 7 }
 0x2ae   : > { %v3370_v30 = vmax.f32 %v3274_v14, %v3346_v17  ;;  %v2966_v40 = vmax.f32 %v2942_v15, %v2892_v29  ;;  %v3179_v54 = vmax.f32 %v3083_v63, %v3155_v22  ;;  %vm8962_vm9 = vcmp.lt.s32.totalorder %v4975_v3, 1 }
 0x2af   : > { %v3217_v21 = vsel %vm8962_vm9, %v3193_v51, %v3205_v41  ;;  %v3290_v56 = vrot.slane %v2988_v31, 6  ;;  %vm8963_vm4 = vcmask 31744   ;;  %v3313_v34 = vsel %vm8955_vm0, %v3289_v61, %v3301_v37  ;;  %vm8967_vm7 = vmmov %vm8962_vm9 }
 0x2b0   : > { %v4743_v62 = vpop.f32.mrf.mxu1  ;;  %4773 = vmatprep.mubr.msk.f32.mxu1 %vm8963_vm4, %v3370_v30  ;;  %vm8964_vm11 = vcmp.lt.s32.totalorder %v4975_v3, 7  ;;  %v3302_v18 = vrot.slane %v7646_v24, 6  ;;  %vm8966_vm14 = vnez %v8503_v0  ;;  %v3275_v29 = vmax.f32 %v3179_v54, %v3217_v21  ;;  %vm8969_vm4 = vmmov %vm8955_vm0 }
 0x2b1   : > { %v3026_v26 = vsel %vm8964_vm11, %v3002_v36, %v3014_v28  ;;  %vm8965_vm8 = vmmov %vm8964_vm11  ;;  %v2895_v20 = vsel %vm8966_vm14, %v4743_v62, -1e+30  ;;  %v3230_v41 = vsel %vm8967_vm7, %v3206_v6, %v3194_v53  ;;  %vm8968_vm9 = vcmp.lt.s32.totalorder %v4975_v3, 6 }
 0x2b2   : > { %v3038_v4 = vsel %vm8965_vm8, %v3014_v28, %v3002_v36  ;;  %v3084_v51 = vmax.f32 %v2988_v31, %v3026_v26  ;;  %v2991_v38 = vmax.f32 %v2967_v9, %v2895_v20  ;;  %v2839_v49 = vpop.f32.mrf.mxu1  ;;  %v3122_v61 = vsel %vm8968_vm9, %v3098_v59, %v3110_v33  ;;  %vm8971_vm11 = vmmov %vm8968_vm9 }
 0x2b3   : > { %v3326_v37 = vsel %vm8969_vm4, %v3302_v18, %v3290_v56  ;;  %vm8970_vm0 = vcmp.lt.s32.totalorder %v4997_v12, 15  ;;  %v2894_v15 = vsel %vm8966_vm14, %v2839_v49, -1e+30  ;;  %v3371_v42 = vmax.f32 %v3275_v29, %v3313_v34 }
 0x2b4   : > { %v3061_v2 = vsel %vm8970_vm0, %v3038_v4, -1e+30  ;;  %v3180_v14 = vmax.f32 %v3084_v51, %v3122_v61  ;;  %v3134_v31 = vsel %vm8971_vm11, %v3110_v33, %v3098_v59  ;;  %v2990_v17 = vmax.f32 %v2966_v40, %v2894_v15 }
 0x2b5   : > { %vm8972_vm8 = vcmp.ge.s32.totalorder %v4975_v3, 1  ;;  %v3015_v63 = vrot.slane %v2991_v38, 1  ;;  %vm8973_vm7 = vcmask 31744   ;;  %vm8974_vm9 = vcmp.ge.s32.totalorder %v4975_v3, 2 }
 0x2b6   : > { %v3252_v9 = vsel %vm8972_vm8, %v3230_v41, -1e+30  ;;  %4774 = vmatmul.mubr.msk.f32.gmra.mxu1 %vm8973_vm7, %v3371_v42  ;;  %v3348_v22 = vsel %vm8974_vm9, %v3326_v37, -1e+30  ;;  %v3085_v36 = vmax.f32 %v7646_v24, %v3061_v2  ;;  %v3003_v0 = vrot.slane %v2990_v17, 1  ;;  %vm8979_vm8 = vmmov %vm8973_vm7 }
 0x2b7   : > { %v3276_v28 = vmax.f32 %v3180_v14, %v3252_v9  ;;  %v3099_v30 = vrot.slane %v2990_v17, 2  ;;  %v3195_v54 = vrot.slane %v2990_v17, 7  ;;  %vm8975_vm14 = vcmp.lt.s32.totalorder %v4997_v12, 14 }
 0x2b8   : > { %v3157_v21 = vsel %vm8975_vm14, %v3134_v31, -1e+30  ;;  %v3207_v33 = vrot.slane %v2991_v38, 7  ;;  %v3291_v62 = vrot.slane %v2990_v17, 6  ;;  %v3111_v34 = vrot.slane %v2991_v38, 2 }
 0x2b9   : > { %v3372_v59 = vmax.f32 %v3276_v28, %v3348_v22  ;;  %v3181_v40 = vmax.f32 %v3085_v36, %v3157_v21  ;;  %vm8976_vm4 = vcmp.lt.s32.totalorder %v4975_v3, 1  ;;  %vm8977_vm0 = vcmp.lt.s32.totalorder %v4975_v3, 7 }
 0x2ba   : > { %v3218_v26 = vsel %vm8976_vm4, %v3194_v53, %v3206_v6  ;;  %v3027_v4 = vsel %vm8977_vm0, %v3003_v0, %v3015_v63  ;;  %vm8978_vm11 = vmmov %vm8977_vm0  ;;  %v3303_v41 = vrot.slane %v2991_v38, 6  ;;  %vm8981_vm9 = vcmp.lt.s32.totalorder %v4975_v3, 2 }
 0x2bb   : > { %v3039_v24 = vsel %vm8978_vm11, %v3015_v63, %v3003_v0  ;;  %4776 = vmatprep.mubr.msk.f32.mxu1 %vm8979_vm8, %v3372_v59  ;;  %v3277_v20 = vmax.f32 %v3181_v40, %v3218_v26  ;;  %v3086_v29 = vmax.f32 %v2990_v17, %v3027_v4  ;;  %vm8980_vm7 = vmmov %vm8976_vm4  ;;  %v3314_v49 = vsel %vm8981_vm9, %v3290_v56, %v3302_v18 }
 0x2bc   : > { %v3231_v51 = vsel %vm8980_vm7, %v3207_v33, %v3195_v54  ;;  %vm8982_vm14 = vcmp.lt.s32.totalorder %v4975_v3, 6  ;;  %vm8983_vm4 = vcmp.lt.s32.totalorder %v4997_v12, 15  ;;  %vm8985_vm11 = vmmov %vm8981_vm9  ;;  %vm8986_vm8 = vcmp.ge.s32.totalorder %v4975_v3, 1 }
 0x2bd   : > { %v3123_v6 = vsel %vm8982_vm14, %v3099_v30, %v3111_v34  ;;  %v3063_v53 = vsel %vm8983_vm4, %v3039_v24, -1e+30  ;;  %vm8984_vm0 = vmmov %vm8982_vm14  ;;  %v3373_v37 = vmax.f32 %v3277_v20, %v3314_v49  ;;  %v3327_v15 = vsel %vm8985_vm11, %v3303_v41, %v3291_v62 }
 0x2be   : > { %v3135_v61 = vsel %vm8984_vm0, %v3111_v34, %v3099_v30  ;;  %v3182_v2 = vmax.f32 %v3086_v29, %v3123_v6  ;;  %v3087_v42 = vmax.f32 %v2991_v38, %v3063_v53  ;;  %v3254_v14 = vsel %vm8986_vm8, %v3231_v51, -1e+30  ;;  %vm8991_vm0 = vmmov %vm8985_vm11 }
 0x2bf   : > { %vm8987_vm7 = vcmp.lt.s32.totalorder %v4997_v12, 14  ;;  %vm8988_vm9 = vcmask 31744   ;;  %vm8989_vm14 = vcmp.ge.s32.totalorder %v4975_v3, 2  ;;  %vm8990_vm4 = vcmp.lt.s32.totalorder %v4975_v3, 1 }
 0x2c0   : > { %v3159_v56 = vsel %vm8987_vm7, %v3135_v61, -1e+30  ;;  %4777 = vmatmul.mubr.msk.f32.gmra.mxu1 %vm8988_vm9, %v3373_v37  ;;  %v3278_v18 = vmax.f32 %v3182_v2, %v3254_v14  ;;  %v3350_v17 = vsel %vm8989_vm14, %v3327_v15, -1e+30  ;;  %v3219_v9 = vsel %vm8990_vm4, %v3195_v54, %v3207_v33  ;;  %vm8992_vm11 = vmmov %vm8988_vm9 }
 0x2c1   : > { %v3183_v31 = vmax.f32 %v3087_v42, %v3159_v56  ;;  %v3315_v38 = vsel %vm8991_vm0, %v3291_v62, %v3303_v41  ;;  %vm8993_vm8 = vmmov %vm8988_vm9  ;;  %vm9001_vm14 = vcmp.ge.s32.totalorder %v4975_v3, 1 }
 0x2c2   : > { %v3374_v63 = vmax.f32 %v3278_v18, %v3350_v17  ;;  %vm9000_vm9 = vmmov %vm8991_vm0  ;;  %vm9003_vm0 = vcmp.lt.s32.totalorder %v4997_v12, 14 }
 0x2c3   : > { %v3279_v28 = vmax.f32 %v3183_v31, %v3219_v9 }
 0x2c4   : > { %4779 = vmatprep.mubr.msk.f32.mxu1 %vm8992_vm11, %v3374_v63 }
 0x2c5   : > { %v3375_v22 = vmax.f32 %v3279_v28, %v3315_v38 }
 0x2c7   : > { %4780 = vmatmul.mubr.msk.f32.gmra.mxu1 %vm8993_vm8, %v3375_v22 }
 0x2f8   : > { %v4748_v36 = vpop.f32.mrf.mxu1 }
 0x2f9   : > { %v3655_v20 = vsel %vm5092_vm15, %v4748_v36, -1e+30 }
 0x2fa   : > { %v3519_v0 = vpop.f32.mrf.mxu1 }
 0x303   : > { %v4751_v30 = vpop.f32.mrf.mxu1 }
 0x304   : > { %v3657_v26 = vsel %vm5204_vm10, %v4751_v30, -1e+30 }
 0x305   : > { %v3529_v21 = vpop.f32.mrf.mxu1  ;;  %v3679_v29 = vmax.f32 %v3655_v20, %v3657_v26 }
 0x314   : > { %v4754_v59 = vpop.f32.mrf.mxu1 }
 0x315   : > { %v7736_v40 = vadd.f32 %v4754_v59, %v7043_v35  ;;  %v3656_v35 = vsel %vm5204_vm10, %v3529_v21, -1e+30  ;;  %vm8994_vm10 = vcmp.lt.s32.totalorder %v4975_v3, 7 }
 0x316   : > { %v3539_v34 = vpop.f32.mrf.mxu1  ;;  %vm9005_vm11 = vmmov %vm8994_vm10 }
 0x317   : > { %v7739_v54 = vadd.f32 %v3539_v34, %v7055_v5  ;;  %v3659_v5 = vsel %vm5255_vm13, %v4754_v59, -1e+30  ;;  %v3658_v51 = vsel %vm5255_vm13, %v3539_v34, -1e+30  ;;  %vm8997_vm13 = vmmov %vm8990_vm4  ;;  %vm9002_vm4 = vcmp.ge.s32.totalorder %v4975_v3, 2 }
 0x318   : > { %v3695_v49 = vmax.f32 %v3679_v29, %v3659_v5  ;;  %v3681_v14 = vmax.f32 %v3657_v26, %v3659_v5  ;;  %v3680_v56 = vmax.f32 %v3656_v35, %v3658_v51 }
 0x322   : > { %v4757_v33 = vpop.f32.mrf.mxu1 }
 0x323   : > { %v7742_v62 = vadd.f32 %v4757_v33, %v7102_v10  ;;  %v3654_v10 = vsel %vm5092_vm15, %v3519_v0, -1e+30  ;;  %vm8995_vm15 = vmmov %vm8994_vm10 }
 0x324   : > { %v3549_v4 = vpop.f32.mrf.mxu1  ;;  %v3678_v41 = vmax.f32 %v3654_v10, %v3656_v35 }
 0x325   : > { %v7747_v24 = vadd.f32 %v3549_v4, %v7118_v44  ;;  %v7761_v44 = vsel %vm5293_vm12, %v4757_v33, -1e+30  ;;  %v7765_v50 = vsel %vm5293_vm12, %v3549_v4, -1e+30  ;;  %vm8996_vm12 = vcmp.lt.s32.totalorder %v4997_v12, 15 }
 0x326   : > { %v3694_v6 = vmax.f32 %v3678_v41, %v3658_v51  ;;  %v3711_v53 = vmax.f32 %v3695_v49, %v7761_v44  ;;  %v3683_v18 = vmax.f32 %v3659_v5, %v7761_v44  ;;  %v3697_v31 = vmax.f32 %v3681_v14, %v7761_v44 }
 0x327   : > { %v3682_v28 = vmax.f32 %v3658_v51, %v7765_v50 }
 0x328   : > { %v3710_v37 = vmax.f32 %v3694_v6, %v7765_v50 }
 0x333   : > { %v4760_v61 = vpop.f32.mrf.mxu1 }
 0x334   : > { %v7769_v58 = vadd.f32 %v4760_v61, %v7172_v43  ;;  %v7773_v39 = vsel %vm8635_vm2, %v4760_v61, -1e+30 }
 0x335   : > { %v7777_v2 = vmax.f32 %v3711_v53, %v7773_v39  ;;  %v3559_v15 = vpop.f32.mrf.mxu1  ;;  %v3713_v22 = vmax.f32 %v3697_v31, %v7773_v39 }
 0x336   : > { %v7780_v52 = vadd.f32 %v3559_v15, %v7189_v19  ;;  %v7784_v42 = vsel %vm8635_vm2, %v3559_v15, -1e+30  ;;  %v3696_v19 = vmax.f32 %v3680_v56, %v7765_v50  ;;  %vm8998_vm2 = vcmp.lt.s32.totalorder %v4975_v3, 6 }
 0x337   : > { %v3726_v43 = vmax.f32 %v3710_v37, %v7784_v42  ;;  %v3750_v9 = vrot.slane %v7777_v2, 1  ;;  %v3878_v30 = vrot.slane %v7777_v2, 7  ;;  %v3814_v34 = vrot.slane %v7777_v2, 2  ;;  %vm8999_vm7 = vmmov %vm8998_vm2 }
 0x338   : > { %v3942_v33 = vrot.slane %v7777_v2, 6  ;;  %v3712_v4 = vmax.f32 %v3696_v19, %v7784_v42  ;;  %v3699_v37 = vmax.f32 %v3683_v18, %v7773_v39 }
 0x339   : > { %v3742_v17 = vrot.slane %v3726_v43, 1  ;;  %v3870_v63 = vrot.slane %v3726_v43, 7  ;;  %v3806_v38 = vrot.slane %v3726_v43, 2  ;;  %v3934_v7 = vrot.slane %v3726_v43, 6 }
 0x33b   : > { %v3758_v36 = vsel %vm8994_vm10, %v3742_v17, %v3750_v9  ;;  %v3766_v0 = vsel %vm8995_vm15, %v3750_v9, %v3742_v17  ;;  %v3894_v5 = vsel %vm8997_vm13, %v3878_v30, %v3870_v63  ;;  %v3822_v51 = vsel %vm8998_vm2, %v3806_v38, %v3814_v34  ;;  %vm9006_vm10 = vmmov %vm9000_vm9 }
 0x33c   : > { %v3790_v59 = vmax.f32 %v3726_v43, %v3758_v36  ;;  %v3775_v26 = vsel %vm8996_vm12, %v3766_v0, -1e+30  ;;  %v3830_v41 = vsel %vm8999_vm7, %v3814_v34, %v3806_v38  ;;  %v3902_v14 = vsel %vm9001_vm14, %v3894_v5, -1e+30  ;;  %vm9007_vm15 = vmmov %vm8998_vm2 }
 0x33d   : > { %v4763_v21 = vpop.f32.mrf.mxu1  ;;  %v3791_v61 = vmax.f32 %v7777_v2, %v3775_v26  ;;  %v3698_v43 = vmax.f32 %v3682_v28, %v7784_v42  ;;  %v3839_v57 = vsel %vm9003_vm0, %v3830_v41, -1e+30  ;;  %vm9008_vm12 = vmmov %vm8993_vm8 }
 0x33e   : > { %v7804_v20 = vadd.f32 %v4763_v21, %v7225_v47  ;;  %v7808_v35 = vsel %vm8654_vm6, %v4763_v21, -1e+30  ;;  %v3958_v47 = vsel %vm9000_vm9, %v3942_v33, %v3934_v7  ;;  %v3854_v53 = vmax.f32 %v3790_v59, %v3822_v51  ;;  %vm9010_vm2 = vmmov %vm9000_vm9 }
 0x33f   : > { %v7813_v29 = vmax.f32 %v3713_v22, %v7808_v35  ;;  %v3569_v10 = vpop.f32.mrf.mxu1  ;;  %v3855_v31 = vmax.f32 %v3791_v61, %v3839_v57  ;;  %v3715_v18 = vmax.f32 %v3699_v37, %v7808_v35  ;;  %v3685_v37 = vmax.f32 %v7761_v44, %v7773_v39  ;;  %vm9012_vm9 = vmmov %vm9001_vm14 }
 0x340   : > { %v7822_v49 = vadd.f32 %v3569_v10, %v7242_v1  ;;  %v7826_v6 = vsel %vm8654_vm6, %v3569_v10, -1e+30  ;;  %v3918_v56 = vmax.f32 %v3854_v53, %v3902_v14  ;;  %v3966_v1 = vsel %vm9002_vm4, %v3958_v47, -1e+30  ;;  %vm9004_vm6 = vmmov %vm8997_vm13 }
 0x341   : > { %v3728_v15 = vmax.f32 %v3712_v4, %v7826_v6  ;;  %v3751_v2 = vrot.slane %v7813_v29, 1  ;;  %v3714_v19 = vmax.f32 %v3698_v43, %v7826_v6  ;;  %v3886_v28 = vsel %vm9004_vm6, %v3870_v63, %v3878_v30  ;;  %vm9009_vm13 = vmmov %vm9004_vm6 }
 0x342   : > { %v3982_v38 = vmax.f32 %v3918_v56, %v3966_v1  ;;  %v3919_v36 = vmax.f32 %v3855_v31, %v3886_v28  ;;  %v3815_v21 = vrot.slane %v7813_v29, 2  ;;  %v3950_v30 = vsel %vm9006_vm10, %v3934_v7, %v3942_v33  ;;  %vm9014_vm0 = vmmov %vm9004_vm6 }
 0x343   : > { %v3743_v17 = vrot.slane %v3728_v15, 1  ;;  %v3807_v9 = vrot.slane %v3728_v15, 2  ;;  %v3871_v59 = vrot.slane %v3728_v15, 7  ;;  %v3935_v5 = vrot.slane %v3728_v15, 6  ;;  %vm9018_vm10 = vmmov %vm9008_vm12 }
 0x344   : > { %4784 = vmatprep.mubr.msk.f32.mxu0 %vm8993_vm8, %v3982_v38  ;;  %v3879_v51 = vrot.slane %v7813_v29, 7  ;;  %v3983_v53 = vmax.f32 %v3919_v36, %v3950_v30  ;;  %v3684_v14 = vmax.f32 %v7765_v50, %v7784_v42  ;;  %v3687_v43 = vmax.f32 %v7773_v39, %v7808_v35 }
 0x345   : > { %v3759_v0 = vsel %vm9005_vm11, %v3743_v17, %v3751_v2  ;;  %v3823_v10 = vsel %vm9007_vm15, %v3807_v9, %v3815_v21  ;;  %v3831_v44 = vsel %vm8999_vm7, %v3815_v21, %v3807_v9  ;;  %vm9013_vm14 = vcmp.lt.s32.totalorder %v4997_v12, 15  ;;  %vm9019_vm15 = vmmov %vm9014_vm0 }
 0x346   : > { %v4766_v22 = vpop.f32.mrf.mxu1  ;;  %v3792_v4 = vmax.f32 %v3728_v15, %v3759_v0  ;;  %4785 = vmatmul.mubr.msk.f32.vlgmr.msra.gmra.mxu0 %vm9008_vm12, %v3983_v53  ;;  %vm9015_vm6 = vcmp.lt.s32.totalorder %v4997_v12, 14  ;;  %v3701_v53 = vmax.f32 %v3685_v37, %v7808_v35 }
 0x347   : > { %v7847_v34 = vadd.f32 %v4766_v22, %v7287_v45  ;;  %v7851_v26 = vsel %vm8667_vm5, %v4766_v22, -1e+30  ;;  %v3943_v45 = vrot.slane %v7813_v29, 6  ;;  %v3841_v50 = vsel %vm9015_vm6, %v3831_v44, -1e+30 }
 0x348   : > { %v3579_v63 = vpop.f32.mrf.mxu1  ;;  %v3856_v61 = vmax.f32 %v3792_v4, %v3823_v10  ;;  %v7870_v7 = vmax.f32 %v3715_v18, %v7851_v26  ;;  %v3717_v37 = vmax.f32 %v3701_v53, %v7851_v26 }
 0x349   : > { %v7861_v41 = vadd.f32 %v3579_v63, %v7305_v60  ;;  %v7865_v47 = vsel %vm8667_vm5, %v3579_v63, -1e+30  ;;  %v3895_v60 = vsel %vm9009_vm13, %v3879_v51, %v3871_v59  ;;  %v3959_v48 = vsel %vm9010_vm2, %v3943_v45, %v3935_v5  ;;  %vm9011_vm5 = vmmov %vm9005_vm11 }
 0x34a   : > { %v7873_v33 = vmax.f32 %v3714_v19, %v7865_v47  ;;  %v3767_v15 = vsel %vm9011_vm5, %v3751_v2, %v3743_v17  ;;  %v3904_v56 = vsel %vm9012_vm9, %v3895_v60, -1e+30  ;;  %v3968_v31 = vsel %vm9002_vm4, %v3959_v48, -1e+30  ;;  %vm9016_vm11 = vmmov %vm9010_vm2 }
 0x34b   : > { %v3777_v1 = vsel %vm9013_vm14, %v3767_v15, -1e+30  ;;  %v3920_v57 = vmax.f32 %v3856_v61, %v3904_v56  ;;  %v3887_v2 = vsel %vm9014_vm0, %v3871_v59, %v3879_v51  ;;  %v3752_v9 = vrot.slane %v7870_v7, 1  ;;  %vm9017_vm8 = vmmov %vm9011_vm5 }
 0x34c   : > { %v3793_v17 = vmax.f32 %v7813_v29, %v3777_v1  ;;  %v3744_v39 = vrot.slane %v7873_v33, 1  ;;  %v3808_v18 = vrot.slane %v7873_v33, 2  ;;  %v3872_v28 = vrot.slane %v7873_v33, 7  ;;  %vm9020_vm12 = vmmov %vm9011_vm5 }
 0x34d   : > { %v3984_v19 = vmax.f32 %v3920_v57, %v3968_v31  ;;  %v3880_v22 = vrot.slane %v7870_v7, 7  ;;  %v3951_v29 = vsel %vm9016_vm11, %v3935_v5, %v3943_v45  ;;  %v3816_v0 = vrot.slane %v7870_v7, 2  ;;  %vm9021_vm13 = vmmov %vm8999_vm7 }
 0x34e   : > { %v3857_v38 = vmax.f32 %v3793_v17, %v3841_v50  ;;  %v3760_v36 = vsel %vm9017_vm8, %v3744_v39, %v3752_v9  ;;  %v3936_v21 = vrot.slane %v7873_v33, 6  ;;  %v3768_v30 = vsel %vm9020_vm12, %v3752_v9, %v3744_v39  ;;  %vm9022_vm2 = vmmov %vm9013_vm14 }
 0x34f   : > { %4787 = vmatprep.mubr.msk.f32.mxu0 %vm9018_vm10, %v3984_v19  ;;  %v3794_v4 = vmax.f32 %v7873_v33, %v3760_v36  ;;  %v3896_v63 = vsel %vm9019_vm15, %v3880_v22, %v3872_v28  ;;  %v3824_v5 = vsel %vm9021_vm13, %v3808_v18, %v3816_v0  ;;  %v3944_v10 = vrot.slane %v7870_v7, 6  ;;  %vm9023_vm5 = vmmov %vm8999_vm7 }
 0x350   : > { %v3921_v59 = vmax.f32 %v3857_v38, %v3887_v2  ;;  %v3779_v51 = vsel %vm9022_vm2, %v3768_v30, -1e+30  ;;  %v3832_v45 = vsel %vm9023_vm5, %v3816_v0, %v3808_v18  ;;  %v3686_v48 = vmax.f32 %v7784_v42, %v7826_v6  ;;  %vm9024_vm7 = vmmov %vm9012_vm9 }
 0x351   : > { %v3858_v33 = vmax.f32 %v3794_v4, %v3824_v5  ;;  %v3795_v60 = vmax.f32 %v7870_v7, %v3779_v51  ;;  %v3906_v15 = vsel %vm9024_vm7, %v3896_v63, -1e+30  ;;  %vm9025_vm9 = vmmov %vm9016_vm11  ;;  %v3700_v1 = vmax.f32 %v3684_v14, %v7826_v6 }
 0x352   : > { %v3985_v61 = vmax.f32 %v3921_v59, %v3951_v29  ;;  %v3960_v44 = vsel %vm9025_vm9, %v3944_v10, %v3936_v21  ;;  %vm9026_vm14 = vmmov %vm9015_vm6  ;;  %v3689_v42 = vmax.f32 %v7808_v35, %v7851_v26  ;;  %v3703_v17 = vmax.f32 %v3687_v43, %v7851_v26 }
 0x353   : > { %v3843_v56 = vsel %vm9026_vm14, %v3832_v45, -1e+30  ;;  %vm9027_vm4 = vmmov %vm9018_vm10  ;;  %v3922_v7 = vmax.f32 %v3858_v33, %v3906_v15  ;;  %v3716_v14 = vmax.f32 %v3700_v1, %v7865_v47  ;;  %vm9028_vm0 = vcmp.ge.s32.totalorder %v4975_v3, 2 }
 0x354   : > { %4788 = vmatmul.mubr.msk.f32.gmra.mxu0 %vm9027_vm4, %v3985_v61  ;;  %v3859_v31 = vmax.f32 %v3795_v60, %v3843_v56  ;;  %v3970_v18 = vsel %vm9028_vm0, %v3960_v44, -1e+30  ;;  %vm9029_vm6 = vmmov %vm9019_vm15  ;;  %v3688_v29 = vmax.f32 %v7826_v6, %v7865_v47  ;;  %v3702_v36 = vmax.f32 %v3686_v48, %v7865_v47 }
 0x355   : > { %v3888_v35 = vsel %vm9029_vm6, %v3872_v28, %v3880_v22  ;;  %v3986_v19 = vmax.f32 %v3922_v7, %v3970_v18  ;;  %vm9030_vm11 = vmmov %vm9025_vm9 }
 0x356   : > { %v3923_v38 = vmax.f32 %v3859_v31, %v3888_v35  ;;  %v3952_v28 = vsel %vm9030_vm11, %v3936_v21, %v3944_v10  ;;  %vm9033_vm10 = vmmov %vm9020_vm12 }
 0x357   : > { %vm9034_vm15 = vmmov %vm9023_vm5 }
 0x358   : > { %v3987_v59 = vmax.f32 %v3923_v38, %v3952_v28  ;;  %vm9035_vm12 = vmmov %vm9029_vm6 }
 0x359   : > { %vm9037_vm13 = vmmov %vm9024_vm7 }
 0x35a   : > { %vm9038_vm2 = vmmov %vm9033_vm10 }
 0x35b   : > { %vm9039_vm7 = vmmov %vm9028_vm0 }
 0x35c   : > { %vm9043_vm11 = vmmov %vm9023_vm5 }
 0x35d   : > { %v4769_v57 = vpop.f32.mrf.mxu1 }
 0x35e   : > { %v7940_v2 = vadd.f32 %v4769_v57, %v7347_v13  ;;  %v7944_v50 = vsel %vm8875_vm1, %v4769_v57, -1e+30 }
 0x35f   : > { %v7948_v39 = vmax.f32 %v3717_v37, %v7944_v50  ;;  %v3589_v9 = vpop.f32.mrf.mxu1  ;;  %v3719_v25 = vmax.f32 %v3703_v17, %v7944_v50  ;;  %v3691_v22 = vmax.f32 %v7851_v26, %v7944_v50 }
 0x360   : > { %v7955_v43 = vadd.f32 %v3589_v9, %v7366_v16  ;;  %v7959_v13 = vsel %vm8875_vm1, %v3589_v9, -1e+30  ;;  %v7970_v16 = vmax.f32 %v3689_v42, %v7944_v50  ;;  %vm9031_vm1 = vmmov %vm9027_vm4 }
 0x361   : > { %v7965_v0 = vmax.f32 %v3716_v14, %v7959_v13  ;;  %4790 = vmatprep.mubr.msk.f32.mxu0 %vm9031_vm1, %v3986_v19  ;;  %v3753_v4 = vrot.slane %v7948_v39, 1  ;;  %v7981_v5 = vmax.f32 %v3688_v29, %v7959_v13  ;;  %v3718_v10 = vmax.f32 %v3702_v36, %v7959_v13  ;;  %vm9032_vm8 = vmmov %vm9031_vm1 }
 0x362   : > { %4791 = vmatmul.mubr.msk.f32.gmra.mxu0 %vm9032_vm8, %v3987_v59  ;;  %v3817_v26 = vrot.slane %v7948_v39, 2  ;;  %v3881_v51 = vrot.slane %v7948_v39, 7  ;;  %v3690_v15 = vmax.f32 %v7865_v47, %v7959_v13  ;;  %v3945_v44 = vrot.slane %v7948_v39, 6  ;;  %vm9041_vm4 = vmmov %vm9038_vm2 }
 0x363   : > { %v3745_v6 = vrot.slane %v7965_v0, 1  ;;  %v3809_v63 = vrot.slane %v7965_v0, 2  ;;  %v3873_v30 = vrot.slane %v7965_v0, 7  ;;  %v3937_v33 = vrot.slane %v7965_v0, 6  ;;  %vm9042_vm0 = vmmov %vm9031_vm1 }
 0x364   : > { %vm9044_vm1 = vmmov %vm9038_vm2 }
 0x365   : > { %v3761_v61 = vsel %vm9033_vm10, %v3745_v6, %v3753_v4  ;;  %v3897_v57 = vsel %vm9035_vm12, %v3881_v51, %v3873_v30  ;;  %v3769_v35 = vsel %vm9038_vm2, %v3753_v4, %v3745_v6  ;;  %vm9045_vm8 = vmmov %vm9029_vm6 }
 0x366   : > { %v3796_v37 = vmax.f32 %v7965_v0, %v3761_v61  ;;  %v3908_v18 = vsel %vm9037_vm13, %v3897_v57, -1e+30  ;;  %vm9050_vm2 = vmmov %vm9039_vm7 }
 0x367   : > { %v4772_v21 = vpop.f32.mrf.mxu1 }
 0x368   : > { %v7988_v45 = vadd.f32 %v4772_v21, %v7397_v11  ;;  %v7992_v53 = vsel %vm8888_vm3, %v4772_v21, -1e+30  ;;  %v3825_v11 = vsel %vm9034_vm15, %v3809_v63, %v3817_v26  ;;  %vm9047_vm15 = vnez %v8915_v8 }
 0x369   : > { %v7998_v60 = vmax.f32 %v3719_v25, %v7992_v53  ;;  %v3599_v48 = vpop.f32.mrf.mxu1  ;;  %v3721_v7 = vmax.f32 %v7970_v16, %v7992_v53  ;;  %v3693_v31 = vmax.f32 %v7944_v50, %v7992_v53  ;;  %v8020_v42 = vmax.f32 %v3691_v22, %v7992_v53 }
 0x36a   : > { %v8006_v56 = vadd.f32 %v3599_v48, %v7410_v32  ;;  %v3670_v1 = vsel %vm8888_vm3, %v3599_v48, -1e+30  ;;  %v3860_v17 = vmax.f32 %v3796_v37, %v3825_v11  ;;  %vm9036_vm3 = vmmov %vm9025_vm9  ;;  %v3833_v50 = vsel %vm9023_vm5, %v3817_v26, %v3809_v63 }
 0x36b   : > { %v8015_v47 = vmax.f32 %v3718_v10, %v3670_v1  ;;  %v3754_v32 = vrot.slane %v7998_v60, 1  ;;  %v3720_v46 = vmax.f32 %v7981_v5, %v3670_v1  ;;  %v3961_v14 = vsel %vm9036_vm3, %v3945_v44, %v3937_v33  ;;  %vm9046_vm10 = vmmov %vm9036_vm3 }
 0x36c   : > { %v3692_v19 = vmax.f32 %v7959_v13, %v3670_v1  ;;  %v3924_v38 = vmax.f32 %v3860_v17, %v3908_v18  ;;  %v3972_v29 = vsel %vm9039_vm7, %v3961_v14, -1e+30  ;;  %vm9040_vm9 = vcmp.lt.s32.totalorder %v4997_v12, 15  ;;  %vm9048_vm12 = vmmov %vm9036_vm3 }
 0x36d   : > { %v3746_v9 = vrot.slane %v8015_v47, 1  ;;  %v3781_v36 = vsel %vm9040_vm9, %v3769_v35, -1e+30  ;;  %v3845_v28 = vsel %vm9026_vm14, %v3833_v50, -1e+30  ;;  %v3810_v25 = vrot.slane %v8015_v47, 2  ;;  %vm9049_vm3 = vmmov %vm9023_vm5 }
 0x36e   : > { %v3797_v0 = vmax.f32 %v7948_v39, %v3781_v36  ;;  %v3988_v22 = vmax.f32 %v3924_v38, %v3972_v29  ;;  %v3818_v59 = vrot.slane %v7998_v60, 2  ;;  %v3874_v6 = vrot.slane %v8015_v47, 7  ;;  %vm9051_vm5 = vmmov %vm9040_vm9 }
 0x36f   : > { %v3762_v16 = vsel %vm9041_vm4, %v3746_v9, %v3754_v32  ;;  %v3882_v63 = vrot.slane %v7998_v60, 7  ;;  %v3938_v39 = vrot.slane %v8015_v47, 6  ;;  %v3946_v21 = vrot.slane %v7998_v60, 6  ;;  %vm9052_vm7 = vmmov %vm9042_vm0 }
 0x370   : > { %v3798_v13 = vmax.f32 %v8015_v47, %v3762_v16  ;;  %v3861_v4 = vmax.f32 %v3797_v0, %v3845_v28  ;;  %v8050_v5 = vmax.f32 %v3690_v15, %v3670_v1  ;;  %4793 = vmatprep.mubr.msk.f32.mxu0 %vm9042_vm0, %v3988_v22  ;;  %v3889_v10 = vsel %vm9029_vm6, %v3873_v30, %v3881_v51  ;;  %vm9053_vm9 = vmmov %vm9026_vm14 }
 0x371   : > { %v3826_v26 = vsel %vm9043_vm11, %v3810_v25, %v3818_v59  ;;  %v3770_v53 = vsel %vm9044_vm1, %v3754_v32, %v3746_v9  ;;  %v3898_v37 = vsel %vm9045_vm8, %v3882_v63, %v3874_v6  ;;  %v3962_v15 = vsel %vm9046_vm10, %v3946_v21, %v3938_v39  ;;  %vm9054_vm14 = vmmov %vm9042_vm0 }
 0x372   : > { %v3925_v48 = vmax.f32 %v3861_v4, %v3889_v10  ;;  %v3862_v11 = vmax.f32 %v3798_v13, %v3826_v26  ;;  %v3953_v51 = vsel %vm9048_vm12, %v3937_v33, %v3945_v44  ;;  %v3834_v57 = vsel %vm9049_vm3, %v3818_v59, %v3810_v25  ;;  %vm9055_vm4 = vmmov %vm9029_vm6 }
 0x373   : > { %v3910_v14 = vsel %vm9037_vm13, %v3898_v37, -1e+30  ;;  %v3783_v44 = vsel %vm9051_vm5, %v3770_v53, -1e+30  ;;  %v3847_v25 = vsel %vm9053_vm9, %v3834_v57, -1e+30  ;;  %vm9056_vm0 = vmmov %vm9046_vm10 }
 0x374   : > { %v3989_v17 = vmax.f32 %v3925_v48, %v3953_v51  ;;  %v3926_v33 = vmax.f32 %v3862_v11, %v3910_v14  ;;  %v3799_v0 = vmax.f32 %v7998_v60, %v3783_v44  ;;  %v3954_v60 = vsel %vm9056_vm0, %v3938_v39, %v3946_v21  ;;  %vm9057_vm6 = vmmov %vm9044_vm1 }
 0x375   : > { %vm9060_vm1 = vmmov %vm9055_vm4 }
 0x376   : > { %v4775_v61 = vpop.f32.mrf.mxu1  ;;  %4794 = vmatmul.mubr.msk.f32.gmra.mxu0 %vm9052_vm7, %v3989_v17  ;;  %vm9061_vm8 = vmmov %vm9049_vm3 }
 0x377   : > { %v8064_v1 = vadd.f32 %v4775_v61, %v7503_v27  ;;  %v3673_v30 = vsel %vm9047_vm15, %v4775_v61, -1e+30  ;;  %v3974_v27 = vsel %vm9050_vm2, %v3962_v15, -1e+30  ;;  %vm9062_vm10 = vmmov %vm9056_vm0 }
 0x378   : > { %v8072_v47 = vmax.f32 %v3721_v7, %v3673_v30  ;;  %v3609_v32 = vpop.f32.mrf.mxu1  ;;  %v3709_v50 = vmax.f32 %v3693_v31, %v3673_v30  ;;  %v3723_v38 = vmax.f32 %v8020_v42, %v3673_v30  ;;  %v3863_v31 = vmax.f32 %v3799_v0, %v3847_v25  ;;  %vm9064_vm12 = vmmov %vm9037_vm13 }
 0x379   : > { %v8079_v9 = vadd.f32 %v3609_v32, %v7517_v55  ;;  %v3672_v18 = vsel %vm9047_vm15, %v3609_v32, -1e+30  ;;  %v3990_v55 = vmax.f32 %v3926_v33, %v3974_v27  ;;  %vm9063_vm15 = vmmov %vm9057_vm6 }
 0x37a   : > { %v3755_v7 = vrot.slane %v8072_v47, 1  ;;  %v3736_v35 = vmax.f32 %v3720_v46, %v3672_v18  ;;  %v3819_v29 = vrot.slane %v8072_v47, 2  ;;  %v3708_v36 = vmax.f32 %v3692_v19, %v3672_v18  ;;  %vm9065_vm3 = vmmov %vm9050_vm2 }
 0x37b   : > { %v3722_v16 = vmax.f32 %v8050_v5, %v3672_v18  ;;  %4796 = vmatprep.mubr.msk.f32.mxu0 %vm9054_vm14, %v3990_v55  ;;  %v3883_v42 = vrot.slane %v8072_v47, 7  ;;  %v3890_v19 = vsel %vm9055_vm4, %v3874_v6, %v3882_v63  ;;  %v3947_v4 = vrot.slane %v8072_v47, 6  ;;  %v9058_v5 = vld [vmem:[#allocation4_spill] sm:$0xff]  ;;  %vm9066_vm13 = vmmov %vm9052_vm7 }
 0x37c   : > { %v3747_v8 = vrot.slane %v3736_v35, 1  ;;  %v3811_v28 = vrot.slane %v3736_v35, 2  ;;  %v3875_v46 = vrot.slane %v3736_v35, 7  ;;  %v3939_v22 = vrot.slane %v3736_v35, 6  ;;  %vm9067_vm2 = vmmov %vm9051_vm5 }
 0x37d   : > { %vm9059_vm11 = vnez %v9058_v5  ;;  %v3927_v26 = vmax.f32 %v3863_v31, %v3890_v19  ;;  %vm9068_vm5 = vmmov %vm9061_vm8 }
 0x37e   : > { %v3763_v59 = vsel %vm9057_vm6, %v3747_v8, %v3755_v7  ;;  %v3899_v61 = vsel %vm9060_vm1, %v3883_v42, %v3875_v46  ;;  %v3827_v6 = vsel %vm9061_vm8, %v3811_v28, %v3819_v29  ;;  %v3963_v63 = vsel %vm9062_vm10, %v3947_v4, %v3939_v22  ;;  %vm9069_vm7 = vmmov %vm9053_vm9 }
 0x37f   : > { %v3800_v53 = vmax.f32 %v3736_v35, %v3763_v59  ;;  %v3771_v39 = vsel %vm9063_vm15, %v3755_v7, %v3747_v8  ;;  %v3991_v15 = vmax.f32 %v3927_v26, %v3954_v60  ;;  %v3912_v32 = vsel %vm9064_vm12, %v3899_v61, -1e+30  ;;  %vm9071_vm14 = vmmov %vm9060_vm1 }
 0x380   : > { %v4778_v13 = vpop.f32.mrf.mxu1  ;;  %v3976_v17 = vsel %vm9065_vm3, %v3963_v63, -1e+30  ;;  %v3785_v18 = vsel %vm9067_vm2, %v3771_v39, -1e+30  ;;  %v3835_v33 = vsel %vm9068_vm5, %v3819_v29, %v3811_v28  ;;  %vm9070_vm9 = vnez %v8939_v23  ;;  %vm9072_vm4 = vmmov %vm9056_vm0 }
 0x381   : > { %v3675_v10 = vsel %vm9059_vm11, %v4778_v13, -1e+30  ;;  %v3864_v30 = vmax.f32 %v3800_v53, %v3827_v6  ;;  %4797 = vmatmul.mubr.msk.f32.gmra.mxu0 %vm9066_vm13, %v3991_v15  ;;  %v3955_v13 = vsel %vm9072_vm4, %v3939_v22, %v3947_v4  ;;  %vm9073_vm0 = vmmov %vm9057_vm6 }
 0x382   : > { %v8106_v48 = vmax.f32 %v3723_v38, %v3675_v10  ;;  %v3619_v11 = vpop.f32.mrf.mxu1  ;;  %v3725_v21 = vmax.f32 %v3709_v50, %v3675_v10  ;;  %v3801_v50 = vmax.f32 %v8072_v47, %v3785_v18  ;;  %v3849_v38 = vsel %vm9069_vm7, %v3835_v33, -1e+30  ;;  %vm9074_vm6 = vmmov %vm9066_vm13 }
 0x383   : > { %v3674_v37 = vsel %vm9059_vm11, %v3619_v11, -1e+30  ;;  %v3928_v27 = vmax.f32 %v3864_v30, %v3912_v32  ;;  %v3891_v47 = vsel %vm9071_vm14, %v3875_v46, %v3883_v42  ;;  %vm9075_vm11 = vmmov %vm9068_vm5 }
 0x384   : > { %v3756_v51 = vrot.slane %v8106_v48, 1  ;;  %v3820_v57 = vrot.slane %v8106_v48, 2  ;;  %v8122_v14 = vmax.f32 %v3722_v16, %v3674_v37  ;;  %v3884_v44 = vrot.slane %v8106_v48, 7  ;;  %vm9076_vm8 = vmmov %vm9073_vm0 }
 0x385   : > { %v3724_v7 = vmax.f32 %v3708_v36, %v3674_v37  ;;  %v3992_v28 = vmax.f32 %v3928_v27, %v3976_v17  ;;  %v3865_v36 = vmax.f32 %v3801_v50, %v3849_v38  ;;  %v3948_v4 = vrot.slane %v8106_v48, 6  ;;  %vm9077_vm10 = vmmov %vm9072_vm4 }
 0x386   : > { %v3748_v55 = vrot.slane %v8122_v14, 1  ;;  %v3812_v0 = vrot.slane %v8122_v14, 2  ;;  %v3876_v8 = vrot.slane %v8122_v14, 7  ;;  %v3940_v60 = vrot.slane %v8122_v14, 6  ;;  %vm9078_vm15 = vmmov %vm9067_vm2 }
 0x387   : > { %v4781_v35 = vpop.f32.mrf.mxu1  ;;  %4799 = vmatprep.mubr.msk.f32.mxu0 %vm9074_vm6, %v3992_v28  ;;  %v3929_v42 = vmax.f32 %v3865_v36, %v3891_v47  ;;  %vm9079_vm3 = vmmov %vm9068_vm5  ;;  %vm9081_vm2 = vcmp.ge.s32.totalorder %v4975_v3, 2 }
 0x388   : > { %v3677_v16 = vsel %vm9070_vm9, %v4781_v35, -1e+30  ;;  %v3764_v19 = vsel %vm9073_vm0, %v3748_v55, %v3756_v51  ;;  %v3828_v10 = vsel %vm9075_vm11, %v3812_v0, %v3820_v57  ;;  %v3900_v23 = vsel %vm9060_vm1, %v3884_v44, %v3876_v8  ;;  %vm9080_vm13 = vmmov %vm9074_vm6 }
 0x389   : > { %v8138_v25 = vmax.f32 %v3725_v21, %v3677_v16  ;;  %v3629_v29 = vpop.f32.mrf.mxu1  ;;  %v3802_v22 = vmax.f32 %v8122_v14, %v3764_v19  ;;  %v3772_v11 = vsel %vm9076_vm8, %v3756_v51, %v3748_v55  ;;  %v3993_v6 = vmax.f32 %v3929_v42, %v3955_v13  ;;  %vm9082_vm5 = vmmov %vm9069_vm7 }
 0x38a   : > { %v3676_v31 = vsel %vm9070_vm9, %v3629_v29, -1e+30  ;;  %v3964_v39 = vsel %vm9077_vm10, %v3948_v4, %v3940_v60  ;;  %v3787_v21 = vsel %vm9078_vm15, %v3772_v11, -1e+30  ;;  %v3914_v15 = vsel %vm9064_vm12, %v3900_v23, -1e+30  ;;  %vm9083_vm7 = vmmov %vm9073_vm0 }
 0x38b   : > { %v3757_v59 = vrot.slane %v8138_v25, 1  ;;  %v3740_v5 = vmax.f32 %v3724_v7, %v3676_v31  ;;  %v3821_v46 = vrot.slane %v8138_v25, 2  ;;  %v3866_v63 = vmax.f32 %v3802_v22, %v3828_v10  ;;  %4800 = vmatmul.mubr.msk.f32.gmra.mxu0 %vm9080_vm13, %v3993_v6  ;;  %vm9084_vm9 = vmmov %vm9060_vm1 }
 0x38c   : > { %v3885_v37 = vrot.slane %v8138_v25, 7  ;;  %v3803_v30 = vmax.f32 %v8106_v48, %v3787_v21  ;;  %v3836_v32 = vsel %vm9079_vm3, %v3820_v57, %v3812_v0  ;;  %v3978_v17 = vsel %vm9081_vm2, %v3964_v39, -1e+30  ;;  %vm9085_vm14 = vmmov %vm9060_vm1 }
 0x38d   : > { %v3749_v26 = vrot.slane %v3740_v5, 1  ;;  %v3813_v53 = vrot.slane %v3740_v5, 2  ;;  %v3877_v61 = vrot.slane %v3740_v5, 7  ;;  %v3930_v51 = vmax.f32 %v3866_v63, %v3914_v15  ;;  %vm9086_vm4 = vmmov %vm9079_vm3 }
 0x38e   : > { %v3851_v14 = vsel %vm9082_vm5, %v3836_v32, -1e+30  ;;  %v3892_v33 = vsel %vm9084_vm9, %v3876_v8, %v3884_v44  ;;  %v3941_v50 = vrot.slane %v3740_v5, 6  ;;  %v3949_v38 = vrot.slane %v8138_v25, 6  ;;  %vm9087_vm6 = vmmov %vm9079_vm3 }
 0x38f   : > { %v3765_v27 = vsel %vm9083_vm7, %v3749_v26, %v3757_v59  ;;  %v3867_v18 = vmax.f32 %v3803_v30, %v3851_v14  ;;  %v3901_v57 = vsel %vm9085_vm14, %v3885_v37, %v3877_v61  ;;  %v3994_v7 = vmax.f32 %v3930_v51, %v3978_v17  ;;  %vm9088_vm11 = vmmov %vm9080_vm13 }
 0x390   : > { %v3804_v48 = vmax.f32 %v3740_v5, %v3765_v27  ;;  %v3829_v35 = vsel %vm9086_vm4, %v3813_v53, %v3821_v46  ;;  %v3773_v16 = vsel %vm9073_vm0, %v3757_v59, %v3749_v26  ;;  %v3837_v29 = vsel %vm9087_vm6, %v3821_v46, %v3813_v53  ;;  %vm9089_vm1 = vmmov %vm9077_vm10 }
 0x391   : > { %v3931_v55 = vmax.f32 %v3867_v18, %v3892_v33  ;;  %4802 = vmatprep.mubr.msk.f32.mxu0 %vm9088_vm11, %v3994_v7  ;;  %v3956_v44 = vsel %vm9089_vm1, %v3940_v60, %v3948_v4  ;;  %vm9090_vm8 = vmmov %vm9064_vm12  ;;  %v3789_v36 = vsel %vm9078_vm15, %v3773_v16, -1e+30 }
 0x392   : > { %v3868_v0 = vmax.f32 %v3804_v48, %v3829_v35  ;;  %v3916_v8 = vsel %vm9090_vm8, %v3901_v57, -1e+30  ;;  %vm9091_vm10 = vmmov %vm9089_vm1  ;;  %v3805_v13 = vmax.f32 %v8138_v25, %v3789_v36 }
 0x393   : > { %v3965_v28 = vsel %vm9091_vm10, %v3949_v38, %v3941_v50  ;;  %v3995_v47 = vmax.f32 %v3931_v55, %v3956_v44  ;;  %vm9092_vm12 = vmmov %vm9081_vm2 }
 0x394   : > { %v3932_v31 = vmax.f32 %v3868_v0, %v3916_v8  ;;  %v3980_v19 = vsel %vm9092_vm12, %v3965_v28, -1e+30  ;;  %vm9093_vm3 = vmmov %vm9082_vm5 }
 0x395   : > { %v3853_v60 = vsel %vm9093_vm3, %v3837_v29, -1e+30  ;;  %vm9094_vm13 = vmmov %vm9088_vm11 }
 0x396   : > { %4803 = vmatmul.mubr.msk.f32.gmra.mxu0 %vm9094_vm13, %v3995_v47  ;;  %v3996_v59 = vmax.f32 %v3932_v31, %v3980_v19  ;;  %v3869_v5 = vmax.f32 %v3805_v13, %v3853_v60  ;;  %vm9095_vm2 = vmmov %vm9084_vm9 }
 0x397   : > { %v3893_v10 = vsel %vm9095_vm2, %v3877_v61, %v3885_v37  ;;  %vm9096_vm5 = vmmov %vm9088_vm11 }
 0x398   : > { %4805 = vmatprep.mubr.msk.f32.mxu0 %vm9096_vm5, %v3996_v59  ;;  %v3933_v23 = vmax.f32 %v3869_v5, %v3893_v10  ;;  %vm9097_vm7 = vmmov %vm9089_vm1 }
 0x399   : > { %v3957_v46 = vsel %vm9097_vm7, %v3941_v50, %v3949_v38  ;;  %vm9098_vm9 = vmmov %vm9096_vm5 }
 0x39a   : > { %v3997_v25 = vmax.f32 %v3933_v23, %v3957_v46  ;;  %vm9099_vm14 = vmmov %vm9096_vm5 }
 0x39b   : > { %vm9100_vm4 = vmmov %vm9096_vm5 }
 0x39c   : > { %4806 = vmatmul.mubr.msk.f32.gmra.mxu0 %vm9098_vm9, %v3997_v25  ;;  %vm9101_vm0 = vmmov %vm9100_vm4 }
 0x39d   : > { %vm9102_vm6 = vmmov %vm9101_vm0 }
 0x39e   : > { %vm9103_vm11 = vmmov %vm9101_vm0 }
 0x39f   : > { %vm9104_vm1 = vmmov %vm9101_vm0 }
 0x3a0   : > { %vm9105_vm8 = vmmov %vm9101_vm0 }
 0x3a1   : > { %vm9106_vm10 = vmmov %vm9101_vm0 }
 0x3a2   : > { %vm9107_vm15 = vmmov %vm9101_vm0 }
 0x3a3   : > { %vm9108_vm12 = vmmov %vm9101_vm0 }
 0x3a4   : > { %vm9109_vm3 = vmmov %vm9101_vm0 }
 0x3a5   : > { %vm9110_vm13 = vmmov %vm9101_vm0 }
 0x3a6   : > { %vm9111_vm2 = vmmov %vm9101_vm0 }
 0x3a7   : > { %vm9112_vm5 = vmmov %vm9101_vm0 }
 0x3a8   : > { %vm9113_vm7 = vmmov %vm9101_vm0 }
 0x3a9   : > { %vm9114_vm9 = vmmov %vm9101_vm0 }
 0x406   : > { %v4786_v12 = vpop.f32.mrf.mxu0 }
 0x407   : > { %v4197_v42 = vadd.f32 %v4786_v12, %v7736_v40 }
 0x408   : > { %v4117_v3 = vpop.f32.mrf.mxu0 }
 0x409   : > { %4213 = vst.msk [vmem:[%s8214_s14 + $0x8] sm:$0xff] %vm9099_vm14, %v4197_v42  ;;  %v4196_v22 = vadd.f32 %v4117_v3, %v7739_v54 }
 0x40b   : > { %4212 = vst.msk [vmem:[%s8214_s14] sm:$0xff] %vm9100_vm4, %v4196_v22 }
 0x414   : > { %v4789_v4 = vpop.f32.mrf.mxu0 }
 0x415   : > { %v4199_v26 = vadd.f32 %v4789_v4, %v7742_v62 }
 0x416   : > { %v4127_v53 = vpop.f32.mrf.mxu0 }
 0x417   : > { %4215 = vst.msk [vmem:[%s8214_s14 + $0x18] sm:$0xff] %vm9101_vm0, %v4199_v26  ;;  %v4198_v61 = vadd.f32 %v4127_v53, %v7747_v24 }
 0x419   : > { %4214 = vst.msk [vmem:[%s8214_s14 + $0x10] sm:$0xff] %vm9102_vm6, %v4198_v61 }
 0x422   : > { %v4792_v40 = vpop.f32.mrf.mxu0 }
 0x423   : > { %v4201_v11 = vadd.f32 %v4792_v40, %v7769_v58 }
 0x424   : > { %v4137_v54 = vpop.f32.mrf.mxu0 }
 0x425   : > { %4217 = vst.msk [vmem:[%s8214_s14 + $0x28] sm:$0xff] %vm9103_vm11, %v4201_v11  ;;  %v4200_v6 = vadd.f32 %v4137_v54, %v7780_v52 }
 0x427   : > { %4216 = vst.msk [vmem:[%s8214_s14 + $0x20] sm:$0xff] %vm9104_vm1, %v4200_v6 }
 0x436   : > { %v4795_v62 = vpop.f32.mrf.mxu0 }
 0x437   : > { %v4203_v63 = vadd.f32 %v4795_v62, %v7804_v20 }
 0x438   : > { %v4147_v24 = vpop.f32.mrf.mxu0 }
 0x439   : > { %4219 = vst.msk [vmem:[%s8214_s14 + $0x38] sm:$0xff] %vm9105_vm8, %v4203_v63  ;;  %v4202_v39 = vadd.f32 %v4147_v24, %v7822_v49 }
 0x43b   : > { %4218 = vst.msk [vmem:[%s8214_s14 + $0x30] sm:$0xff] %vm9106_vm10, %v4202_v39 }
 0x441   : > { %v4798_v58 = vpop.f32.mrf.mxu0 }
 0x442   : > { %v4205_v21 = vadd.f32 %v4798_v58, %v7847_v34 }
 0x443   : > { %v4157_v52 = vpop.f32.mrf.mxu0 }
 0x444   : > { %4221 = vst.msk [vmem:[%s8214_s14 + $0x48] sm:$0xff] %vm9107_vm15, %v4205_v21  ;;  %v4204_v37 = vadd.f32 %v4157_v52, %v7861_v41 }
 0x446   : > { %4220 = vst.msk [vmem:[%s8214_s14 + $0x40] sm:$0xff] %vm9108_vm12, %v4204_v37 }
 0x44b   : > { %v4801_v20 = vpop.f32.mrf.mxu0 }
 0x44c   : > { %v4207_v15 = vadd.f32 %v4801_v20, %v7940_v2 }
 0x44d   : > { %v4167_v49 = vpop.f32.mrf.mxu0 }
 0x44e   : > { %4223 = vst.msk [vmem:[%s8214_s14 + $0x58] sm:$0xff] %vm9109_vm3, %v4207_v15  ;;  %v4206_v30 = vadd.f32 %v4167_v49, %v7955_v43 }
 0x450   : > { %4222 = vst.msk [vmem:[%s8214_s14 + $0x50] sm:$0xff] %vm9110_vm13, %v4206_v30 }
 0x456   : > { %v4804_v34 = vpop.f32.mrf.mxu0 }
 0x457   : > { %v4209_v32 = vadd.f32 %v4804_v34, %v7988_v45 }
 0x458   : > { %v4177_v51 = vpop.f32.mrf.mxu0 }
 0x459   : > { %4225 = vst.msk [vmem:[%s8214_s14 + $0x68] sm:$0xff] %vm9111_vm2, %v4209_v32  ;;  %v4208_v41 = vadd.f32 %v4177_v51, %v8006_v56 }
 0x45b   : > { %4224 = vst.msk [vmem:[%s8214_s14 + $0x60] sm:$0xff] %vm9112_vm5, %v4208_v41 }
 0x45c   : > { %v4807_v17 = vpop.f32.mrf.mxu0 }
 0x45d   : > { %v4211_v2 = vadd.f32 %v4807_v17, %v8064_v1 }
 0x45e   : > { %v4187_v14 = vpop.f32.mrf.mxu0 }
 0x45f   : > { %4227 = vst.msk [vmem:[%s8214_s14 + $0x78] sm:$0xff] %vm9113_vm7, %v4211_v2  ;;  %v4210_v43 = vadd.f32 %v4187_v14, %v8079_v9 }
 0x461   : > { %4226 = vst.msk [vmem:[%s8214_s14 + $0x70] sm:$0xff] %vm9114_vm9, %v4210_v43 }
 0x462 PF: > { %s14_s19 = sadd.s32 1, %s4902_s19   ;;  %s9115_s15 = smov %s4894_s17 }
 0x463   : > { %p11_p11 = scmp.ge.s32.totalorder %s14_s19, 6   ;;  %s9116_s16 = smov %s4898_s18 }
 0x464   : > { %s9117_s17 = smov %s9120_s20  ;;  %s9118_s18 = smov %s9124_s21 }
 0x465   :  { %13 = sbr.rel (!%p11_p11) target bundleno = 3 (0x3), region = 75 }

</bundles_post_ra>
